<compile_context>
chip_gen: v7x
topology: tpu7x:2x2x1
jax: 0.10.0
libtpu: 0.0.40
codegen_flags: <defaults>
</compile_context>

<pallas_src>
import functools

import jax
import jax.numpy as jnp
from jax.experimental import pallas as pl
from jax.experimental.pallas import tpu as pltpu

_LANE = 128      # vreg lane width
_SUBLANE = 8     # vreg sublane count


def _round_up(x, m):
    return (x + m - 1) // m * m


def _vmem_capacity_bytes():
    """Per-TensorCore VMEM capacity; conservative fallback = v7x (64 MiB)."""
    try:
        return int(pltpu.get_tpu_info().vmem_capacity_bytes)
    except Exception:
        return 64 * 1024 * 1024


def _num_tensorcores():
    """Best-effort count of TensorCores per device (v7x has 2)."""
    try:
        dev = jax.devices()[0]
        n = getattr(dev, "num_cores", None)
        if n and int(n) > 1:
            return int(n)
        kind = str(getattr(dev, "device_kind", "")).lower()
        if "v7" in kind:
            return 2
    except Exception:
        pass
    return 1


# ----------------------------------------------------------------------------
# Pallas kernel: recurrent part of one LSTM layer, one (batch-block, time-chunk).
# ----------------------------------------------------------------------------
def _lstm_recurrent_kernel(gx_ref, bias_ref, whh_ref, out_ref, hn_ref, cn_ref,
                           h_sc, c_sc, *, hp, block_t, seq_len, mxu_dtype,
                           unroll):
    """One chunk of `block_t` timesteps for one batch sub-block.

    gx_ref : (block_t, Bb, 4*Hp) compute_dtype  precomputed x @ W_ih.T (no bias)
    bias_ref:(1, 4*Hp) f32                      fused b_ih + b_hh
    whh_ref: (Hp, 4*Hp)                         hidden->gates weights (transposed)
    out_ref: (block_t, Bb, Hp) compute_dtype    h_t for each timestep of chunk
    hn_ref : (Bb, Hp) f32                       final hidden (written last chunk)
    cn_ref : (Bb, Hp) f32                       final cell   (written last chunk)
    h_sc/c_sc : VMEM f32 scratch carrying the recurrence across time chunks.
    """
    t_chunk = pl.program_id(1)

    @pl.when(t_chunk == 0)
    def _():
        h_sc[...] = jnp.zeros_like(h_sc)
        c_sc[...] = jnp.zeros_like(c_sc)

    w_hh = whh_ref[...]          # resident (single-buffered) weights, read once
    bias = bias_ref[...]         # (1, 4*Hp) f32, hoisted out of the step loop

    def step(s, carry):
        h, c = carry
        # Only the hidden projection is inside the recurrence.  h is re-cast to
        # mxu_dtype each step (bf16 path): rounding compounds over very long
        # sequences -- use compute_dtype=f32 if that drift matters.
        gates = (gx_ref[s].astype(jnp.float32) + bias
                 + jnp.dot(h.astype(mxu_dtype), w_hh,
                           preferred_element_type=jnp.float32))
        # Hp is a multiple of 128, so these slices are lane-aligned.
        i_g = jax.nn.sigmoid(gates[:, 0 * hp:1 * hp])
        f_g = jax.nn.sigmoid(gates[:, 1 * hp:2 * hp])
        g_g = jnp.tanh(gates[:, 2 * hp:3 * hp])
        o_g = jax.nn.sigmoid(gates[:, 3 * hp:4 * hp])
        c_new = f_g * c + i_g * g_g
        h_new = o_g * jnp.tanh(c_new)
        if seq_len % block_t != 0:
            # Freeze state for padded timesteps beyond the true sequence end.
            valid = (t_chunk * block_t + s) < seq_len
            h_new = jnp.where(valid, h_new, h)
            c_new = jnp.where(valid, c_new, c)
        out_ref[s] = h_new.astype(out_ref.dtype)
        return h_new, c_new

    h, c = jax.lax.fori_loop(0, block_t, step, (h_sc[...], c_sc[...]),
                             unroll=unroll)
    h_sc[...] = h
    c_sc[...] = c

    # Write final states only once, on the last time chunk of this batch block.
    @pl.when(t_chunk == pl.num_programs(1) - 1)
    def _():
        hn_ref[...] = h
        cn_ref[...] = c


# ----------------------------------------------------------------------------
# Per-layer wrapper: hoisted input projection + Pallas recurrence.
# ----------------------------------------------------------------------------
def lstm_layer_forward(x_tbd, layer, *, block_t=32,
                       compute_dtype=jnp.bfloat16, batch_blocks=None,
                       vmem_limit_bytes=None):
    """Run one LSTM layer over the full (padded) sequence.

    x_tbd : (T, Bp, Dp) time-major, batch padded to 8, features padded to the
            layer's expected input width.
    Returns (out (T, Bp, Hp) compute_dtype, h_n (Bp, Hp) f32, c_n (Bp, Hp) f32).
    """
    t_len, bp, dp = x_tbd.shape
    hp = layer["hp"]
    four_hp = 4 * hp
    assert dp == layer["wih"].shape[0], (dp, layer["wih"].shape)

    # ---- Batch grid split (megacore on v7x).  Each sub-block must stay a
    # multiple of 16 rows so bf16 tiles remain sublane-aligned.
    if batch_blocks is not None:
        nb = int(batch_blocks)
    elif _num_tensorcores() >= 2:
        nb = 2
    else:
        nb = 1
    if nb > 1 and (bp % nb != 0 or (bp // nb) % 16 != 0):
        nb = 1
    bb = bp // nb

    # ---- VMEM-accurate timestep chunk size.
    act_bytes = jnp.dtype(compute_dtype).itemsize
    whh_bytes = hp * four_hp * jnp.dtype(layer["whh"].dtype).itemsize  # 1 buffer
    bias_bytes = four_hp * 4
    scratch_bytes = 2 * bb * hp * 4
    per_t_bytes = (2 * bb * four_hp * act_bytes      # gx tile, double-buffered
                   + 2 * bb * hp * act_bytes)        # out tile, double-buffered
    fixed_bytes = whh_bytes + bias_bytes + scratch_bytes + (1 << 20)
    vmem_cap = _vmem_capacity_bytes()
    budget = int(vmem_cap * 0.5)                     # headroom for compiler scratch
    bt = max(1, min(block_t, t_len,
                    max(1, (budget - fixed_bytes) // per_t_bytes)))
    nt = -(-t_len // bt)
    t_pad = nt * bt

    if vmem_limit_bytes is None:
        required = fixed_bytes + per_t_bytes * bt + (4 << 20)
        vmem_limit_bytes = int(min(max(required, 32 << 20), vmem_cap * 0.9))

    # ---- Vreg-pressure-aware unroll of the in-kernel time loop.
    gates_live_bytes = bb * four_hp * 4              # one f32 gates tile
    if gates_live_bytes > (128 << 10):
        unroll = max(1, min(4, bt))
    elif gates_live_bytes > (64 << 10):
        unroll = max(1, min(8, bt))
    else:
        unroll = True

    # ---- Pad the SEQUENCE on x (width Dp) before the projection matmul
    # (4x cheaper than padding gx, and usually fused into the matmul).
    if t_pad != t_len:
        x_tbd = jnp.pad(x_tbd, ((0, t_pad - t_len), (0, 0), (0, 0)))

    # ---- Input projection for ALL timesteps: one large MXU matmul (f32 acc),
    # stored in compute_dtype (bias is added inside the kernel in f32).
    gx = jnp.dot(x_tbd.reshape(t_pad * bp, dp).astype(compute_dtype),
                 layer["wih"], preferred_element_type=jnp.float32)
    gx = gx.astype(compute_dtype).reshape(t_pad, bp, four_hp)

    kernel = functools.partial(_lstm_recurrent_kernel, hp=hp, block_t=bt,
                               seq_len=t_len, mxu_dtype=compute_dtype,
                               unroll=unroll)

    out, h_n, c_n = pl.pallas_call(
        kernel,
        out_shape=(
            jax.ShapeDtypeStruct((t_pad, bp, hp), compute_dtype),
            jax.ShapeDtypeStruct((bp, hp), jnp.float32),
            jax.ShapeDtypeStruct((bp, hp), jnp.float32),
        ),
        grid_spec=pltpu.PrefetchScalarGridSpec(
            num_scalar_prefetch=0,
            grid=(nb, nt),
            in_specs=[
                pl.BlockSpec((bt, bb, four_hp), lambda b, t: (t, b, 0)),
                # Constant index_map -> single-buffer (no re-DMA, halves VMEM).
                pl.BlockSpec((1, four_hp), lambda b, t: (0, 0),
                             pipeline_mode=pl.Buffered(1)),
                pl.BlockSpec((hp, four_hp), lambda b, t: (0, 0),
                             pipeline_mode=pl.Buffered(1)),
            ],
            out_specs=[
                pl.BlockSpec((bt, bb, hp), lambda b, t: (t, b, 0)),
                pl.BlockSpec((bb, hp), lambda b, t: (b, 0)),
                pl.BlockSpec((bb, hp), lambda b, t: (b, 0)),
            ],
            scratch_shapes=[
                pltpu.VMEM((bb, hp), jnp.float32),
                pltpu.VMEM((bb, hp), jnp.float32),
            ],
        ),
        compiler_params=pltpu.CompilerParams(
            # batch blocks are independent (megacore); time is sequential.
            dimension_semantics=("parallel", "arbitrary"),
            vmem_limit_bytes=vmem_limit_bytes),
    )(gx, layer["bias"], layer["whh"])

    if t_pad != t_len:
        out = out[:t_len]
    return out, h_n, c_n


# ----------------------------------------------------------------------------
# Parameter init (PyTorch nn.LSTM shapes) and one-time preparation.
# ----------------------------------------------------------------------------
def init_multilayer_lstm_params(key, input_size, hidden_size, num_layers,
                                output_size=None):
    """Deterministic synthetic parameters, PyTorch nn.LSTM shapes/init scale."""
    if output_size is None:
        output_size = hidden_size
    params = []
    for l in range(num_layers):
        d_in = input_size if l == 0 else hidden_size
        d_out = hidden_size if l != num_layers - 1 else output_size
        bound = 1.0 / jnp.sqrt(jnp.float32(d_out))
        key, k1, k2, k3, k4 = jax.random.split(key, 5)
        w_ih = jax.random.uniform(k1, (4 * d_out, d_in), jnp.float32, -bound, bound)
        w_hh = jax.random.uniform(k2, (4 * d_out, d_out), jnp.float32, -bound, bound)
        b_ih = jax.random.uniform(k3, (4 * d_out,), jnp.float32, -bound, bound)
        b_hh = jax.random.uniform(k4, (4 * d_out,), jnp.float32, -bound, bound)
        params.append((w_ih, w_hh, b_ih, b_hh))
    return params


def _prepare_layer(w_ih, w_hh, b_ih, b_hh, d_in_padded, compute_dtype):
    """Transpose, lane-pad and (optionally) bf16-cast one layer's weights.

    Padded gate rows/cols and padded h-input columns are zero, so padded H
    columns of the state stay exactly 0 through the recurrence, and padded
    input columns from the previous layer contribute nothing.  (Padded BATCH
    rows are nonzero but never mix with real rows and are always sliced off.)
    """
    four_h, d_in = w_ih.shape
    h = four_h // 4
    hp = _round_up(h, _LANE)
    assert d_in_padded >= d_in

    def gate_wih(k):
        blk = jnp.asarray(w_ih[k * h:(k + 1) * h, :], jnp.float32).T     # (d_in, h)
        return jnp.pad(blk, ((0, d_in_padded - d_in), (0, hp - h)))

    def gate_whh(k):
        blk = jnp.asarray(w_hh[k * h:(k + 1) * h, :], jnp.float32).T     # (h_in, h_out)
        return jnp.pad(blk, ((0, hp - h), (0, hp - h)))

    def gate_bias(k):
        b = (jnp.asarray(b_ih[k * h:(k + 1) * h], jnp.float32)
             + jnp.asarray(b_hh[k * h:(k + 1) * h], jnp.float32))
        return jnp.pad(b, (0, hp - h))

    wih = jnp.concatenate([gate_wih(k) for k in range(4)], axis=1).astype(compute_dtype)
    whh = jnp.concatenate([gate_whh(k) for k in range(4)], axis=1).astype(compute_dtype)
    bias = jnp.concatenate([gate_bias(k) for k in range(4)], axis=0)     # f32 (4*hp,)
    bias = bias.reshape(1, 4 * hp)                                       # lane-major
    return {"wih": wih, "whh": whh, "bias": bias, "h": h, "hp": hp}


def prepare_multilayer_lstm_params(raw_params, compute_dtype=jnp.bfloat16):
    """One-time weight prep (transpose / pad / cast), outside the per-call path."""
    prepared = []
    d_in_padded = raw_params[0][0].shape[1]            # layer-0 input width
    for (w_ih, w_hh, b_ih, b_hh) in raw_params:
        layer = _prepare_layer(w_ih, w_hh, b_ih, b_hh, d_in_padded, compute_dtype)
        prepared.append(layer)
        d_in_padded = layer["hp"]                      # next layer eats padded output
    return prepared


# ----------------------------------------------------------------------------
# Full MultiLayerLSTM forward (eval mode, hx=None).
# ----------------------------------------------------------------------------
def multilayer_lstm_forward(inputs_btd, params, return_outputs=False, *,
                            block_t=32, compute_dtype=jnp.bfloat16,
                            batch_blocks=None, vmem_limit_bytes=None):
    """Mirrors MultiLayerLSTM.forward (inference; dropouts are identity).

    inputs_btd: (B, T, input_size), batch_first like the PyTorch module.
    params    : output of prepare_multilayer_lstm_params.
    Returns (outputs (B, T, out_size) f32, new_h list of (h_n, c_n) each (1, B, H_l)).
    """
    b, t_len, _ = inputs_btd.shape
    bp = _round_up(b, _SUBLANE)
    x = jnp.transpose(inputs_btd, (1, 0, 2))          # time-major (T, B, D)
    if bp != b:
        x = jnp.pad(x, ((0, 0), (0, bp - b), (0, 0)))

    new_h, raw_outputs, drop_outputs = [], [], []
    for layer in params:
        x, h_n, c_n = lstm_layer_forward(
            x, layer, block_t=block_t, compute_dtype=compute_dtype,
            batch_blocks=batch_blocks, vmem_limit_bytes=vmem_limit_bytes)
        h = layer["h"]
        new_h.append((h_n[:b, :h][None], c_n[:b, :h][None]))   # (1, B, H) like PyTorch
        if return_outputs:
            out_bth = jnp.transpose(x[:, :b, :h], (1, 0, 2)).astype(jnp.float32)
            raw_outputs.append(out_bth)
            # RNNDropout / WeightDropout are identities at inference time.
            drop_outputs.append(out_bth)

    h_last = params[-1]["h"]
    outputs = jnp.transpose(x[:, :b, :h_last], (1, 0, 2)).astype(jnp.float32)
    if return_outputs:
        return outputs, new_h, raw_outputs, drop_outputs
    return outputs, new_h


# ----------------------------------------------------------------------------
# Pure-JAX reference (PyTorch LSTM math, f32) for correctness checking.
# ----------------------------------------------------------------------------
def _reference_lstm_layer(x_tbd, w_ih, w_hh, b_ih, b_hh):
    T, B, D = x_tbd.shape
    H = w_hh.shape[1]

    def step(carry, x_t):
        h, c = carry
        gates = x_t @ w_ih.T + b_ih + h @ w_hh.T + b_hh
        i, f, g, o = jnp.split(gates, 4, axis=-1)
        c_new = jax.nn.sigmoid(f) * c + jax.nn.sigmoid(i) * jnp.tanh(g)
        h_new = jax.nn.sigmoid(o) * jnp.tanh(c_new)
        return (h_new, c_new), h_new

    init = (jnp.zeros((B, H), jnp.float32), jnp.zeros((B, H), jnp.float32))
    (h_n, c_n), out = jax.lax.scan(step, init, x_tbd)
    return out, h_n, c_n


if __name__ == "__main__":
    B, T = 2, 8
    input_size, hidden_size, num_layers = 16, 32, 2

    key = jax.random.PRNGKey(0)
    key, kx = jax.random.split(key)
    inputs = jax.random.normal(kx, (B, T, input_size), jnp.float32)
    raw_params = init_multilayer_lstm_params(key, input_size, hidden_size, num_layers)

    # Pure-JAX f32 reference of the same math.
    x_ref = jnp.transpose(inputs, (1, 0, 2))
    for (w_ih, w_hh, b_ih, b_hh) in raw_params:
        x_ref, h_ref, c_ref = _reference_lstm_layer(x_ref, w_ih, w_hh, b_ih, b_hh)
    out_ref = jnp.transpose(x_ref, (1, 0, 2))

    # Check the exact f32 path tightly, and the fast bf16-MXU path loosely.
    for compute_dtype, tol in ((jnp.float32, 1e-4), (jnp.bfloat16, 5e-2)):
        prep = prepare_multilayer_lstm_params(raw_params, compute_dtype=compute_dtype)
        fwd = jax.jit(functools.partial(multilayer_lstm_forward, params=prep,
                                        block_t=32, compute_dtype=compute_dtype))
        outputs, new_h = fwd(inputs)
        outputs = jax.block_until_ready(outputs)
        jax.block_until_ready(new_h)

        assert outputs.shape == (B, T, hidden_size)
        assert new_h[-1][0].shape == (1, B, hidden_size)
        assert jnp.allclose(outputs, out_ref, atol=tol, rtol=tol), compute_dtype
        assert jnp.allclose(new_h[-1][0][0], h_ref, atol=tol, rtol=tol), compute_dtype
        assert jnp.allclose(new_h[-1][1][0], c_ref, atol=tol, rtol=tol), compute_dtype

    print("KERNEL_OK")
</pallas_src>

<mosaic_0001>
module attributes {stable_mosaic.version = 11 : i64} {
  func.func @_lstm_recurrent_kernel(%arg0: i32, %arg1: i32, %arg2: memref<8x8x512xf32, #tpu.memory_space<vmem>>, %arg3: memref<1x512xf32, #tpu.memory_space<vmem>>, %arg4: memref<128x512xf32, #tpu.memory_space<vmem>>, %arg5: memref<8x8x128xf32, #tpu.memory_space<vmem>>, %arg6: memref<8x128xf32, #tpu.memory_space<vmem>>, %arg7: memref<8x128xf32, #tpu.memory_space<vmem>>, %arg8: memref<8x128xf32, #tpu.memory_space<vmem>>, %arg9: memref<8x128xf32, #tpu.memory_space<vmem>>) attributes {dimension_semantics = [#tpu.dimension_semantics<parallel>, #tpu.dimension_semantics<arbitrary>], iteration_bounds = array<i64: 1, 1>, scalar_prefetch = 0 : i64, scratch_operands = 2 : i64, tpu.core_type = #tpu.core_type<tc>, window_params = [{transform_indices = @transform_0, window_bounds = array<i64: 8, 8, 512>}, {pipeline_mode = #tpu.pipeline_mode<synchronous>, transform_indices = @transform_1, window_bounds = array<i64: 1, 512>}, {pipeline_mode = #tpu.pipeline_mode<synchronous>, transform_indices = @transform_2, window_bounds = array<i64: 128, 512>}, {transform_indices = @transform_3, window_bounds = array<i64: 8, 8, 128>}, {transform_indices = @transform_4, window_bounds = array<i64: 8, 128>}, {transform_indices = @transform_5, window_bounds = array<i64: 8, 128>}]} {
    %c0_i32 = arith.constant 0 : i32
    %0 = arith.cmpi eq, %arg1, %c0_i32 : i32
    %1 = arith.extui %0 : i1 to i32
    %c0_i32_0 = arith.constant 0 : i32
    %2 = arith.cmpi ne, %1, %c0_i32_0 : i32
    scf.if %2 {
      %cst_78 = arith.constant 0.000000e+00 : f32
      %300 = vector.broadcast %cst_78 : f32 to vector<8x128xf32>
      %c0_79 = arith.constant 0 : index
      %c0_80 = arith.constant 0 : index
      %301 = vector.load %arg8[%c0_79, %c0_80] : memref<8x128xf32, #tpu.memory_space<vmem>>, vector<8x128xf32>
      tpu.vector_store %arg8[%c0_79, %c0_80], %300 {strides = array<i32>} : memref<8x128xf32, #tpu.memory_space<vmem>>, vector<8x128xf32>,
      %cst_81 = arith.constant 0.000000e+00 : f32
      %302 = vector.broadcast %cst_81 : f32 to vector<8x128xf32>
      %c0_82 = arith.constant 0 : index
      %c0_83 = arith.constant 0 : index
      %303 = vector.load %arg9[%c0_82, %c0_83] : memref<8x128xf32, #tpu.memory_space<vmem>>, vector<8x128xf32>
      tpu.vector_store %arg9[%c0_82, %c0_83], %302 {strides = array<i32>} : memref<8x128xf32, #tpu.memory_space<vmem>>, vector<8x128xf32>,
    } else {
    }
    %c0 = arith.constant 0 : index
    %c0_1 = arith.constant 0 : index
    %3 = vector.load %arg4[%c0, %c0_1] : memref<128x512xf32, #tpu.memory_space<vmem>>, vector<128x512xf32>
    %c0_2 = arith.constant 0 : index
    %c0_3 = arith.constant 0 : index
    %4 = vector.load %arg3[%c0_2, %c0_3] : memref<1x512xf32, #tpu.memory_space<vmem>>, vector<1x512xf32>
    %c0_4 = arith.constant 0 : index
    %c0_5 = arith.constant 0 : index
    %5 = vector.load %arg8[%c0_4, %c0_5] : memref<8x128xf32, #tpu.memory_space<vmem>>, vector<8x128xf32>
    %c0_6 = arith.constant 0 : index
    %c0_7 = arith.constant 0 : index
    %6 = vector.load %arg9[%c0_6, %c0_7] : memref<8x128xf32, #tpu.memory_space<vmem>>, vector<8x128xf32>
    %c0_i32_8 = arith.constant 0 : i32
    %7 = arith.index_cast %c0_i32_8 : i32 to index
    %c0_9 = arith.constant 0 : index
    %c0_10 = arith.constant 0 : index
    %8 = vector.load %arg2[%7, %c0_9, %c0_10] : memref<8x8x512xf32, #tpu.memory_space<vmem>>, vector<1x8x512xf32>
    %9 = vector.shape_cast %8 : vector<1x8x512xf32> to vector<8x512xf32>
    %10 = vector.broadcast %4 : vector<1x512xf32> to vector<8x512xf32>
    %11 = arith.addf %9, %10 : vector<8x512xf32>
    %cst = arith.constant dense<0.000000e+00> : vector<8x512xf32>
    %12 = tpu.matmul %5, %3, %cst {dimension_numbers = #tpu.dot_dimension_numbers<[1], [0], [0], [1], [0, 0, 1, 1], [], []>} : vector<8x128xf32>, vector<128x512xf32>, vector<8x512xf32> -> vector<8x512xf32>
    %13 = arith.addf %11, %12 : vector<8x512xf32>
    %14 = vector.extract_strided_slice %13 {offsets = [0, 0], sizes = [8, 128], strides = [1, 1]} : vector<8x512xf32> to vector<8x128xf32>
    %15 = arith.negf %14 : vector<8x128xf32>
    %16 = math.exp %15 : vector<8x128xf32>
    %cst_11 = arith.constant 1.000000e+00 : f32
    %17 = vector.broadcast %cst_11 : f32 to vector<8x128xf32>
    %18 = arith.addf %17, %16 : vector<8x128xf32>
    %19 = arith.divf %17, %18 : vector<8x128xf32>
    %20 = vector.extract_strided_slice %13 {offsets = [0, 128], sizes = [8, 128], strides = [1, 1]} : vector<8x512xf32> to vector<8x128xf32>
    %21 = arith.negf %20 : vector<8x128xf32>
    %22 = math.exp %21 : vector<8x128xf32>
    %cst_12 = arith.constant 1.000000e+00 : f32
    %23 = vector.broadcast %cst_12 : f32 to vector<8x128xf32>
    %24 = arith.addf %23, %22 : vector<8x128xf32>
    %25 = arith.divf %23, %24 : vector<8x128xf32>
    %26 = vector.extract_strided_slice %13 {offsets = [0, 256], sizes = [8, 128], strides = [1, 1]} : vector<8x512xf32> to vector<8x128xf32>
    %27 = math.tanh %26 : vector<8x128xf32>
    %28 = vector.extract_strided_slice %13 {offsets = [0, 384], sizes = [8, 128], strides = [1, 1]} : vector<8x512xf32> to vector<8x128xf32>
    %29 = arith.negf %28 : vector<8x128xf32>
    %30 = math.exp %29 : vector<8x128xf32>
    %cst_13 = arith.constant 1.000000e+00 : f32
    %31 = vector.broadcast %cst_13 : f32 to vector<8x128xf32>
    %32 = arith.addf %31, %30 : vector<8x128xf32>
    %33 = arith.divf %31, %32 : vector<8x128xf32>
    %34 = arith.mulf %25, %6 : vector<8x128xf32>
    %35 = arith.mulf %19, %27 : vector<8x128xf32>
    %36 = arith.addf %34, %35 : vector<8x128xf32>
    %37 = math.tanh %36 : vector<8x128xf32>
    %38 = arith.mulf %33, %37 : vector<8x128xf32>
    %39 = arith.index_cast %c0_i32_8 : i32 to index
    %c0_14 = arith.constant 0 : index
    %c0_15 = arith.constant 0 : index
    %40 = vector.load %arg5[%39, %c0_14, %c0_15] : memref<8x8x128xf32, #tpu.memory_space<vmem>>, vector<1x8x128xf32>
    %41 = vector.shape_cast %40 : vector<1x8x128xf32> to vector<8x128xf32>
    %42 = vector.shape_cast %38 : vector<8x128xf32> to vector<1x8x128xf32>
    tpu.vector_store %arg5[%39, %c0_14, %c0_15], %42 {strides = array<i32>} : memref<8x8x128xf32, #tpu.memory_space<vmem>>, vector<1x8x128xf32>,
    %c1_i32 = arith.constant 1 : i32
    %43 = arith.index_cast %c1_i32 : i32 to index
    %c0_16 = arith.constant 0 : index
    %c0_17 = arith.constant 0 : index
    %44 = vector.load %arg2[%43, %c0_16, %c0_17] : memref<8x8x512xf32, #tpu.memory_space<vmem>>, vector<1x8x512xf32>
    %45 = vector.shape_cast %44 : vector<1x8x512xf32> to vector<8x512xf32>
    %46 = vector.broadcast %4 : vector<1x512xf32> to vector<8x512xf32>
    %47 = arith.addf %45, %46 : vector<8x512xf32>
    %cst_18 = arith.constant dense<0.000000e+00> : vector<8x512xf32>
    %48 = tpu.matmul %38, %3, %cst_18 {dimension_numbers = #tpu.dot_dimension_numbers<[1], [0], [0], [1], [0, 0, 1, 1], [], []>} : vector<8x128xf32>, vector<128x512xf32>, vector<8x512xf32> -> vector<8x512xf32>
    %49 = arith.addf %47, %48 : vector<8x512xf32>
    %50 = vector.extract_strided_slice %49 {offsets = [0, 0], sizes = [8, 128], strides = [1, 1]} : vector<8x512xf32> to vector<8x128xf32>
    %51 = arith.negf %50 : vector<8x128xf32>
    %52 = math.exp %51 : vector<8x128xf32>
    %cst_19 = arith.constant 1.000000e+00 : f32
    %53 = vector.broadcast %cst_19 : f32 to vector<8x128xf32>
    %54 = arith.addf %53, %52 : vector<8x128xf32>
    %55 = arith.divf %53, %54 : vector<8x128xf32>
    %56 = vector.extract_strided_slice %49 {offsets = [0, 128], sizes = [8, 128], strides = [1, 1]} : vector<8x512xf32> to vector<8x128xf32>
    %57 = arith.negf %56 : vector<8x128xf32>
    %58 = math.exp %57 : vector<8x128xf32>
    %cst_20 = arith.constant 1.000000e+00 : f32
    %59 = vector.broadcast %cst_20 : f32 to vector<8x128xf32>
    %60 = arith.addf %59, %58 : vector<8x128xf32>
    %61 = arith.divf %59, %60 : vector<8x128xf32>
    %62 = vector.extract_strided_slice %49 {offsets = [0, 256], sizes = [8, 128], strides = [1, 1]} : vector<8x512xf32> to vector<8x128xf32>
    %63 = math.tanh %62 : vector<8x128xf32>
    %64 = vector.extract_strided_slice %49 {offsets = [0, 384], sizes = [8, 128], strides = [1, 1]} : vector<8x512xf32> to vector<8x128xf32>
    %65 = arith.negf %64 : vector<8x128xf32>
    %66 = math.exp %65 : vector<8x128xf32>
    %cst_21 = arith.constant 1.000000e+00 : f32
    %67 = vector.broadcast %cst_21 : f32 to vector<8x128xf32>
    %68 = arith.addf %67, %66 : vector<8x128xf32>
    %69 = arith.divf %67, %68 : vector<8x128xf32>
    %70 = arith.mulf %61, %36 : vector<8x128xf32>
    %71 = arith.mulf %55, %63 : vector<8x128xf32>
    %72 = arith.addf %70, %71 : vector<8x128xf32>
    %73 = math.tanh %72 : vector<8x128xf32>
    %74 = arith.mulf %69, %73 : vector<8x128xf32>
    %75 = arith.index_cast %c1_i32 : i32 to index
    %c0_22 = arith.constant 0 : index
    %c0_23 = arith.constant 0 : index
    %76 = vector.load %arg5[%75, %c0_22, %c0_23] : memref<8x8x128xf32, #tpu.memory_space<vmem>>, vector<1x8x128xf32>
    %77 = vector.shape_cast %76 : vector<1x8x128xf32> to vector<8x128xf32>
    %78 = vector.shape_cast %74 : vector<8x128xf32> to vector<1x8x128xf32>
    tpu.vector_store %arg5[%75, %c0_22, %c0_23], %78 {strides = array<i32>} : memref<8x8x128xf32, #tpu.memory_space<vmem>>, vector<1x8x128xf32>,
    %c2_i32 = arith.constant 2 : i32
    %79 = arith.index_cast %c2_i32 : i32 to index
    %c0_24 = arith.constant 0 : index
    %c0_25 = arith.constant 0 : index
    %80 = vector.load %arg2[%79, %c0_24, %c0_25] : memref<8x8x512xf32, #tpu.memory_space<vmem>>, vector<1x8x512xf32>
    %81 = vector.shape_cast %80 : vector<1x8x512xf32> to vector<8x512xf32>
    %82 = vector.broadcast %4 : vector<1x512xf32> to vector<8x512xf32>
    %83 = arith.addf %81, %82 : vector<8x512xf32>
    %cst_26 = arith.constant dense<0.000000e+00> : vector<8x512xf32>
    %84 = tpu.matmul %74, %3, %cst_26 {dimension_numbers = #tpu.dot_dimension_numbers<[1], [0], [0], [1], [0, 0, 1, 1], [], []>} : vector<8x128xf32>, vector<128x512xf32>, vector<8x512xf32> -> vector<8x512xf32>
    %85 = arith.addf %83, %84 : vector<8x512xf32>
    %86 = vector.extract_strided_slice %85 {offsets = [0, 0], sizes = [8, 128], strides = [1, 1]} : vector<8x512xf32> to vector<8x128xf32>
    %87 = arith.negf %86 : vector<8x128xf32>
    %88 = math.exp %87 : vector<8x128xf32>
    %cst_27 = arith.constant 1.000000e+00 : f32
    %89 = vector.broadcast %cst_27 : f32 to vector<8x128xf32>
    %90 = arith.addf %89, %88 : vector<8x128xf32>
    %91 = arith.divf %89, %90 : vector<8x128xf32>
    %92 = vector.extract_strided_slice %85 {offsets = [0, 128], sizes = [8, 128], strides = [1, 1]} : vector<8x512xf32> to vector<8x128xf32>
    %93 = arith.negf %92 : vector<8x128xf32>
    %94 = math.exp %93 : vector<8x128xf32>
    %cst_28 = arith.constant 1.000000e+00 : f32
    %95 = vector.broadcast %cst_28 : f32 to vector<8x128xf32>
    %96 = arith.addf %95, %94 : vector<8x128xf32>
    %97 = arith.divf %95, %96 : vector<8x128xf32>
    %98 = vector.extract_strided_slice %85 {offsets = [0, 256], sizes = [8, 128], strides = [1, 1]} : vector<8x512xf32> to vector<8x128xf32>
    %99 = math.tanh %98 : vector<8x128xf32>
    %100 = vector.extract_strided_slice %85 {offsets = [0, 384], sizes = [8, 128], strides = [1, 1]} : vector<8x512xf32> to vector<8x128xf32>
    %101 = arith.negf %100 : vector<8x128xf32>
    %102 = math.exp %101 : vector<8x128xf32>
    %cst_29 = arith.constant 1.000000e+00 : f32
    %103 = vector.broadcast %cst_29 : f32 to vector<8x128xf32>
    %104 = arith.addf %103, %102 : vector<8x128xf32>
    %105 = arith.divf %103, %104 : vector<8x128xf32>
    %106 = arith.mulf %97, %72 : vector<8x128xf32>
    %107 = arith.mulf %91, %99 : vector<8x128xf32>
    %108 = arith.addf %106, %107 : vector<8x128xf32>
    %109 = math.tanh %108 : vector<8x128xf32>
    %110 = arith.mulf %105, %109 : vector<8x128xf32>
    %111 = arith.index_cast %c2_i32 : i32 to index
    %c0_30 = arith.constant 0 : index
    %c0_31 = arith.constant 0 : index
    %112 = vector.load %arg5[%111, %c0_30, %c0_31] : memref<8x8x128xf32, #tpu.memory_space<vmem>>, vector<1x8x128xf32>
    %113 = vector.shape_cast %112 : vector<1x8x128xf32> to vector<8x128xf32>
    %114 = vector.shape_cast %110 : vector<8x128xf32> to vector<1x8x128xf32>
    tpu.vector_store %arg5[%111, %c0_30, %c0_31], %114 {strides = array<i32>} : memref<8x8x128xf32, #tpu.memory_space<vmem>>, vector<1x8x128xf32>,
    %c3_i32 = arith.constant 3 : i32
    %115 = arith.index_cast %c3_i32 : i32 to index
    %c0_32 = arith.constant 0 : index
    %c0_33 = arith.constant 0 : index
    %116 = vector.load %arg2[%115, %c0_32, %c0_33] : memref<8x8x512xf32, #tpu.memory_space<vmem>>, vector<1x8x512xf32>
    %117 = vector.shape_cast %116 : vector<1x8x512xf32> to vector<8x512xf32>
    %118 = vector.broadcast %4 : vector<1x512xf32> to vector<8x512xf32>
    %119 = arith.addf %117, %118 : vector<8x512xf32>
    %cst_34 = arith.constant dense<0.000000e+00> : vector<8x512xf32>
    %120 = tpu.matmul %110, %3, %cst_34 {dimension_numbers = #tpu.dot_dimension_numbers<[1], [0], [0], [1], [0, 0, 1, 1], [], []>} : vector<8x128xf32>, vector<128x512xf32>, vector<8x512xf32> -> vector<8x512xf32>
    %121 = arith.addf %119, %120 : vector<8x512xf32>
    %122 = vector.extract_strided_slice %121 {offsets = [0, 0], sizes = [8, 128], strides = [1, 1]} : vector<8x512xf32> to vector<8x128xf32>
    %123 = arith.negf %122 : vector<8x128xf32>
    %124 = math.exp %123 : vector<8x128xf32>
    %cst_35 = arith.constant 1.000000e+00 : f32
    %125 = vector.broadcast %cst_35 : f32 to vector<8x128xf32>
    %126 = arith.addf %125, %124 : vector<8x128xf32>
    %127 = arith.divf %125, %126 : vector<8x128xf32>
    %128 = vector.extract_strided_slice %121 {offsets = [0, 128], sizes = [8, 128], strides = [1, 1]} : vector<8x512xf32> to vector<8x128xf32>
    %129 = arith.negf %128 : vector<8x128xf32>
    %130 = math.exp %129 : vector<8x128xf32>
    %cst_36 = arith.constant 1.000000e+00 : f32
    %131 = vector.broadcast %cst_36 : f32 to vector<8x128xf32>
    %132 = arith.addf %131, %130 : vector<8x128xf32>
    %133 = arith.divf %131, %132 : vector<8x128xf32>
    %134 = vector.extract_strided_slice %121 {offsets = [0, 256], sizes = [8, 128], strides = [1, 1]} : vector<8x512xf32> to vector<8x128xf32>
    %135 = math.tanh %134 : vector<8x128xf32>
    %136 = vector.extract_strided_slice %121 {offsets = [0, 384], sizes = [8, 128], strides = [1, 1]} : vector<8x512xf32> to vector<8x128xf32>
    %137 = arith.negf %136 : vector<8x128xf32>
    %138 = math.exp %137 : vector<8x128xf32>
    %cst_37 = arith.constant 1.000000e+00 : f32
    %139 = vector.broadcast %cst_37 : f32 to vector<8x128xf32>
    %140 = arith.addf %139, %138 : vector<8x128xf32>
    %141 = arith.divf %139, %140 : vector<8x128xf32>
    %142 = arith.mulf %133, %108 : vector<8x128xf32>
    %143 = arith.mulf %127, %135 : vector<8x128xf32>
    %144 = arith.addf %142, %143 : vector<8x128xf32>
    %145 = math.tanh %144 : vector<8x128xf32>
    %146 = arith.mulf %141, %145 : vector<8x128xf32>
    %147 = arith.index_cast %c3_i32 : i32 to index
    %c0_38 = arith.constant 0 : index
    %c0_39 = arith.constant 0 : index
    %148 = vector.load %arg5[%147, %c0_38, %c0_39] : memref<8x8x128xf32, #tpu.memory_space<vmem>>, vector<1x8x128xf32>
    %149 = vector.shape_cast %148 : vector<1x8x128xf32> to vector<8x128xf32>
    %150 = vector.shape_cast %146 : vector<8x128xf32> to vector<1x8x128xf32>
    tpu.vector_store %arg5[%147, %c0_38, %c0_39], %150 {strides = array<i32>} : memref<8x8x128xf32, #tpu.memory_space<vmem>>, vector<1x8x128xf32>,
    %c4_i32 = arith.constant 4 : i32
    %151 = arith.index_cast %c4_i32 : i32 to index
    %c0_40 = arith.constant 0 : index
    %c0_41 = arith.constant 0 : index
    %152 = vector.load %arg2[%151, %c0_40, %c0_41] : memref<8x8x512xf32, #tpu.memory_space<vmem>>, vector<1x8x512xf32>
    %153 = vector.shape_cast %152 : vector<1x8x512xf32> to vector<8x512xf32>
    %154 = vector.broadcast %4 : vector<1x512xf32> to vector<8x512xf32>
    %155 = arith.addf %153, %154 : vector<8x512xf32>
    %cst_42 = arith.constant dense<0.000000e+00> : vector<8x512xf32>
    %156 = tpu.matmul %146, %3, %cst_42 {dimension_numbers = #tpu.dot_dimension_numbers<[1], [0], [0], [1], [0, 0, 1, 1], [], []>} : vector<8x128xf32>, vector<128x512xf32>, vector<8x512xf32> -> vector<8x512xf32>
    %157 = arith.addf %155, %156 : vector<8x512xf32>
    %158 = vector.extract_strided_slice %157 {offsets = [0, 0], sizes = [8, 128], strides = [1, 1]} : vector<8x512xf32> to vector<8x128xf32>
    %159 = arith.negf %158 : vector<8x128xf32>
    %160 = math.exp %159 : vector<8x128xf32>
    %cst_43 = arith.constant 1.000000e+00 : f32
    %161 = vector.broadcast %cst_43 : f32 to vector<8x128xf32>
    %162 = arith.addf %161, %160 : vector<8x128xf32>
    %163 = arith.divf %161, %162 : vector<8x128xf32>
    %164 = vector.extract_strided_slice %157 {offsets = [0, 128], sizes = [8, 128], strides = [1, 1]} : vector<8x512xf32> to vector<8x128xf32>
    %165 = arith.negf %164 : vector<8x128xf32>
    %166 = math.exp %165 : vector<8x128xf32>
    %cst_44 = arith.constant 1.000000e+00 : f32
    %167 = vector.broadcast %cst_44 : f32 to vector<8x128xf32>
    %168 = arith.addf %167, %166 : vector<8x128xf32>
    %169 = arith.divf %167, %168 : vector<8x128xf32>
    %170 = vector.extract_strided_slice %157 {offsets = [0, 256], sizes = [8, 128], strides = [1, 1]} : vector<8x512xf32> to vector<8x128xf32>
    %171 = math.tanh %170 : vector<8x128xf32>
    %172 = vector.extract_strided_slice %157 {offsets = [0, 384], sizes = [8, 128], strides = [1, 1]} : vector<8x512xf32> to vector<8x128xf32>
    %173 = arith.negf %172 : vector<8x128xf32>
    %174 = math.exp %173 : vector<8x128xf32>
    %cst_45 = arith.constant 1.000000e+00 : f32
    %175 = vector.broadcast %cst_45 : f32 to vector<8x128xf32>
    %176 = arith.addf %175, %174 : vector<8x128xf32>
    %177 = arith.divf %175, %176 : vector<8x128xf32>
    %178 = arith.mulf %169, %144 : vector<8x128xf32>
    %179 = arith.mulf %163, %171 : vector<8x128xf32>
    %180 = arith.addf %178, %179 : vector<8x128xf32>
    %181 = math.tanh %180 : vector<8x128xf32>
    %182 = arith.mulf %177, %181 : vector<8x128xf32>
    %183 = arith.index_cast %c4_i32 : i32 to index
    %c0_46 = arith.constant 0 : index
    %c0_47 = arith.constant 0 : index
    %184 = vector.load %arg5[%183, %c0_46, %c0_47] : memref<8x8x128xf32, #tpu.memory_space<vmem>>, vector<1x8x128xf32>
    %185 = vector.shape_cast %184 : vector<1x8x128xf32> to vector<8x128xf32>
    %186 = vector.shape_cast %182 : vector<8x128xf32> to vector<1x8x128xf32>
    tpu.vector_store %arg5[%183, %c0_46, %c0_47], %186 {strides = array<i32>} : memref<8x8x128xf32, #tpu.memory_space<vmem>>, vector<1x8x128xf32>,
    %c5_i32 = arith.constant 5 : i32
    %187 = arith.index_cast %c5_i32 : i32 to index
    %c0_48 = arith.constant 0 : index
    %c0_49 = arith.constant 0 : index
    %188 = vector.load %arg2[%187, %c0_48, %c0_49] : memref<8x8x512xf32, #tpu.memory_space<vmem>>, vector<1x8x512xf32>
    %189 = vector.shape_cast %188 : vector<1x8x512xf32> to vector<8x512xf32>
    %190 = vector.broadcast %4 : vector<1x512xf32> to vector<8x512xf32>
    %191 = arith.addf %189, %190 : vector<8x512xf32>
    %cst_50 = arith.constant dense<0.000000e+00> : vector<8x512xf32>
    %192 = tpu.matmul %182, %3, %cst_50 {dimension_numbers = #tpu.dot_dimension_numbers<[1], [0], [0], [1], [0, 0, 1, 1], [], []>} : vector<8x128xf32>, vector<128x512xf32>, vector<8x512xf32> -> vector<8x512xf32>
    %193 = arith.addf %191, %192 : vector<8x512xf32>
    %194 = vector.extract_strided_slice %193 {offsets = [0, 0], sizes = [8, 128], strides = [1, 1]} : vector<8x512xf32> to vector<8x128xf32>
    %195 = arith.negf %194 : vector<8x128xf32>
    %196 = math.exp %195 : vector<8x128xf32>
    %cst_51 = arith.constant 1.000000e+00 : f32
    %197 = vector.broadcast %cst_51 : f32 to vector<8x128xf32>
    %198 = arith.addf %197, %196 : vector<8x128xf32>
    %199 = arith.divf %197, %198 : vector<8x128xf32>
    %200 = vector.extract_strided_slice %193 {offsets = [0, 128], sizes = [8, 128], strides = [1, 1]} : vector<8x512xf32> to vector<8x128xf32>
    %201 = arith.negf %200 : vector<8x128xf32>
    %202 = math.exp %201 : vector<8x128xf32>
    %cst_52 = arith.constant 1.000000e+00 : f32
    %203 = vector.broadcast %cst_52 : f32 to vector<8x128xf32>
    %204 = arith.addf %203, %202 : vector<8x128xf32>
    %205 = arith.divf %203, %204 : vector<8x128xf32>
    %206 = vector.extract_strided_slice %193 {offsets = [0, 256], sizes = [8, 128], strides = [1, 1]} : vector<8x512xf32> to vector<8x128xf32>
    %207 = math.tanh %206 : vector<8x128xf32>
    %208 = vector.extract_strided_slice %193 {offsets = [0, 384], sizes = [8, 128], strides = [1, 1]} : vector<8x512xf32> to vector<8x128xf32>
    %209 = arith.negf %208 : vector<8x128xf32>
    %210 = math.exp %209 : vector<8x128xf32>
    %cst_53 = arith.constant 1.000000e+00 : f32
    %211 = vector.broadcast %cst_53 : f32 to vector<8x128xf32>
    %212 = arith.addf %211, %210 : vector<8x128xf32>
    %213 = arith.divf %211, %212 : vector<8x128xf32>
    %214 = arith.mulf %205, %180 : vector<8x128xf32>
    %215 = arith.mulf %199, %207 : vector<8x128xf32>
    %216 = arith.addf %214, %215 : vector<8x128xf32>
    %217 = math.tanh %216 : vector<8x128xf32>
    %218 = arith.mulf %213, %217 : vector<8x128xf32>
    %219 = arith.index_cast %c5_i32 : i32 to index
    %c0_54 = arith.constant 0 : index
    %c0_55 = arith.constant 0 : index
    %220 = vector.load %arg5[%219, %c0_54, %c0_55] : memref<8x8x128xf32, #tpu.memory_space<vmem>>, vector<1x8x128xf32>
    %221 = vector.shape_cast %220 : vector<1x8x128xf32> to vector<8x128xf32>
    %222 = vector.shape_cast %218 : vector<8x128xf32> to vector<1x8x128xf32>
    tpu.vector_store %arg5[%219, %c0_54, %c0_55], %222 {strides = array<i32>} : memref<8x8x128xf32, #tpu.memory_space<vmem>>, vector<1x8x128xf32>,
    %c6_i32 = arith.constant 6 : i32
    %223 = arith.index_cast %c6_i32 : i32 to index
    %c0_56 = arith.constant 0 : index
    %c0_57 = arith.constant 0 : index
    %224 = vector.load %arg2[%223, %c0_56, %c0_57] : memref<8x8x512xf32, #tpu.memory_space<vmem>>, vector<1x8x512xf32>
    %225 = vector.shape_cast %224 : vector<1x8x512xf32> to vector<8x512xf32>
    %226 = vector.broadcast %4 : vector<1x512xf32> to vector<8x512xf32>
    %227 = arith.addf %225, %226 : vector<8x512xf32>
    %cst_58 = arith.constant dense<0.000000e+00> : vector<8x512xf32>
    %228 = tpu.matmul %218, %3, %cst_58 {dimension_numbers = #tpu.dot_dimension_numbers<[1], [0], [0], [1], [0, 0, 1, 1], [], []>} : vector<8x128xf32>, vector<128x512xf32>, vector<8x512xf32> -> vector<8x512xf32>
    %229 = arith.addf %227, %228 : vector<8x512xf32>
    %230 = vector.extract_strided_slice %229 {offsets = [0, 0], sizes = [8, 128], strides = [1, 1]} : vector<8x512xf32> to vector<8x128xf32>
    %231 = arith.negf %230 : vector<8x128xf32>
    %232 = math.exp %231 : vector<8x128xf32>
    %cst_59 = arith.constant 1.000000e+00 : f32
    %233 = vector.broadcast %cst_59 : f32 to vector<8x128xf32>
    %234 = arith.addf %233, %232 : vector<8x128xf32>
    %235 = arith.divf %233, %234 : vector<8x128xf32>
    %236 = vector.extract_strided_slice %229 {offsets = [0, 128], sizes = [8, 128], strides = [1, 1]} : vector<8x512xf32> to vector<8x128xf32>
    %237 = arith.negf %236 : vector<8x128xf32>
    %238 = math.exp %237 : vector<8x128xf32>
    %cst_60 = arith.constant 1.000000e+00 : f32
    %239 = vector.broadcast %cst_60 : f32 to vector<8x128xf32>
    %240 = arith.addf %239, %238 : vector<8x128xf32>
    %241 = arith.divf %239, %240 : vector<8x128xf32>
    %242 = vector.extract_strided_slice %229 {offsets = [0, 256], sizes = [8, 128], strides = [1, 1]} : vector<8x512xf32> to vector<8x128xf32>
    %243 = math.tanh %242 : vector<8x128xf32>
    %244 = vector.extract_strided_slice %229 {offsets = [0, 384], sizes = [8, 128], strides = [1, 1]} : vector<8x512xf32> to vector<8x128xf32>
    %245 = arith.negf %244 : vector<8x128xf32>
    %246 = math.exp %245 : vector<8x128xf32>
    %cst_61 = arith.constant 1.000000e+00 : f32
    %247 = vector.broadcast %cst_61 : f32 to vector<8x128xf32>
    %248 = arith.addf %247, %246 : vector<8x128xf32>
    %249 = arith.divf %247, %248 : vector<8x128xf32>
    %250 = arith.mulf %241, %216 : vector<8x128xf32>
    %251 = arith.mulf %235, %243 : vector<8x128xf32>
    %252 = arith.addf %250, %251 : vector<8x128xf32>
    %253 = math.tanh %252 : vector<8x128xf32>
    %254 = arith.mulf %249, %253 : vector<8x128xf32>
    %255 = arith.index_cast %c6_i32 : i32 to index
    %c0_62 = arith.constant 0 : index
    %c0_63 = arith.constant 0 : index
    %256 = vector.load %arg5[%255, %c0_62, %c0_63] : memref<8x8x128xf32, #tpu.memory_space<vmem>>, vector<1x8x128xf32>
    %257 = vector.shape_cast %256 : vector<1x8x128xf32> to vector<8x128xf32>
    %258 = vector.shape_cast %254 : vector<8x128xf32> to vector<1x8x128xf32>
    tpu.vector_store %arg5[%255, %c0_62, %c0_63], %258 {strides = array<i32>} : memref<8x8x128xf32, #tpu.memory_space<vmem>>, vector<1x8x128xf32>,
    %c7_i32 = arith.constant 7 : i32
    %259 = arith.index_cast %c7_i32 : i32 to index
    %c0_64 = arith.constant 0 : index
    %c0_65 = arith.constant 0 : index
    %260 = vector.load %arg2[%259, %c0_64, %c0_65] : memref<8x8x512xf32, #tpu.memory_space<vmem>>, vector<1x8x512xf32>
    %261 = vector.shape_cast %260 : vector<1x8x512xf32> to vector<8x512xf32>
    %262 = vector.broadcast %4 : vector<1x512xf32> to vector<8x512xf32>
    %263 = arith.addf %261, %262 : vector<8x512xf32>
    %cst_66 = arith.constant dense<0.000000e+00> : vector<8x512xf32>
    %264 = tpu.matmul %254, %3, %cst_66 {dimension_numbers = #tpu.dot_dimension_numbers<[1], [0], [0], [1], [0, 0, 1, 1], [], []>} : vector<8x128xf32>, vector<128x512xf32>, vector<8x512xf32> -> vector<8x512xf32>
    %265 = arith.addf %263, %264 : vector<8x512xf32>
    %266 = vector.extract_strided_slice %265 {offsets = [0, 0], sizes = [8, 128], strides = [1, 1]} : vector<8x512xf32> to vector<8x128xf32>
    %267 = arith.negf %266 : vector<8x128xf32>
    %268 = math.exp %267 : vector<8x128xf32>
    %cst_67 = arith.constant 1.000000e+00 : f32
    %269 = vector.broadcast %cst_67 : f32 to vector<8x128xf32>
    %270 = arith.addf %269, %268 : vector<8x128xf32>
    %271 = arith.divf %269, %270 : vector<8x128xf32>
    %272 = vector.extract_strided_slice %265 {offsets = [0, 128], sizes = [8, 128], strides = [1, 1]} : vector<8x512xf32> to vector<8x128xf32>
    %273 = arith.negf %272 : vector<8x128xf32>
    %274 = math.exp %273 : vector<8x128xf32>
    %cst_68 = arith.constant 1.000000e+00 : f32
    %275 = vector.broadcast %cst_68 : f32 to vector<8x128xf32>
    %276 = arith.addf %275, %274 : vector<8x128xf32>
    %277 = arith.divf %275, %276 : vector<8x128xf32>
    %278 = vector.extract_strided_slice %265 {offsets = [0, 256], sizes = [8, 128], strides = [1, 1]} : vector<8x512xf32> to vector<8x128xf32>
    %279 = math.tanh %278 : vector<8x128xf32>
    %280 = vector.extract_strided_slice %265 {offsets = [0, 384], sizes = [8, 128], strides = [1, 1]} : vector<8x512xf32> to vector<8x128xf32>
    %281 = arith.negf %280 : vector<8x128xf32>
    %282 = math.exp %281 : vector<8x128xf32>
    %cst_69 = arith.constant 1.000000e+00 : f32
    %283 = vector.broadcast %cst_69 : f32 to vector<8x128xf32>
    %284 = arith.addf %283, %282 : vector<8x128xf32>
    %285 = arith.divf %283, %284 : vector<8x128xf32>
    %286 = arith.mulf %277, %252 : vector<8x128xf32>
    %287 = arith.mulf %271, %279 : vector<8x128xf32>
    %288 = arith.addf %286, %287 : vector<8x128xf32>
    %289 = math.tanh %288 : vector<8x128xf32>
    %290 = arith.mulf %285, %289 : vector<8x128xf32>
    %291 = arith.index_cast %c7_i32 : i32 to index
    %c0_70 = arith.constant 0 : index
    %c0_71 = arith.constant 0 : index
    %292 = vector.load %arg5[%291, %c0_70, %c0_71] : memref<8x8x128xf32, #tpu.memory_space<vmem>>, vector<1x8x128xf32>
    %293 = vector.shape_cast %292 : vector<1x8x128xf32> to vector<8x128xf32>
    %294 = vector.shape_cast %290 : vector<8x128xf32> to vector<1x8x128xf32>
    tpu.vector_store %arg5[%291, %c0_70, %c0_71], %294 {strides = array<i32>} : memref<8x8x128xf32, #tpu.memory_space<vmem>>, vector<1x8x128xf32>,
    %c8_i32 = arith.constant 8 : i32
    %c0_72 = arith.constant 0 : index
    %c0_73 = arith.constant 0 : index
    %295 = vector.load %arg8[%c0_72, %c0_73] : memref<8x128xf32, #tpu.memory_space<vmem>>, vector<8x128xf32>
    tpu.vector_store %arg8[%c0_72, %c0_73], %290 {strides = array<i32>} : memref<8x128xf32, #tpu.memory_space<vmem>>, vector<8x128xf32>,
    %c0_74 = arith.constant 0 : index
    %c0_75 = arith.constant 0 : index
    %296 = vector.load %arg9[%c0_74, %c0_75] : memref<8x128xf32, #tpu.memory_space<vmem>>, vector<8x128xf32>
    tpu.vector_store %arg9[%c0_74, %c0_75], %288 {strides = array<i32>} : memref<8x128xf32, #tpu.memory_space<vmem>>, vector<8x128xf32>,
    %c0_i32_76 = arith.constant 0 : i32
    %297 = arith.cmpi eq, %arg1, %c0_i32_76 : i32
    %298 = arith.extui %297 : i1 to i32
    %c0_i32_77 = arith.constant 0 : i32
    %299 = arith.cmpi ne, %298, %c0_i32_77 : i32
    scf.if %299 {
      %c0_78 = arith.constant 0 : index
      %c0_79 = arith.constant 0 : index
      %300 = vector.load %arg6[%c0_78, %c0_79] : memref<8x128xf32, #tpu.memory_space<vmem>>, vector<8x128xf32>
      tpu.vector_store %arg6[%c0_78, %c0_79], %290 {strides = array<i32>} : memref<8x128xf32, #tpu.memory_space<vmem>>, vector<8x128xf32>,
      %c0_80 = arith.constant 0 : index
      %c0_81 = arith.constant 0 : index
      %301 = vector.load %arg7[%c0_80, %c0_81] : memref<8x128xf32, #tpu.memory_space<vmem>>, vector<8x128xf32>
      tpu.vector_store %arg7[%c0_80, %c0_81], %288 {strides = array<i32>} : memref<8x128xf32, #tpu.memory_space<vmem>>, vector<8x128xf32>,
    } else {
    }
    return
  }
  func.func @transform_0(%arg0: i32, %arg1: i32) -> (i32, i32, i32) {
    %c0_i32 = arith.constant 0 : i32
    %c0_i32_0 = arith.constant 0 : i32
    return %arg1, %arg0, %c0_i32 : i32, i32, i32
  }
  func.func @transform_1(%arg0: i32, %arg1: i32) -> (i32, i32) {
    %c0_i32 = arith.constant 0 : i32
    %c0_i32_0 = arith.constant 0 : i32
    %c0_i32_1 = arith.constant 0 : i32
    return %c0_i32, %c0_i32_0 : i32, i32
  }
  func.func @transform_2(%arg0: i32, %arg1: i32) -> (i32, i32) {
    %c0_i32 = arith.constant 0 : i32
    %c0_i32_0 = arith.constant 0 : i32
    %c0_i32_1 = arith.constant 0 : i32
    return %c0_i32, %c0_i32_0 : i32, i32
  }
  func.func @transform_3(%arg0: i32, %arg1: i32) -> (i32, i32, i32) {
    %c0_i32 = arith.constant 0 : i32
    %c0_i32_0 = arith.constant 0 : i32
    return %arg1, %arg0, %c0_i32 : i32, i32, i32
  }
  func.func @transform_4(%arg0: i32, %arg1: i32) -> (i32, i32) {
    %c0_i32 = arith.constant 0 : i32
    %c0_i32_0 = arith.constant 0 : i32
    return %arg0, %c0_i32 : i32, i32
  }
  func.func @transform_5(%arg0: i32, %arg1: i32) -> (i32, i32) {
    %c0_i32 = arith.constant 0 : i32
    %c0_i32_0 = arith.constant 0 : i32
    return %arg0, %c0_i32 : i32, i32
  }
}

module attributes {stable_mosaic.version = 11 : i64} {
  func.func @_lstm_recurrent_kernel(%arg0: i32, %arg1: i32, %arg2: memref<8x8x512xf32, #tpu.memory_space<vmem>>, %arg3: memref<1x512xf32, #tpu.memory_space<vmem>>, %arg4: memref<128x512xf32, #tpu.memory_space<vmem>>, %arg5: memref<8x8x128xf32, #tpu.memory_space<vmem>>, %arg6: memref<8x128xf32, #tpu.memory_space<vmem>>, %arg7: memref<8x128xf32, #tpu.memory_space<vmem>>, %arg8: memref<8x128xf32, #tpu.memory_space<vmem>>, %arg9: memref<8x128xf32, #tpu.memory_space<vmem>>) attributes {dimension_semantics = [#tpu.dimension_semantics<parallel>, #tpu.dimension_semantics<arbitrary>], iteration_bounds = array<i64: 1, 1>, scalar_prefetch = 0 : i64, scratch_operands = 2 : i64, tpu.core_type = #tpu.core_type<tc>, window_params = [{transform_indices = @transform_0, window_bounds = array<i64: 8, 8, 512>}, {pipeline_mode = #tpu.pipeline_mode<synchronous>, transform_indices = @transform_1, window_bounds = array<i64: 1, 512>}, {pipeline_mode = #tpu.pipeline_mode<synchronous>, transform_indices = @transform_2, window_bounds = array<i64: 128, 512>}, {transform_indices = @transform_3, window_bounds = array<i64: 8, 8, 128>}, {transform_indices = @transform_4, window_bounds = array<i64: 8, 128>}, {transform_indices = @transform_5, window_bounds = array<i64: 8, 128>}]} {
    %c0_i32 = arith.constant 0 : i32
    %0 = arith.cmpi eq, %arg1, %c0_i32 : i32
    %1 = arith.extui %0 : i1 to i32
    %c0_i32_0 = arith.constant 0 : i32
    %2 = arith.cmpi ne, %1, %c0_i32_0 : i32
    scf.if %2 {
      %cst_78 = arith.constant 0.000000e+00 : f32
      %300 = vector.broadcast %cst_78 : f32 to vector<8x128xf32>
      %c0_79 = arith.constant 0 : index
      %c0_80 = arith.constant 0 : index
      %301 = vector.load %arg8[%c0_79, %c0_80] : memref<8x128xf32, #tpu.memory_space<vmem>>, vector<8x128xf32>
      tpu.vector_store %arg8[%c0_79, %c0_80], %300 {strides = array<i32>} : memref<8x128xf32, #tpu.memory_space<vmem>>, vector<8x128xf32>,
      %cst_81 = arith.constant 0.000000e+00 : f32
      %302 = vector.broadcast %cst_81 : f32 to vector<8x128xf32>
      %c0_82 = arith.constant 0 : index
      %c0_83 = arith.constant 0 : index
      %303 = vector.load %arg9[%c0_82, %c0_83] : memref<8x128xf32, #tpu.memory_space<vmem>>, vector<8x128xf32>
      tpu.vector_store %arg9[%c0_82, %c0_83], %302 {strides = array<i32>} : memref<8x128xf32, #tpu.memory_space<vmem>>, vector<8x128xf32>,
    } else {
    }
    %c0 = arith.constant 0 : index
    %c0_1 = arith.constant 0 : index
    %3 = vector.load %arg4[%c0, %c0_1] : memref<128x512xf32, #tpu.memory_space<vmem>>, vector<128x512xf32>
    %c0_2 = arith.constant 0 : index
    %c0_3 = arith.constant 0 : index
    %4 = vector.load %arg3[%c0_2, %c0_3] : memref<1x512xf32, #tpu.memory_space<vmem>>, vector<1x512xf32>
    %c0_4 = arith.constant 0 : index
    %c0_5 = arith.constant 0 : index
    %5 = vector.load %arg8[%c0_4, %c0_5] : memref<8x128xf32, #tpu.memory_space<vmem>>, vector<8x128xf32>
    %c0_6 = arith.constant 0 : index
    %c0_7 = arith.constant 0 : index
    %6 = vector.load %arg9[%c0_6, %c0_7] : memref<8x128xf32, #tpu.memory_space<vmem>>, vector<8x128xf32>
    %c0_i32_8 = arith.constant 0 : i32
    %7 = arith.index_cast %c0_i32_8 : i32 to index
    %c0_9 = arith.constant 0 : index
    %c0_10 = arith.constant 0 : index
    %8 = vector.load %arg2[%7, %c0_9, %c0_10] : memref<8x8x512xf32, #tpu.memory_space<vmem>>, vector<1x8x512xf32>
    %9 = vector.shape_cast %8 : vector<1x8x512xf32> to vector<8x512xf32>
    %10 = vector.broadcast %4 : vector<1x512xf32> to vector<8x512xf32>
    %11 = arith.addf %9, %10 : vector<8x512xf32>
    %cst = arith.constant dense<0.000000e+00> : vector<8x512xf32>
    %12 = tpu.matmul %5, %3, %cst {dimension_numbers = #tpu.dot_dimension_numbers<[1], [0], [0], [1], [0, 0, 1, 1], [], []>} : vector<8x128xf32>, vector<128x512xf32>, vector<8x512xf32> -> vector<8x512xf32>
    %13 = arith.addf %11, %12 : vector<8x512xf32>
    %14 = vector.extract_strided_slice %13 {offsets = [0, 0], sizes = [8, 128], strides = [1, 1]} : vector<8x512xf32> to vector<8x128xf32>
    %15 = arith.negf %14 : vector<8x128xf32>
    %16 = math.exp %15 : vector<8x128xf32>
    %cst_11 = arith.constant 1.000000e+00 : f32
    %17 = vector.broadcast %cst_11 : f32 to vector<8x128xf32>
    %18 = arith.addf %17, %16 : vector<8x128xf32>
    %19 = arith.divf %17, %18 : vector<8x128xf32>
    %20 = vector.extract_strided_slice %13 {offsets = [0, 128], sizes = [8, 128], strides = [1, 1]} : vector<8x512xf32> to vector<8x128xf32>
    %21 = arith.negf %20 : vector<8x128xf32>
    %22 = math.exp %21 : vector<8x128xf32>
    %cst_12 = arith.constant 1.000000e+00 : f32
    %23 = vector.broadcast %cst_12 : f32 to vector<8x128xf32>
    %24 = arith.addf %23, %22 : vector<8x128xf32>
    %25 = arith.divf %23, %24 : vector<8x128xf32>
    %26 = vector.extract_strided_slice %13 {offsets = [0, 256], sizes = [8, 128], strides = [1, 1]} : vector<8x512xf32> to vector<8x128xf32>
    %27 = math.tanh %26 : vector<8x128xf32>
    %28 = vector.extract_strided_slice %13 {offsets = [0, 384], sizes = [8, 128], strides = [1, 1]} : vector<8x512xf32> to vector<8x128xf32>
    %29 = arith.negf %28 : vector<8x128xf32>
    %30 = math.exp %29 : vector<8x128xf32>
    %cst_13 = arith.constant 1.000000e+00 : f32
    %31 = vector.broadcast %cst_13 : f32 to vector<8x128xf32>
    %32 = arith.addf %31, %30 : vector<8x128xf32>
    %33 = arith.divf %31, %32 : vector<8x128xf32>
    %34 = arith.mulf %25, %6 : vector<8x128xf32>
    %35 = arith.mulf %19, %27 : vector<8x128xf32>
    %36 = arith.addf %34, %35 : vector<8x128xf32>
    %37 = math.tanh %36 : vector<8x128xf32>
    %38 = arith.mulf %33, %37 : vector<8x128xf32>
    %39 = arith.index_cast %c0_i32_8 : i32 to index
    %c0_14 = arith.constant 0 : index
    %c0_15 = arith.constant 0 : index
    %40 = vector.load %arg5[%39, %c0_14, %c0_15] : memref<8x8x128xf32, #tpu.memory_space<vmem>>, vector<1x8x128xf32>
    %41 = vector.shape_cast %40 : vector<1x8x128xf32> to vector<8x128xf32>
    %42 = vector.shape_cast %38 : vector<8x128xf32> to vector<1x8x128xf32>
    tpu.vector_store %arg5[%39, %c0_14, %c0_15], %42 {strides = array<i32>} : memref<8x8x128xf32, #tpu.memory_space<vmem>>, vector<1x8x128xf32>,
    %c1_i32 = arith.constant 1 : i32
    %43 = arith.index_cast %c1_i32 : i32 to index
    %c0_16 = arith.constant 0 : index
    %c0_17 = arith.constant 0 : index
    %44 = vector.load %arg2[%43, %c0_16, %c0_17] : memref<8x8x512xf32, #tpu.memory_space<vmem>>, vector<1x8x512xf32>
    %45 = vector.shape_cast %44 : vector<1x8x512xf32> to vector<8x512xf32>
    %46 = vector.broadcast %4 : vector<1x512xf32> to vector<8x512xf32>
    %47 = arith.addf %45, %46 : vector<8x512xf32>
    %cst_18 = arith.constant dense<0.000000e+00> : vector<8x512xf32>
    %48 = tpu.matmul %38, %3, %cst_18 {dimension_numbers = #tpu.dot_dimension_numbers<[1], [0], [0], [1], [0, 0, 1, 1], [], []>} : vector<8x128xf32>, vector<128x512xf32>, vector<8x512xf32> -> vector<8x512xf32>
    %49 = arith.addf %47, %48 : vector<8x512xf32>
    %50 = vector.extract_strided_slice %49 {offsets = [0, 0], sizes = [8, 128], strides = [1, 1]} : vector<8x512xf32> to vector<8x128xf32>
    %51 = arith.negf %50 : vector<8x128xf32>
    %52 = math.exp %51 : vector<8x128xf32>
    %cst_19 = arith.constant 1.000000e+00 : f32
    %53 = vector.broadcast %cst_19 : f32 to vector<8x128xf32>
    %54 = arith.addf %53, %52 : vector<8x128xf32>
    %55 = arith.divf %53, %54 : vector<8x128xf32>
    %56 = vector.extract_strided_slice %49 {offsets = [0, 128], sizes = [8, 128], strides = [1, 1]} : vector<8x512xf32> to vector<8x128xf32>
    %57 = arith.negf %56 : vector<8x128xf32>
    %58 = math.exp %57 : vector<8x128xf32>
    %cst_20 = arith.constant 1.000000e+00 : f32
    %59 = vector.broadcast %cst_20 : f32 to vector<8x128xf32>
    %60 = arith.addf %59, %58 : vector<8x128xf32>
    %61 = arith.divf %59, %60 : vector<8x128xf32>
    %62 = vector.extract_strided_slice %49 {offsets = [0, 256], sizes = [8, 128], strides = [1, 1]} : vector<8x512xf32> to vector<8x128xf32>
    %63 = math.tanh %62 : vector<8x128xf32>
    %64 = vector.extract_strided_slice %49 {offsets = [0, 384], sizes = [8, 128], strides = [1, 1]} : vector<8x512xf32> to vector<8x128xf32>
    %65 = arith.negf %64 : vector<8x128xf32>
    %66 = math.exp %65 : vector<8x128xf32>
    %cst_21 = arith.constant 1.000000e+00 : f32
    %67 = vector.broadcast %cst_21 : f32 to vector<8x128xf32>
    %68 = arith.addf %67, %66 : vector<8x128xf32>
    %69 = arith.divf %67, %68 : vector<8x128xf32>
    %70 = arith.mulf %61, %36 : vector<8x128xf32>
    %71 = arith.mulf %55, %63 : vector<8x128xf32>
    %72 = arith.addf %70, %71 : vector<8x128xf32>
    %73 = math.tanh %72 : vector<8x128xf32>
    %74 = arith.mulf %69, %73 : vector<8x128xf32>
    %75 = arith.index_cast %c1_i32 : i32 to index
    %c0_22 = arith.constant 0 : index
    %c0_23 = arith.constant 0 : index
    %76 = vector.load %arg5[%75, %c0_22, %c0_23] : memref<8x8x128xf32, #tpu.memory_space<vmem>>, vector<1x8x128xf32>
    %77 = vector.shape_cast %76 : vector<1x8x128xf32> to vector<8x128xf32>
    %78 = vector.shape_cast %74 : vector<8x128xf32> to vector<1x8x128xf32>
    tpu.vector_store %arg5[%75, %c0_22, %c0_23], %78 {strides = array<i32>} : memref<8x8x128xf32, #tpu.memory_space<vmem>>, vector<1x8x128xf32>,
    %c2_i32 = arith.constant 2 : i32
    %79 = arith.index_cast %c2_i32 : i32 to index
    %c0_24 = arith.constant 0 : index
    %c0_25 = arith.constant 0 : index
    %80 = vector.load %arg2[%79, %c0_24, %c0_25] : memref<8x8x512xf32, #tpu.memory_space<vmem>>, vector<1x8x512xf32>
    %81 = vector.shape_cast %80 : vector<1x8x512xf32> to vector<8x512xf32>
    %82 = vector.broadcast %4 : vector<1x512xf32> to vector<8x512xf32>
    %83 = arith.addf %81, %82 : vector<8x512xf32>
    %cst_26 = arith.constant dense<0.000000e+00> : vector<8x512xf32>
    %84 = tpu.matmul %74, %3, %cst_26 {dimension_numbers = #tpu.dot_dimension_numbers<[1], [0], [0], [1], [0, 0, 1, 1], [], []>} : vector<8x128xf32>, vector<128x512xf32>, vector<8x512xf32> -> vector<8x512xf32>
    %85 = arith.addf %83, %84 : vector<8x512xf32>
    %86 = vector.extract_strided_slice %85 {offsets = [0, 0], sizes = [8, 128], strides = [1, 1]} : vector<8x512xf32> to vector<8x128xf32>
    %87 = arith.negf %86 : vector<8x128xf32>
    %88 = math.exp %87 : vector<8x128xf32>
    %cst_27 = arith.constant 1.000000e+00 : f32
    %89 = vector.broadcast %cst_27 : f32 to vector<8x128xf32>
    %90 = arith.addf %89, %88 : vector<8x128xf32>
    %91 = arith.divf %89, %90 : vector<8x128xf32>
    %92 = vector.extract_strided_slice %85 {offsets = [0, 128], sizes = [8, 128], strides = [1, 1]} : vector<8x512xf32> to vector<8x128xf32>
    %93 = arith.negf %92 : vector<8x128xf32>
    %94 = math.exp %93 : vector<8x128xf32>
    %cst_28 = arith.constant 1.000000e+00 : f32
    %95 = vector.broadcast %cst_28 : f32 to vector<8x128xf32>
    %96 = arith.addf %95, %94 : vector<8x128xf32>
    %97 = arith.divf %95, %96 : vector<8x128xf32>
    %98 = vector.extract_strided_slice %85 {offsets = [0, 256], sizes = [8, 128], strides = [1, 1]} : vector<8x512xf32> to vector<8x128xf32>
    %99 = math.tanh %98 : vector<8x128xf32>
    %100 = vector.extract_strided_slice %85 {offsets = [0, 384], sizes = [8, 128], strides = [1, 1]} : vector<8x512xf32> to vector<8x128xf32>
    %101 = arith.negf %100 : vector<8x128xf32>
    %102 = math.exp %101 : vector<8x128xf32>
    %cst_29 = arith.constant 1.000000e+00 : f32
    %103 = vector.broadcast %cst_29 : f32 to vector<8x128xf32>
    %104 = arith.addf %103, %102 : vector<8x128xf32>
    %105 = arith.divf %103, %104 : vector<8x128xf32>
    %106 = arith.mulf %97, %72 : vector<8x128xf32>
    %107 = arith.mulf %91, %99 : vector<8x128xf32>
    %108 = arith.addf %106, %107 : vector<8x128xf32>
    %109 = math.tanh %108 : vector<8x128xf32>
    %110 = arith.mulf %105, %109 : vector<8x128xf32>
    %111 = arith.index_cast %c2_i32 : i32 to index
    %c0_30 = arith.constant 0 : index
    %c0_31 = arith.constant 0 : index
    %112 = vector.load %arg5[%111, %c0_30, %c0_31] : memref<8x8x128xf32, #tpu.memory_space<vmem>>, vector<1x8x128xf32>
    %113 = vector.shape_cast %112 : vector<1x8x128xf32> to vector<8x128xf32>
    %114 = vector.shape_cast %110 : vector<8x128xf32> to vector<1x8x128xf32>
    tpu.vector_store %arg5[%111, %c0_30, %c0_31], %114 {strides = array<i32>} : memref<8x8x128xf32, #tpu.memory_space<vmem>>, vector<1x8x128xf32>,
    %c3_i32 = arith.constant 3 : i32
    %115 = arith.index_cast %c3_i32 : i32 to index
    %c0_32 = arith.constant 0 : index
    %c0_33 = arith.constant 0 : index
    %116 = vector.load %arg2[%115, %c0_32, %c0_33] : memref<8x8x512xf32, #tpu.memory_space<vmem>>, vector<1x8x512xf32>
    %117 = vector.shape_cast %116 : vector<1x8x512xf32> to vector<8x512xf32>
    %118 = vector.broadcast %4 : vector<1x512xf32> to vector<8x512xf32>
    %119 = arith.addf %117, %118 : vector<8x512xf32>
    %cst_34 = arith.constant dense<0.000000e+00> : vector<8x512xf32>
    %120 = tpu.matmul %110, %3, %cst_34 {dimension_numbers = #tpu.dot_dimension_numbers<[1], [0], [0], [1], [0, 0, 1, 1], [], []>} : vector<8x128xf32>, vector<128x512xf32>, vector<8x512xf32> -> vector<8x512xf32>
    %121 = arith.addf %119, %120 : vector<8x512xf32>
    %122 = vector.extract_strided_slice %121 {offsets = [0, 0], sizes = [8, 128], strides = [1, 1]} : vector<8x512xf32> to vector<8x128xf32>
    %123 = arith.negf %122 : vector<8x128xf32>
    %124 = math.exp %123 : vector<8x128xf32>
    %cst_35 = arith.constant 1.000000e+00 : f32
    %125 = vector.broadcast %cst_35 : f32 to vector<8x128xf32>
    %126 = arith.addf %125, %124 : vector<8x128xf32>
    %127 = arith.divf %125, %126 : vector<8x128xf32>
    %128 = vector.extract_strided_slice %121 {offsets = [0, 128], sizes = [8, 128], strides = [1, 1]} : vector<8x512xf32> to vector<8x128xf32>
    %129 = arith.negf %128 : vector<8x128xf32>
    %130 = math.exp %129 : vector<8x128xf32>
    %cst_36 = arith.constant 1.000000e+00 : f32
    %131 = vector.broadcast %cst_36 : f32 to vector<8x128xf32>
    %132 = arith.addf %131, %130 : vector<8x128xf32>
    %133 = arith.divf %131, %132 : vector<8x128xf32>
    %134 = vector.extract_strided_slice %121 {offsets = [0, 256], sizes = [8, 128], strides = [1, 1]} : vector<8x512xf32> to vector<8x128xf32>
    %135 = math.tanh %134 : vector<8x128xf32>
    %136 = vector.extract_strided_slice %121 {offsets = [0, 384], sizes = [8, 128], strides = [1, 1]} : vector<8x512xf32> to vector<8x128xf32>
    %137 = arith.negf %136 : vector<8x128xf32>
    %138 = math.exp %137 : vector<8x128xf32>
    %cst_37 = arith.constant 1.000000e+00 : f32
    %139 = vector.broadcast %cst_37 : f32 to vector<8x128xf32>
    %140 = arith.addf %139, %138 : vector<8x128xf32>
    %141 = arith.divf %139, %140 : vector<8x128xf32>
    %142 = arith.mulf %133, %108 : vector<8x128xf32>
    %143 = arith.mulf %127, %135 : vector<8x128xf32>
    %144 = arith.addf %142, %143 : vector<8x128xf32>
    %145 = math.tanh %144 : vector<8x128xf32>
    %146 = arith.mulf %141, %145 : vector<8x128xf32>
    %147 = arith.index_cast %c3_i32 : i32 to index
    %c0_38 = arith.constant 0 : index
    %c0_39 = arith.constant 0 : index
    %148 = vector.load %arg5[%147, %c0_38, %c0_39] : memref<8x8x128xf32, #tpu.memory_space<vmem>>, vector<1x8x128xf32>
    %149 = vector.shape_cast %148 : vector<1x8x128xf32> to vector<8x128xf32>
    %150 = vector.shape_cast %146 : vector<8x128xf32> to vector<1x8x128xf32>
    tpu.vector_store %arg5[%147, %c0_38, %c0_39], %150 {strides = array<i32>} : memref<8x8x128xf32, #tpu.memory_space<vmem>>, vector<1x8x128xf32>,
    %c4_i32 = arith.constant 4 : i32
    %151 = arith.index_cast %c4_i32 : i32 to index
    %c0_40 = arith.constant 0 : index
    %c0_41 = arith.constant 0 : index
    %152 = vector.load %arg2[%151, %c0_40, %c0_41] : memref<8x8x512xf32, #tpu.memory_space<vmem>>, vector<1x8x512xf32>
    %153 = vector.shape_cast %152 : vector<1x8x512xf32> to vector<8x512xf32>
    %154 = vector.broadcast %4 : vector<1x512xf32> to vector<8x512xf32>
    %155 = arith.addf %153, %154 : vector<8x512xf32>
    %cst_42 = arith.constant dense<0.000000e+00> : vector<8x512xf32>
    %156 = tpu.matmul %146, %3, %cst_42 {dimension_numbers = #tpu.dot_dimension_numbers<[1], [0], [0], [1], [0, 0, 1, 1], [], []>} : vector<8x128xf32>, vector<128x512xf32>, vector<8x512xf32> -> vector<8x512xf32>
    %157 = arith.addf %155, %156 : vector<8x512xf32>
    %158 = vector.extract_strided_slice %157 {offsets = [0, 0], sizes = [8, 128], strides = [1, 1]} : vector<8x512xf32> to vector<8x128xf32>
    %159 = arith.negf %158 : vector<8x128xf32>
    %160 = math.exp %159 : vector<8x128xf32>
    %cst_43 = arith.constant 1.000000e+00 : f32
    %161 = vector.broadcast %cst_43 : f32 to vector<8x128xf32>
    %162 = arith.addf %161, %160 : vector<8x128xf32>
    %163 = arith.divf %161, %162 : vector<8x128xf32>
    %164 = vector.extract_strided_slice %157 {offsets = [0, 128], sizes = [8, 128], strides = [1, 1]} : vector<8x512xf32> to vector<8x128xf32>
    %165 = arith.negf %164 : vector<8x128xf32>
    %166 = math.exp %165 : vector<8x128xf32>
    %cst_44 = arith.constant 1.000000e+00 : f32
    %167 = vector.broadcast %cst_44 : f32 to vector<8x128xf32>
    %168 = arith.addf %167, %166 : vector<8x128xf32>
    %169 = arith.divf %167, %168 : vector<8x128xf32>
    %170 = vector.extract_strided_slice %157 {offsets = [0, 256], sizes = [8, 128], strides = [1, 1]} : vector<8x512xf32> to vector<8x128xf32>
    %171 = math.tanh %170 : vector<8x128xf32>
    %172 = vector.extract_strided_slice %157 {offsets = [0, 384], sizes = [8, 128], strides = [1, 1]} : vector<8x512xf32> to vector<8x128xf32>
    %173 = arith.negf %172 : vector<8x128xf32>
    %174 = math.exp %173 : vector<8x128xf32>
    %cst_45 = arith.constant 1.000000e+00 : f32
    %175 = vector.broadcast %cst_45 : f32 to vector<8x128xf32>
    %176 = arith.addf %175, %174 : vector<8x128xf32>
    %177 = arith.divf %175, %176 : vector<8x128xf32>
    %178 = arith.mulf %169, %144 : vector<8x128xf32>
    %179 = arith.mulf %163, %171 : vector<8x128xf32>
    %180 = arith.addf %178, %179 : vector<8x128xf32>
    %181 = math.tanh %180 : vector<8x128xf32>
    %182 = arith.mulf %177, %181 : vector<8x128xf32>
    %183 = arith.index_cast %c4_i32 : i32 to index
    %c0_46 = arith.constant 0 : index
    %c0_47 = arith.constant 0 : index
    %184 = vector.load %arg5[%183, %c0_46, %c0_47] : memref<8x8x128xf32, #tpu.memory_space<vmem>>, vector<1x8x128xf32>
    %185 = vector.shape_cast %184 : vector<1x8x128xf32> to vector<8x128xf32>
    %186 = vector.shape_cast %182 : vector<8x128xf32> to vector<1x8x128xf32>
    tpu.vector_store %arg5[%183, %c0_46, %c0_47], %186 {strides = array<i32>} : memref<8x8x128xf32, #tpu.memory_space<vmem>>, vector<1x8x128xf32>,
    %c5_i32 = arith.constant 5 : i32
    %187 = arith.index_cast %c5_i32 : i32 to index
    %c0_48 = arith.constant 0 : index
    %c0_49 = arith.constant 0 : index
    %188 = vector.load %arg2[%187, %c0_48, %c0_49] : memref<8x8x512xf32, #tpu.memory_space<vmem>>, vector<1x8x512xf32>
    %189 = vector.shape_cast %188 : vector<1x8x512xf32> to vector<8x512xf32>
    %190 = vector.broadcast %4 : vector<1x512xf32> to vector<8x512xf32>
    %191 = arith.addf %189, %190 : vector<8x512xf32>
    %cst_50 = arith.constant dense<0.000000e+00> : vector<8x512xf32>
    %192 = tpu.matmul %182, %3, %cst_50 {dimension_numbers = #tpu.dot_dimension_numbers<[1], [0], [0], [1], [0, 0, 1, 1], [], []>} : vector<8x128xf32>, vector<128x512xf32>, vector<8x512xf32> -> vector<8x512xf32>
    %193 = arith.addf %191, %192 : vector<8x512xf32>
    %194 = vector.extract_strided_slice %193 {offsets = [0, 0], sizes = [8, 128], strides = [1, 1]} : vector<8x512xf32> to vector<8x128xf32>
    %195 = arith.negf %194 : vector<8x128xf32>
    %196 = math.exp %195 : vector<8x128xf32>
    %cst_51 = arith.constant 1.000000e+00 : f32
    %197 = vector.broadcast %cst_51 : f32 to vector<8x128xf32>
    %198 = arith.addf %197, %196 : vector<8x128xf32>
    %199 = arith.divf %197, %198 : vector<8x128xf32>
    %200 = vector.extract_strided_slice %193 {offsets = [0, 128], sizes = [8, 128], strides = [1, 1]} : vector<8x512xf32> to vector<8x128xf32>
    %201 = arith.negf %200 : vector<8x128xf32>
    %202 = math.exp %201 : vector<8x128xf32>
    %cst_52 = arith.constant 1.000000e+00 : f32
    %203 = vector.broadcast %cst_52 : f32 to vector<8x128xf32>
    %204 = arith.addf %203, %202 : vector<8x128xf32>
    %205 = arith.divf %203, %204 : vector<8x128xf32>
    %206 = vector.extract_strided_slice %193 {offsets = [0, 256], sizes = [8, 128], strides = [1, 1]} : vector<8x512xf32> to vector<8x128xf32>
    %207 = math.tanh %206 : vector<8x128xf32>
    %208 = vector.extract_strided_slice %193 {offsets = [0, 384], sizes = [8, 128], strides = [1, 1]} : vector<8x512xf32> to vector<8x128xf32>
    %209 = arith.negf %208 : vector<8x128xf32>
    %210 = math.exp %209 : vector<8x128xf32>
    %cst_53 = arith.constant 1.000000e+00 : f32
    %211 = vector.broadcast %cst_53 : f32 to vector<8x128xf32>
    %212 = arith.addf %211, %210 : vector<8x128xf32>
    %213 = arith.divf %211, %212 : vector<8x128xf32>
    %214 = arith.mulf %205, %180 : vector<8x128xf32>
    %215 = arith.mulf %199, %207 : vector<8x128xf32>
    %216 = arith.addf %214, %215 : vector<8x128xf32>
    %217 = math.tanh %216 : vector<8x128xf32>
    %218 = arith.mulf %213, %217 : vector<8x128xf32>
    %219 = arith.index_cast %c5_i32 : i32 to index
    %c0_54 = arith.constant 0 : index
    %c0_55 = arith.constant 0 : index
    %220 = vector.load %arg5[%219, %c0_54, %c0_55] : memref<8x8x128xf32, #tpu.memory_space<vmem>>, vector<1x8x128xf32>
    %221 = vector.shape_cast %220 : vector<1x8x128xf32> to vector<8x128xf32>
    %222 = vector.shape_cast %218 : vector<8x128xf32> to vector<1x8x128xf32>
    tpu.vector_store %arg5[%219, %c0_54, %c0_55], %222 {strides = array<i32>} : memref<8x8x128xf32, #tpu.memory_space<vmem>>, vector<1x8x128xf32>,
    %c6_i32 = arith.constant 6 : i32
    %223 = arith.index_cast %c6_i32 : i32 to index
    %c0_56 = arith.constant 0 : index
    %c0_57 = arith.constant 0 : index
    %224 = vector.load %arg2[%223, %c0_56, %c0_57] : memref<8x8x512xf32, #tpu.memory_space<vmem>>, vector<1x8x512xf32>
    %225 = vector.shape_cast %224 : vector<1x8x512xf32> to vector<8x512xf32>
    %226 = vector.broadcast %4 : vector<1x512xf32> to vector<8x512xf32>
    %227 = arith.addf %225, %226 : vector<8x512xf32>
    %cst_58 = arith.constant dense<0.000000e+00> : vector<8x512xf32>
    %228 = tpu.matmul %218, %3, %cst_58 {dimension_numbers = #tpu.dot_dimension_numbers<[1], [0], [0], [1], [0, 0, 1, 1], [], []>} : vector<8x128xf32>, vector<128x512xf32>, vector<8x512xf32> -> vector<8x512xf32>
    %229 = arith.addf %227, %228 : vector<8x512xf32>
    %230 = vector.extract_strided_slice %229 {offsets = [0, 0], sizes = [8, 128], strides = [1, 1]} : vector<8x512xf32> to vector<8x128xf32>
    %231 = arith.negf %230 : vector<8x128xf32>
    %232 = math.exp %231 : vector<8x128xf32>
    %cst_59 = arith.constant 1.000000e+00 : f32
    %233 = vector.broadcast %cst_59 : f32 to vector<8x128xf32>
    %234 = arith.addf %233, %232 : vector<8x128xf32>
    %235 = arith.divf %233, %234 : vector<8x128xf32>
    %236 = vector.extract_strided_slice %229 {offsets = [0, 128], sizes = [8, 128], strides = [1, 1]} : vector<8x512xf32> to vector<8x128xf32>
    %237 = arith.negf %236 : vector<8x128xf32>
    %238 = math.exp %237 : vector<8x128xf32>
    %cst_60 = arith.constant 1.000000e+00 : f32
    %239 = vector.broadcast %cst_60 : f32 to vector<8x128xf32>
    %240 = arith.addf %239, %238 : vector<8x128xf32>
    %241 = arith.divf %239, %240 : vector<8x128xf32>
    %242 = vector.extract_strided_slice %229 {offsets = [0, 256], sizes = [8, 128], strides = [1, 1]} : vector<8x512xf32> to vector<8x128xf32>
    %243 = math.tanh %242 : vector<8x128xf32>
    %244 = vector.extract_strided_slice %229 {offsets = [0, 384], sizes = [8, 128], strides = [1, 1]} : vector<8x512xf32> to vector<8x128xf32>
    %245 = arith.negf %244 : vector<8x128xf32>
    %246 = math.exp %245 : vector<8x128xf32>
    %cst_61 = arith.constant 1.000000e+00 : f32
    %247 = vector.broadcast %cst_61 : f32 to vector<8x128xf32>
    %248 = arith.addf %247, %246 : vector<8x128xf32>
    %249 = arith.divf %247, %248 : vector<8x128xf32>
    %250 = arith.mulf %241, %216 : vector<8x128xf32>
    %251 = arith.mulf %235, %243 : vector<8x128xf32>
    %252 = arith.addf %250, %251 : vector<8x128xf32>
    %253 = math.tanh %252 : vector<8x128xf32>
    %254 = arith.mulf %249, %253 : vector<8x128xf32>
    %255 = arith.index_cast %c6_i32 : i32 to index
    %c0_62 = arith.constant 0 : index
    %c0_63 = arith.constant 0 : index
    %256 = vector.load %arg5[%255, %c0_62, %c0_63] : memref<8x8x128xf32, #tpu.memory_space<vmem>>, vector<1x8x128xf32>
    %257 = vector.shape_cast %256 : vector<1x8x128xf32> to vector<8x128xf32>
    %258 = vector.shape_cast %254 : vector<8x128xf32> to vector<1x8x128xf32>
    tpu.vector_store %arg5[%255, %c0_62, %c0_63], %258 {strides = array<i32>} : memref<8x8x128xf32, #tpu.memory_space<vmem>>, vector<1x8x128xf32>,
    %c7_i32 = arith.constant 7 : i32
    %259 = arith.index_cast %c7_i32 : i32 to index
    %c0_64 = arith.constant 0 : index
    %c0_65 = arith.constant 0 : index
    %260 = vector.load %arg2[%259, %c0_64, %c0_65] : memref<8x8x512xf32, #tpu.memory_space<vmem>>, vector<1x8x512xf32>
    %261 = vector.shape_cast %260 : vector<1x8x512xf32> to vector<8x512xf32>
    %262 = vector.broadcast %4 : vector<1x512xf32> to vector<8x512xf32>
    %263 = arith.addf %261, %262 : vector<8x512xf32>
    %cst_66 = arith.constant dense<0.000000e+00> : vector<8x512xf32>
    %264 = tpu.matmul %254, %3, %cst_66 {dimension_numbers = #tpu.dot_dimension_numbers<[1], [0], [0], [1], [0, 0, 1, 1], [], []>} : vector<8x128xf32>, vector<128x512xf32>, vector<8x512xf32> -> vector<8x512xf32>
    %265 = arith.addf %263, %264 : vector<8x512xf32>
    %266 = vector.extract_strided_slice %265 {offsets = [0, 0], sizes = [8, 128], strides = [1, 1]} : vector<8x512xf32> to vector<8x128xf32>
    %267 = arith.negf %266 : vector<8x128xf32>
    %268 = math.exp %267 : vector<8x128xf32>
    %cst_67 = arith.constant 1.000000e+00 : f32
    %269 = vector.broadcast %cst_67 : f32 to vector<8x128xf32>
    %270 = arith.addf %269, %268 : vector<8x128xf32>
    %271 = arith.divf %269, %270 : vector<8x128xf32>
    %272 = vector.extract_strided_slice %265 {offsets = [0, 128], sizes = [8, 128], strides = [1, 1]} : vector<8x512xf32> to vector<8x128xf32>
    %273 = arith.negf %272 : vector<8x128xf32>
    %274 = math.exp %273 : vector<8x128xf32>
    %cst_68 = arith.constant 1.000000e+00 : f32
    %275 = vector.broadcast %cst_68 : f32 to vector<8x128xf32>
    %276 = arith.addf %275, %274 : vector<8x128xf32>
    %277 = arith.divf %275, %276 : vector<8x128xf32>
    %278 = vector.extract_strided_slice %265 {offsets = [0, 256], sizes = [8, 128], strides = [1, 1]} : vector<8x512xf32> to vector<8x128xf32>
    %279 = math.tanh %278 : vector<8x128xf32>
    %280 = vector.extract_strided_slice %265 {offsets = [0, 384], sizes = [8, 128], strides = [1, 1]} : vector<8x512xf32> to vector<8x128xf32>
    %281 = arith.negf %280 : vector<8x128xf32>
    %282 = math.exp %281 : vector<8x128xf32>
    %cst_69 = arith.constant 1.000000e+00 : f32
    %283 = vector.broadcast %cst_69 : f32 to vector<8x128xf32>
    %284 = arith.addf %283, %282 : vector<8x128xf32>
    %285 = arith.divf %283, %284 : vector<8x128xf32>
    %286 = arith.mulf %277, %252 : vector<8x128xf32>
    %287 = arith.mulf %271, %279 : vector<8x128xf32>
    %288 = arith.addf %286, %287 : vector<8x128xf32>
    %289 = math.tanh %288 : vector<8x128xf32>
    %290 = arith.mulf %285, %289 : vector<8x128xf32>
    %291 = arith.index_cast %c7_i32 : i32 to index
    %c0_70 = arith.constant 0 : index
    %c0_71 = arith.constant 0 : index
    %292 = vector.load %arg5[%291, %c0_70, %c0_71] : memref<8x8x128xf32, #tpu.memory_space<vmem>>, vector<1x8x128xf32>
    %293 = vector.shape_cast %292 : vector<1x8x128xf32> to vector<8x128xf32>
    %294 = vector.shape_cast %290 : vector<8x128xf32> to vector<1x8x128xf32>
    tpu.vector_store %arg5[%291, %c0_70, %c0_71], %294 {strides = array<i32>} : memref<8x8x128xf32, #tpu.memory_space<vmem>>, vector<1x8x128xf32>,
    %c8_i32 = arith.constant 8 : i32
    %c0_72 = arith.constant 0 : index
    %c0_73 = arith.constant 0 : index
    %295 = vector.load %arg8[%c0_72, %c0_73] : memref<8x128xf32, #tpu.memory_space<vmem>>, vector<8x128xf32>
    tpu.vector_store %arg8[%c0_72, %c0_73], %290 {strides = array<i32>} : memref<8x128xf32, #tpu.memory_space<vmem>>, vector<8x128xf32>,
    %c0_74 = arith.constant 0 : index
    %c0_75 = arith.constant 0 : index
    %296 = vector.load %arg9[%c0_74, %c0_75] : memref<8x128xf32, #tpu.memory_space<vmem>>, vector<8x128xf32>
    tpu.vector_store %arg9[%c0_74, %c0_75], %288 {strides = array<i32>} : memref<8x128xf32, #tpu.memory_space<vmem>>, vector<8x128xf32>,
    %c0_i32_76 = arith.constant 0 : i32
    %297 = arith.cmpi eq, %arg1, %c0_i32_76 : i32
    %298 = arith.extui %297 : i1 to i32
    %c0_i32_77 = arith.constant 0 : i32
    %299 = arith.cmpi ne, %298, %c0_i32_77 : i32
    scf.if %299 {
      %c0_78 = arith.constant 0 : index
      %c0_79 = arith.constant 0 : index
      %300 = vector.load %arg6[%c0_78, %c0_79] : memref<8x128xf32, #tpu.memory_space<vmem>>, vector<8x128xf32>
      tpu.vector_store %arg6[%c0_78, %c0_79], %290 {strides = array<i32>} : memref<8x128xf32, #tpu.memory_space<vmem>>, vector<8x128xf32>,
      %c0_80 = arith.constant 0 : index
      %c0_81 = arith.constant 0 : index
      %301 = vector.load %arg7[%c0_80, %c0_81] : memref<8x128xf32, #tpu.memory_space<vmem>>, vector<8x128xf32>
      tpu.vector_store %arg7[%c0_80, %c0_81], %288 {strides = array<i32>} : memref<8x128xf32, #tpu.memory_space<vmem>>, vector<8x128xf32>,
    } else {
    }
    return
  }
  func.func @transform_0(%arg0: i32, %arg1: i32) -> (i32, i32, i32) {
    %c0_i32 = arith.constant 0 : i32
    %c0_i32_0 = arith.constant 0 : i32
    return %arg1, %arg0, %c0_i32 : i32, i32, i32
  }
  func.func @transform_1(%arg0: i32, %arg1: i32) -> (i32, i32) {
    %c0_i32 = arith.constant 0 : i32
    %c0_i32_0 = arith.constant 0 : i32
    %c0_i32_1 = arith.constant 0 : i32
    return %c0_i32, %c0_i32_0 : i32, i32
  }
  func.func @transform_2(%arg0: i32, %arg1: i32) -> (i32, i32) {
    %c0_i32 = arith.constant 0 : i32
    %c0_i32_0 = arith.constant 0 : i32
    %c0_i32_1 = arith.constant 0 : i32
    return %c0_i32, %c0_i32_0 : i32, i32
  }
  func.func @transform_3(%arg0: i32, %arg1: i32) -> (i32, i32, i32) {
    %c0_i32 = arith.constant 0 : i32
    %c0_i32_0 = arith.constant 0 : i32
    return %arg1, %arg0, %c0_i32 : i32, i32, i32
  }
  func.func @transform_4(%arg0: i32, %arg1: i32) -> (i32, i32) {
    %c0_i32 = arith.constant 0 : i32
    %c0_i32_0 = arith.constant 0 : i32
    return %arg0, %c0_i32 : i32, i32
  }
  func.func @transform_5(%arg0: i32, %arg1: i32) -> (i32, i32) {
    %c0_i32 = arith.constant 0 : i32
    %c0_i32_0 = arith.constant 0 : i32
    return %arg0, %c0_i32 : i32, i32
  }
}

</mosaic_0001>

<bundles_post_ra>
// kernel: multilayer_lstm_forward.2
= control target key start
LH: loop header
LB: loop body
LE: loop exit
PB: predicated region body
PF: predicated region fallthrough
CT: control target
= control target key end

     0   :  { %11 = vsyncpa [#allocation5], 0  ;;  %s2318_s18 = smov [#allocation4]   ;;  %s2895_s0 = inlined_call_operand.vmem [shape: f32[8,8,512], index: 0, kind: input, shape index: {}]   ;;  %s2896_s1 = inlined_call_operand.vmem [shape: f32[1,512], index: 1, kind: input, shape index: {}]   ;;  %s2897_s2 = inlined_call_operand.hbm [shape: f32[128,512], index: 2, kind: input, shape index: {}]   ;;  %s2898_s3 = inlined_call_operand.vmem [shape: f32[8,8,128], index: 3, kind: output, shape index: {0}]   ;;  %s2899_s4 = inlined_call_operand.vmem [shape: f32[8,128], index: 4, kind: output, shape index: {1}]   ;;  %s2900_s5 = inlined_call_operand.vmem [shape: f32[8,128], index: 5, kind: output, shape index: {2}]  }
   0x1   :  { %s21_s19 = sshll.u32 %s2318_s18, 4  ;;  %s2294_s22 = scalar_lea.hbm %s2897_s2, 8192  ;;  %s22_s19 = int_to_ptr.vmem [resolvable:$true] %s21_s19 }
   0x2   :  { %p2295_p0 = scmp.ne.s32.totalorder %s2897_s2, %s2294_s22  ;;  %p2298_p1 = scmp.lt.u32.totalorder %s2294_s22, %s2897_s2 }
   0x4   :  { %p2300_p2 = pnand %p2298_p1, %p2295_p0 }
   0x6   :  { %2303 = shalt.err (!%p2300_p2)
}
   0x7   :  { %s2304_s27 = scalar_lea.vmem %s22_s19, 8192  ;;  %p2309_p4 = scmp.lt.s32.totalorder %s22_s19, %s22_s19 }
   0x8   :  { %p2305_p3 = scmp.ne.s32.totalorder %s22_s19, %s2304_s27  ;;  %p2310_p5 = scmp.lt.s32.totalorder %s2304_s27, %s2304_s27 }
   0xa   :  { %p2311_p6 = por %p2310_p5, %p2309_p4 }
   0xc   :  { %p2312_p7 = pnand %p2311_p6, %p2305_p3 }
   0xe   :  { %2315 = shalt.err (!%p2312_p7)
}
   0xf   :  { %s2319_s28 = smov 512   ;;  %s2320_s29 = smov 32  }
  0x10   :  { %27 = dma.hbm_to_vmem [thread:$0]  %s2897_s2, 8192, %s22_s19, [#allocation5], %s2319_s28, %s2319_s28, %s2320_s29  }
  0x11   :  { %2316 = dma.done.wait [#allocation5], 8192  }
  0x12   :  { %2317 = vsyncadd [#allocation5], 4294959104  ;;  %v2321_v0 = vmov 0.0   ;;  %v38_v1 = vld [vmem:[#allocation4 + $0x8] sm:$0xff]  ;;  %v37_v3 = vld [vmem:[#allocation4] sm:$0xff] }
  0x13   :  { %197 = vmatprep.mubr.f32.mxu0 %v2321_v0  ;;  %268 = vmatprep.mubr.f32.mxu1 %v2321_v0  ;;  %v42_v2 = vld [vmem:[#allocation4 + $0x28] sm:$0xff]  ;;  %v41_v5 = vld [vmem:[#allocation4 + $0x20] sm:$0xff]  ;;  %v40_v19 = vld [vmem:[#allocation4 + $0x18] sm:$0xff] }
  0x14   :  { %v2366_v4 = vpack.c.bf16 %v42_v2, %v38_v1  ;;  %v46_v6 = vld [vmem:[#allocation4 + $0x48] sm:$0xff]  ;;  %v2368_v8 = vpack.c.bf16 %v41_v5, %v37_v3  ;;  %v45_v10 = vld [vmem:[#allocation4 + $0x40] sm:$0xff]  ;;  %v44_v20 = vld [vmem:[#allocation4 + $0x38] sm:$0xff] }
  0x15   :  { %v50_v7 = vld [vmem:[#allocation4 + $0x68] sm:$0xff]  ;;  %v49_v11 = vld [vmem:[#allocation4 + $0x60] sm:$0xff]  ;;  %v2379_v22 = vpack.c.bf16 %v44_v20, %v40_v19  ;;  %v39_v23 = vld [vmem:[#allocation4 + $0x10] sm:$0xff] }
  0x16   :  { %v2370_v9 = vpack.c.bf16 %v50_v7, %v46_v6  ;;  %v54_v12 = vld [vmem:[#allocation4 + $0x88] sm:$0xff]  ;;  %1651 = vmatprep.subr.bf16.mxu0 %v2366_v4  ;;  %v2374_v14 = vpack.c.bf16 %v49_v11, %v45_v10  ;;  %v53_v15 = vld [vmem:[#allocation4 + $0x80] sm:$0xff]  ;;  %v43_v24 = vld [vmem:[#allocation4 + $0x30] sm:$0xff] }
  0x17   :  { %v58_v13 = vld [vmem:[#allocation4 + $0xa8] sm:$0xff]  ;;  %1653 = vmatpush1.bf16.msra.mxu0 %v2368_v8  ;;  %v57_v16 = vld [vmem:[#allocation4 + $0xa0] sm:$0xff]  ;;  %v2381_v25 = vpack.c.bf16 %v43_v24, %v39_v23  ;;  %1683 = vmatprep.subr.bf16.mxu1 %v2379_v22  ;;  %v48_v27 = vld [vmem:[#allocation4 + $0x58] sm:$0xff] }
  0x18   :  { %1655 = vmatprep.subr.bf16.mxu0 %v2370_v9  ;;  %v2377_v17 = vpack.c.bf16 %v58_v13, %v54_v12  ;;  %v62_v18 = vld [vmem:[#allocation4 + $0xc8] sm:$0xff]  ;;  %v2384_v26 = vpack.c.bf16 %v57_v16, %v53_v15  ;;  %v52_v28 = vld [vmem:[#allocation4 + $0x78] sm:$0xff]  ;;  %v47_v29 = vld [vmem:[#allocation4 + $0x50] sm:$0xff] }
  0x19   :  { %v66_v21 = vld [vmem:[#allocation4 + $0xe8] sm:$0xff]  ;;  %v61_v31 = vld [vmem:[#allocation4 + $0xc0] sm:$0xff]  ;;  %1685 = vmatpush1.bf16.msra.mxu1 %v2381_v25  ;;  %v2391_v33 = vpack.c.bf16 %v52_v28, %v48_v27  ;;  %v51_v34 = vld [vmem:[#allocation4 + $0x70] sm:$0xff] }
  0x1a   :  { %v2388_v30 = vpack.c.bf16 %v66_v21, %v62_v18  ;;  %v65_v32 = vld [vmem:[#allocation4 + $0xe0] sm:$0xff]  ;;  %v70_v35 = vld [vmem:[#allocation4 + $0x108] sm:$0xff]  ;;  %v2393_v37 = vpack.c.bf16 %v51_v34, %v47_v29  ;;  %v56_v38 = vld [vmem:[#allocation4 + $0x98] sm:$0xff] }
  0x1b   :  { %1657 = vmatpush1.bf16.msra.mxu0 %v2374_v14  ;;  %v74_v36 = vld [vmem:[#allocation4 + $0x128] sm:$0xff]  ;;  %1687 = vmatprep.subr.bf16.mxu1 %v2391_v33  ;;  %v60_v39 = vld [vmem:[#allocation4 + $0xb8] sm:$0xff]  ;;  %v55_v40 = vld [vmem:[#allocation4 + $0x90] sm:$0xff]  ;;  %v2397_v42 = vpack.c.bf16 %v65_v32, %v61_v31 }
  0x1c   :  { %1659 = vmatprep.subr.bf16.mxu0 %v2377_v17  ;;  %v59_v41 = vld [vmem:[#allocation4 + $0xb0] sm:$0xff]  ;;  %v69_v43 = vld [vmem:[#allocation4 + $0x100] sm:$0xff]  ;;  %v2399_v45 = vpack.c.bf16 %v60_v39, %v56_v38  ;;  %v2402_v46 = vpack.c.bf16 %v74_v36, %v70_v35  ;;  %v78_v47 = vld [vmem:[#allocation4 + $0x148] sm:$0xff] }
  0x1d   :  { %v73_v44 = vld [vmem:[#allocation4 + $0x120] sm:$0xff]  ;;  %1689 = vmatpush1.bf16.msra.mxu1 %v2393_v37  ;;  %v2405_v48 = vpack.c.bf16 %v59_v41, %v55_v40  ;;  %v64_v49 = vld [vmem:[#allocation4 + $0xd8] sm:$0xff]  ;;  %v82_v51 = vld [vmem:[#allocation4 + $0x168] sm:$0xff] }
  0x1e   :  { %v68_v50 = vld [vmem:[#allocation4 + $0xf8] sm:$0xff]  ;;  %1691 = vmatprep.subr.bf16.mxu1 %v2399_v45  ;;  %v63_v53 = vld [vmem:[#allocation4 + $0xd0] sm:$0xff]  ;;  %v2411_v55 = vpack.c.bf16 %v73_v44, %v69_v43  ;;  %v2414_v58 = vpack.c.bf16 %v82_v51, %v78_v47  ;;  %v77_v59 = vld [vmem:[#allocation4 + $0x140] sm:$0xff] }
  0x1f   :  { %1661 = vmatpush1.bf16.msra.mxu0 %v2384_v26  ;;  %v2408_v52 = vpack.c.bf16 %v68_v50, %v64_v49  ;;  %v67_v54 = vld [vmem:[#allocation4 + $0xf0] sm:$0xff]  ;;  %v72_v56 = vld [vmem:[#allocation4 + $0x118] sm:$0xff]  ;;  %v81_v60 = vld [vmem:[#allocation4 + $0x160] sm:$0xff]  ;;  %v109_v49 = vlaneseq }
  0x20   :  { %1663 = vmatprep.subr.bf16.mxu0 %v2388_v30  ;;  %v76_v57 = vld [vmem:[#allocation4 + $0x138] sm:$0xff]  ;;  %v86_v61 = vld [vmem:[#allocation4 + $0x188] sm:$0xff]  ;;  %v2417_v62 = vpack.c.bf16 %v67_v54, %v63_v53  ;;  %v71_v2 = vld [vmem:[#allocation4 + $0x110] sm:$0xff]  ;;  %v2423_v7 = vpack.c.bf16 %v81_v60, %v77_v59 }
  0x21   :  { %1693 = vmatpush1.bf16.msra.mxu1 %v2405_v48  ;;  %v90_v63 = vld [vmem:[#allocation4 + $0x1a8] sm:$0xff]  ;;  %v2420_v1 = vpack.c.bf16 %v76_v57, %v72_v56  ;;  %v75_v3 = vld [vmem:[#allocation4 + $0x130] sm:$0xff]  ;;  %v80_v5 = vld [vmem:[#allocation4 + $0x158] sm:$0xff]  ;;  %v110_v50 = vshrl.u32 %v109_v49, 7 }
  0x22   :  { %1695 = vmatprep.subr.bf16.mxu1 %v2408_v52  ;;  %v84_v6 = vld [vmem:[#allocation4 + $0x178] sm:$0xff]  ;;  %v2426_v10 = vpack.c.bf16 %v90_v63, %v86_v61  ;;  %v85_v11 = vld [vmem:[#allocation4 + $0x180] sm:$0xff]  ;;  %v94_v13 = vld [vmem:[#allocation4 + $0x1c8] sm:$0xff]  ;;  %v2429_v15 = vpack.c.bf16 %v75_v3, %v71_v2 }
  0x23   :  { %1665 = vmatpush1.bf16.msra.mxu0 %v2397_v42  ;;  %v89_v12 = vld [vmem:[#allocation4 + $0x1a0] sm:$0xff]  ;;  %v98_v16 = vld [vmem:[#allocation4 + $0x1e8] sm:$0xff]  ;;  %v2432_v18 = vpack.c.bf16 %v84_v6, %v80_v5  ;;  %v79_v19 = vld [vmem:[#allocation4 + $0x150] sm:$0xff]  ;;  %v111_v51 = vsub.s32 0, %v110_v50  ;;  %v115_v54 = vsub.s32 1, %v110_v50  ;;  %v123_v61 = vsub.s32 3, %v110_v50 }
  0x24   :  { %1667 = vmatprep.subr.bf16.mxu0 %v2402_v46  ;;  %v83_v20 = vld [vmem:[#allocation4 + $0x170] sm:$0xff]  ;;  %v88_v21 = vld [vmem:[#allocation4 + $0x198] sm:$0xff]  ;;  %v2435_v24 = vpack.c.bf16 %v89_v12, %v85_v11  ;;  %v2438_v27 = vpack.c.bf16 %v98_v16, %v94_v13  ;;  %v93_v28 = vld [vmem:[#allocation4 + $0x1c0] sm:$0xff]  ;;  %v119_v6 = vsub.s32 2, %v110_v50 }
  0x25   :  { %1697 = vmatpush1.bf16.msra.mxu1 %v2417_v62  ;;  %v92_v23 = vld [vmem:[#allocation4 + $0x1b8] sm:$0xff]  ;;  %v97_v29 = vld [vmem:[#allocation4 + $0x1e0] sm:$0xff]  ;;  %v2441_v31 = vpack.c.bf16 %v83_v20, %v79_v19  ;;  %v87_v34 = vld [vmem:[#allocation4 + $0x190] sm:$0xff] }
  0x26   :  { %1699 = vmatprep.subr.bf16.mxu1 %v2420_v1  ;;  %v2444_v32 = vpack.c.bf16 %v92_v23, %v88_v21  ;;  %v91_v35 = vld [vmem:[#allocation4 + $0x1b0] sm:$0xff]  ;;  %v96_v36 = vld [vmem:[#allocation4 + $0x1d8] sm:$0xff]  ;;  %v2447_v39 = vpack.c.bf16 %v97_v29, %v93_v28  ;;  %v101_v53 = vld [vmem:[%s2896_s1] sm:$0xf] }
  0x27   :  { %1669 = vmatpush1.bf16.msra.mxu0 %v2411_v55  ;;  %v100_v38 = vld [vmem:[#allocation4 + $0x1f8] sm:$0xff]  ;;  %v2451_v40 = vpack.c.bf16 %v91_v35, %v87_v34  ;;  %v95_v43 = vld [vmem:[#allocation4 + $0x1d0] sm:$0xff]  ;;  %v2503_v56 = vrot.slane %v101_v53, %v111_v51  ;;  %v104_v57 = vld [vmem:[%s2895_s0] sm:$0xff]  ;;  %v2508_v59 = vrot.slane %v101_v53, %v115_v54  ;;  %v2515_v3 = vrot.slane %v101_v53, %v123_v61 }
  0x28   :  { %1671 = vmatprep.subr.bf16.mxu0 %v2414_v58  ;;  %v2454_v41 = vpack.c.bf16 %v100_v38, %v96_v36  ;;  %v99_v44 = vld [vmem:[#allocation4 + $0x1f0] sm:$0xff]  ;;  %v105_v60 = vld [vmem:[%s2895_s0 + $0x8] sm:$0xff]  ;;  %v107_v11 = vld [vmem:[%s2895_s0 + $0x18] sm:$0xff]  ;;  %v2521_v23 = vrot.slane %v101_v53, %v119_v6 }
  0x29   :  { %1701 = vmatpush1.bf16.msra.mxu1 %v2429_v15  ;;  %v2458_v47 = vpack.c.bf16 %v99_v44, %v95_v43  ;;  %v129_v63 = vadd.f32 %v2503_v56, %v104_v57  ;;  %v130_v2 = vadd.f32 %v2508_v59, %v105_v60  ;;  %v132_v20 = vadd.f32 %v2515_v3, %v107_v11  ;;  %v106_v28 = vld [vmem:[%s2895_s0 + $0x10] sm:$0xff] }
  0x2a   :  { %1703 = vmatprep.subr.bf16.mxu1 %v2432_v18  ;;  %v131_v36 = vadd.f32 %v2521_v23, %v106_v28 }
  0x2b   :  { %1673 = vmatpush1.bf16.msra.mxu0 %v2423_v7 }
  0x2c   :  { %1675 = vmatprep.subr.bf16.mxu0 %v2426_v10 }
  0x2d   :  { %1705 = vmatpush1.bf16.msra.mxu1 %v2441_v31 }
  0x2e   :  { %1707 = vmatprep.subr.bf16.mxu1 %v2444_v32 }
  0x2f   :  { %1677 = vmatpush1.bf16.msra.mxu0 %v2435_v24 }
  0x30   :  { %1679 = vmatprep.subr.bf16.mxu0 %v2438_v27 }
  0x31   :  { %1709 = vmatpush1.bf16.msra.mxu1 %v2451_v40 }
  0x32   :  { %1711 = vmatprep.subr.bf16.mxu1 %v2454_v41 }
  0x33   :  { %1681 = vmatpush1.bf16.msra.mxu0 %v2447_v39 }
  0x34   :  { %1715 = vmatprep.subr.bf16.mxu0 %v2366_v4 }
  0x35   :  { %1713 = vmatpush1.bf16.msra.mxu1 %v2458_v47 }
  0x36   :  { %198 = vmatmul.mubr.f32.vlgmr.msra.gmra.mrb[0].mxu0 %v2321_v0  ;;  %1747 = vmatprep.subr.bf16.mxu1 %v2379_v22 }
  0x37   :  { %1717 = vmatpush1.bf16.msra.mxu0 %v2368_v8  ;;  %377 = vmatprep.mubr.f32.mxu0 %v2321_v0 }
  0x38   :  { %1719 = vmatprep.subr.bf16.mxu0 %v2370_v9  ;;  %269 = vmatmul.mubr.f32.vlgmr.msra.gmra.mrb[0].mxu1 %v2321_v0 }
  0x39   :  { %1749 = vmatpush1.bf16.msra.mxu1 %v2381_v25  ;;  %448 = vmatprep.mubr.f32.mxu1 %v2321_v0 }
  0x3a   :  { %1751 = vmatprep.subr.bf16.mxu1 %v2391_v33 }
  0x3b   :  { %1721 = vmatpush1.bf16.msra.mxu0 %v2374_v14 }
  0x3c   :  { %1723 = vmatprep.subr.bf16.mxu0 %v2377_v17 }
  0x3d   :  { %1753 = vmatpush1.bf16.msra.mxu1 %v2393_v37 }
  0x3e   :  { %1755 = vmatprep.subr.bf16.mxu1 %v2399_v45 }
  0x3f   :  { %1725 = vmatpush1.bf16.msra.mxu0 %v2384_v26 }
  0x40   :  { %1727 = vmatprep.subr.bf16.mxu0 %v2388_v30 }
  0x41   :  { %1757 = vmatpush1.bf16.msra.mxu1 %v2405_v48 }
  0x42   :  { %1759 = vmatprep.subr.bf16.mxu1 %v2408_v52 }
  0x43   :  { %1729 = vmatpush1.bf16.msra.mxu0 %v2397_v42 }
  0x44   :  { %1731 = vmatprep.subr.bf16.mxu0 %v2402_v46 }
  0x45   :  { %1761 = vmatpush1.bf16.msra.mxu1 %v2417_v62 }
  0x46   :  { %1763 = vmatprep.subr.bf16.mxu1 %v2420_v1 }
  0x47   :  { %1733 = vmatpush1.bf16.msra.mxu0 %v2411_v55 }
  0x48   :  { %1735 = vmatprep.subr.bf16.mxu0 %v2414_v58 }
  0x49   :  { %1765 = vmatpush1.bf16.msra.mxu1 %v2429_v15 }
  0x4a   :  { %1767 = vmatprep.subr.bf16.mxu1 %v2432_v18 }
  0x4b   :  { %1737 = vmatpush1.bf16.msra.mxu0 %v2423_v7 }
  0x4c   :  { %1739 = vmatprep.subr.bf16.mxu0 %v2426_v10 }
  0x4d   :  { %1769 = vmatpush1.bf16.msra.mxu1 %v2441_v31 }
  0x4e   :  { %1771 = vmatprep.subr.bf16.mxu1 %v2444_v32 }
  0x4f   :  { %1741 = vmatpush1.bf16.msra.mxu0 %v2435_v24 }
  0x50   :  { %1743 = vmatprep.subr.bf16.mxu0 %v2438_v27 }
  0x51   :  { %1773 = vmatpush1.bf16.msra.mxu1 %v2451_v40 }
  0x52   :  { %1775 = vmatprep.subr.bf16.mxu1 %v2454_v41 }
  0x53   :  { %1745 = vmatpush1.bf16.msra.mxu0 %v2447_v39 }
  0x54   :  { %1779 = vmatprep.subr.bf16.mxu0 %v2366_v4 }
  0x55   :  { %1777 = vmatpush1.bf16.msra.mxu1 %v2458_v47 }
  0x56   :  { %1811 = vmatprep.subr.bf16.mxu1 %v2379_v22 }
 0x109   :  { %v199_v5 = vpop.f32.mrb[0].mxu0 }
 0x10a   :  { %v275_v12 = vadd.f32 %v199_v5, %v129_v63  ;;  %v201_v13 = vpop.f32.mrb[1].mxu0 }
 0x10b   :  { %v276_v16 = vadd.f32 %v201_v13, %v130_v2  ;;  %v270_v29 = vpop.f32.mrb[0].mxu1  ;;  %v1594_v13 = vld [vmem:[%s2895_s0 + $0x20] sm:$0xff] }
 0x10c   :  { %v1591_v19 = vmul.f32 -1.442695, %v275_v12  ;;  %v272_v34 = vpop.f32.mrb[1].mxu1  ;;  %v277_v43 = vadd.f32 %v270_v29, %v131_v36 }
 0x10d   :  { %v1592_v21 = vmul.f32 -1.442695, %v276_v16  ;;  %v278_v35 = vadd.f32 %v272_v34, %v132_v20  ;;  %v1595_v16 = vld [vmem:[%s2895_s0 + $0x28] sm:$0xff] }
 0x10e   :  { %2166 = vpow2.f32 %v1591_v19  ;;  %v309_v19 = vadd.f32 %v1594_v13, %v2503_v56  ;;  %v310_v20 = vadd.f32 %v1595_v16, %v2508_v59 }
 0x10f   :  { %2168 = vpow2.f32 %v1592_v21  ;;  %v1593_v38 = vmul.f32 -1.442695, %v278_v35  ;;  %v1597_v35 = vld [vmem:[%s2895_s0 + $0x38] sm:$0xff] }
 0x111   :  { %2170 = vpow2.f32 %v1593_v38 }
 0x112   :  { %2172 = vtanh.f32 %v277_v43 }
 0x118   :  { %v2167_v44 = vpop.eup %2166 }
 0x119   :  { %v2169_v49 = vpop.eup %2168  ;;  %v282_v50 = vadd.f32 1.0, %v2167_v44 }
 0x11a   :  { %v288_v51 = vadd.f32 1.0, %v2169_v49  ;;  %v312_v49 = vadd.f32 %v1597_v35, %v2515_v3  ;;  %v1603_v35 = vld [vmem:[%s2895_s0 + $0x48] sm:$0xff] }
 0x11b   :  { %2174 = vrcp.f32 %v282_v50  ;;  %v2171_v53 = vpop.eup %2170  ;;  %v1596_v50 = vld [vmem:[%s2895_s0 + $0x30] sm:$0xff] }
 0x11c   :  { %2176 = vrcp.f32 %v288_v51  ;;  %v2173_v54 = vpop.eup %2172  ;;  %v295_v60 = vadd.f32 1.0, %v2171_v53  ;;  %v311_v53 = vadd.f32 %v1596_v50, %v2521_v23 }
 0x11e   :  { %2178 = vrcp.f32 %v295_v60 }
 0x125   :  { %v2175_v57 = vpop.eup %2174 }
 0x126   :  { %v2177_v61 = vpop.eup %2176  ;;  %v299_v63 = vmul.f32 %v2175_v57, %v2173_v54 }
 0x127   :  { %v298_v2 = vmul.f32 0.0, %v2177_v61 }
 0x128   :  { %v2179_v6 = vpop.eup %2178 }
 0x129   :  { %v2527_v5 = vadd.f32 %v299_v63, %v298_v2 }
 0x12b   :  { %2180 = vtanh.f32 %v2527_v5 }
 0x135   :  { %v2181_v11 = vpop.eup %2180 }
 0x136   :  { %v302_v12 = vmul.f32 %v2181_v11, %v2179_v6 }
 0x138   :  { %303 = vst [vmem:[%s2898_s3] sm:$0xff] %v302_v12  ;;  %378 = vmatmul.mubr.f32.vlgmr.msra.gmra.mrb[2].mxu0 %v302_v12  ;;  %449 = vmatmul.mubr.f32.vlgmr.msra.gmra.mrb[2].mxu1 %v302_v12 }
 0x139   :  { %1781 = vmatpush1.bf16.msra.mxu0 %v2368_v8  ;;  %1813 = vmatpush1.bf16.msra.mxu1 %v2381_v25 }
 0x13a   :  { %1783 = vmatprep.subr.bf16.mxu0 %v2370_v9  ;;  %1815 = vmatprep.subr.bf16.mxu1 %v2391_v33 }
 0x13b   :  { %558 = vmatprep.mubr.f32.mxu0 %v2321_v0  ;;  %629 = vmatprep.mubr.f32.mxu1 %v2321_v0 }
 0x13d   :  { %1785 = vmatpush1.bf16.msra.mxu0 %v2374_v14  ;;  %1817 = vmatpush1.bf16.msra.mxu1 %v2393_v37 }
 0x13e   :  { %1787 = vmatprep.subr.bf16.mxu0 %v2377_v17  ;;  %1819 = vmatprep.subr.bf16.mxu1 %v2399_v45 }
 0x141   :  { %1789 = vmatpush1.bf16.msra.mxu0 %v2384_v26  ;;  %1821 = vmatpush1.bf16.msra.mxu1 %v2405_v48 }
 0x142   :  { %1791 = vmatprep.subr.bf16.mxu0 %v2388_v30  ;;  %1823 = vmatprep.subr.bf16.mxu1 %v2408_v52 }
 0x145   :  { %1793 = vmatpush1.bf16.msra.mxu0 %v2397_v42  ;;  %1825 = vmatpush1.bf16.msra.mxu1 %v2417_v62 }
 0x146   :  { %1795 = vmatprep.subr.bf16.mxu0 %v2402_v46  ;;  %1827 = vmatprep.subr.bf16.mxu1 %v2420_v1 }
 0x149   :  { %1797 = vmatpush1.bf16.msra.mxu0 %v2411_v55  ;;  %1829 = vmatpush1.bf16.msra.mxu1 %v2429_v15 }
 0x14a   :  { %1799 = vmatprep.subr.bf16.mxu0 %v2414_v58  ;;  %1831 = vmatprep.subr.bf16.mxu1 %v2432_v18 }
 0x14d   :  { %1801 = vmatpush1.bf16.msra.mxu0 %v2423_v7  ;;  %1833 = vmatpush1.bf16.msra.mxu1 %v2441_v31 }
 0x14e   :  { %1803 = vmatprep.subr.bf16.mxu0 %v2426_v10  ;;  %1835 = vmatprep.subr.bf16.mxu1 %v2444_v32 }
 0x151   :  { %1805 = vmatpush1.bf16.msra.mxu0 %v2435_v24  ;;  %1837 = vmatpush1.bf16.msra.mxu1 %v2451_v40 }
 0x152   :  { %1807 = vmatprep.subr.bf16.mxu0 %v2438_v27  ;;  %1839 = vmatprep.subr.bf16.mxu1 %v2454_v41 }
 0x155   :  { %1809 = vmatpush1.bf16.msra.mxu0 %v2447_v39  ;;  %1841 = vmatpush1.bf16.msra.mxu1 %v2458_v47 }
 0x156   :  { %1843 = vmatprep.subr.bf16.mxu0 %v2366_v4  ;;  %1875 = vmatprep.subr.bf16.mxu1 %v2379_v22 }
 0x20b   :  { %v379_v21 = vpop.f32.mrb[2].mxu0  ;;  %v450_v28 = vpop.f32.mrb[2].mxu1 }
 0x20c   :  { %v455_v29 = vadd.f32 %v379_v21, %v309_v19  ;;  %v381_v34 = vpop.f32.mrb[3].mxu0  ;;  %v452_v36 = vpop.f32.mrb[3].mxu1  ;;  %v457_v57 = vadd.f32 %v450_v28, %v311_v53 }
 0x20d   :  { %v456_v38 = vadd.f32 %v381_v34, %v310_v20  ;;  %v458_v51 = vadd.f32 %v452_v36, %v312_v49 }
 0x20e   :  { %v1598_v43 = vmul.f32 -1.442695, %v455_v29 }
 0x20f   :  { %v1599_v44 = vmul.f32 -1.442695, %v456_v38  ;;  %v1600_v54 = vmul.f32 -1.442695, %v458_v51  ;;  %v491_v38 = vadd.f32 %v1603_v35, %v2508_v59  ;;  %v1605_v51 = vld [vmem:[%s2895_s0 + $0x58] sm:$0xff] }
 0x210   :  { %2182 = vpow2.f32 %v1598_v43 }
 0x211   :  { %2184 = vpow2.f32 %v1599_v44 }
 0x212   :  { %2186 = vpow2.f32 %v1600_v54 }
 0x213   :  { %2188 = vtanh.f32 %v457_v57 }
 0x21a   :  { %v2183_v60 = vpop.eup %2182 }
 0x21b   :  { %v2185_v61 = vpop.eup %2184  ;;  %v462_v63 = vadd.f32 1.0, %v2183_v60 }
 0x21c   :  { %v468_v2 = vadd.f32 1.0, %v2185_v61  ;;  %v2187_v6 = vpop.eup %2186  ;;  %v493_v61 = vadd.f32 %v1605_v51, %v2515_v3  ;;  %v1611_v51 = vld [vmem:[%s2895_s0 + $0x68] sm:$0xff] }
 0x21d   :  { %2190 = vrcp.f32 %v462_v63  ;;  %v2189_v11 = vpop.eup %2188  ;;  %v475_v19 = vadd.f32 1.0, %v2187_v6  ;;  %v1604_v63 = vld [vmem:[%s2895_s0 + $0x50] sm:$0xff] }
 0x21e   :  { %2192 = vrcp.f32 %v468_v2  ;;  %v492_v6 = vadd.f32 %v1604_v63, %v2521_v23 }
 0x21f   :  { %2194 = vrcp.f32 %v475_v19 }
 0x227   :  { %v2191_v12 = vpop.eup %2190 }
 0x228   :  { %v2193_v13 = vpop.eup %2192  ;;  %v479_v16 = vmul.f32 %v2191_v12, %v2189_v11 }
 0x229   :  { %v478_v20 = vmul.f32 %v2193_v13, %v2527_v5  ;;  %v2195_v28 = vpop.eup %2194  ;;  %v1602_v5 = vld [vmem:[%s2895_s0 + $0x40] sm:$0xff] }
 0x22a   :  { %v490_v36 = vadd.f32 %v1602_v5, %v2503_v56 }
 0x22b   :  { %v2584_v21 = vadd.f32 %v479_v16, %v478_v20 }
 0x22d   :  { %2196 = vtanh.f32 %v2584_v21 }
 0x237   :  { %v2197_v29 = vpop.eup %2196 }
 0x238   :  { %v482_v34 = vmul.f32 %v2197_v29, %v2195_v28 }
 0x23a   :  { %1601 = vst [vmem:[%s2898_s3 + $0x8] sm:$0xff] %v482_v34  ;;  %559 = vmatmul.mubr.f32.vlgmr.msra.gmra.mrb[4].mxu0 %v482_v34  ;;  %630 = vmatmul.mubr.f32.vlgmr.msra.gmra.mrb[4].mxu1 %v482_v34 }
 0x23b   :  { %1845 = vmatpush1.bf16.msra.mxu0 %v2368_v8  ;;  %1877 = vmatpush1.bf16.msra.mxu1 %v2381_v25 }
 0x23c   :  { %1847 = vmatprep.subr.bf16.mxu0 %v2370_v9  ;;  %1879 = vmatprep.subr.bf16.mxu1 %v2391_v33 }
 0x23d   :  { %739 = vmatprep.mubr.f32.mxu0 %v2321_v0  ;;  %810 = vmatprep.mubr.f32.mxu1 %v2321_v0 }
 0x23f   :  { %1849 = vmatpush1.bf16.msra.mxu0 %v2374_v14  ;;  %1881 = vmatpush1.bf16.msra.mxu1 %v2393_v37 }
 0x240   :  { %1851 = vmatprep.subr.bf16.mxu0 %v2377_v17  ;;  %1883 = vmatprep.subr.bf16.mxu1 %v2399_v45 }
 0x243   :  { %1853 = vmatpush1.bf16.msra.mxu0 %v2384_v26  ;;  %1885 = vmatpush1.bf16.msra.mxu1 %v2405_v48 }
 0x244   :  { %1855 = vmatprep.subr.bf16.mxu0 %v2388_v30  ;;  %1887 = vmatprep.subr.bf16.mxu1 %v2408_v52 }
 0x247   :  { %1857 = vmatpush1.bf16.msra.mxu0 %v2397_v42  ;;  %1889 = vmatpush1.bf16.msra.mxu1 %v2417_v62 }
 0x248   :  { %1859 = vmatprep.subr.bf16.mxu0 %v2402_v46  ;;  %1891 = vmatprep.subr.bf16.mxu1 %v2420_v1 }
 0x24b   :  { %1861 = vmatpush1.bf16.msra.mxu0 %v2411_v55  ;;  %1893 = vmatpush1.bf16.msra.mxu1 %v2429_v15 }
 0x24c   :  { %1863 = vmatprep.subr.bf16.mxu0 %v2414_v58  ;;  %1895 = vmatprep.subr.bf16.mxu1 %v2432_v18 }
 0x24f   :  { %1865 = vmatpush1.bf16.msra.mxu0 %v2423_v7  ;;  %1897 = vmatpush1.bf16.msra.mxu1 %v2441_v31 }
 0x250   :  { %1867 = vmatprep.subr.bf16.mxu0 %v2426_v10  ;;  %1899 = vmatprep.subr.bf16.mxu1 %v2444_v32 }
 0x253   :  { %1869 = vmatpush1.bf16.msra.mxu0 %v2435_v24  ;;  %1901 = vmatpush1.bf16.msra.mxu1 %v2451_v40 }
 0x254   :  { %1871 = vmatprep.subr.bf16.mxu0 %v2438_v27  ;;  %1903 = vmatprep.subr.bf16.mxu1 %v2454_v41 }
 0x257   :  { %1873 = vmatpush1.bf16.msra.mxu0 %v2447_v39  ;;  %1905 = vmatpush1.bf16.msra.mxu1 %v2458_v47 }
 0x258   :  { %1907 = vmatprep.subr.bf16.mxu0 %v2366_v4  ;;  %1939 = vmatprep.subr.bf16.mxu1 %v2379_v22 }
 0x30d   :  { %v560_v43 = vpop.f32.mrb[4].mxu0  ;;  %v631_v44 = vpop.f32.mrb[4].mxu1 }
 0x30e   :  { %v636_v49 = vadd.f32 %v560_v43, %v490_v36  ;;  %v562_v50 = vpop.f32.mrb[5].mxu0  ;;  %v633_v53 = vpop.f32.mrb[5].mxu1  ;;  %v638_v12 = vadd.f32 %v631_v44, %v492_v6 }
 0x30f   :  { %v637_v54 = vadd.f32 %v562_v50, %v491_v38  ;;  %v639_v2 = vadd.f32 %v633_v53, %v493_v61 }
 0x310   :  { %v1606_v57 = vmul.f32 -1.442695, %v636_v49 }
 0x311   :  { %v1607_v60 = vmul.f32 -1.442695, %v637_v54  ;;  %v1608_v11 = vmul.f32 -1.442695, %v639_v2  ;;  %v672_v54 = vadd.f32 %v1611_v51, %v2508_v59  ;;  %v1613_v2 = vld [vmem:[%s2895_s0 + $0x78] sm:$0xff] }
 0x312   :  { %2198 = vpow2.f32 %v1606_v57 }
 0x313   :  { %2200 = vpow2.f32 %v1607_v60 }
 0x314   :  { %2202 = vpow2.f32 %v1608_v11 }
 0x315   :  { %2204 = vtanh.f32 %v638_v12 }
 0x31c   :  { %v2199_v13 = vpop.eup %2198 }
 0x31d   :  { %v2201_v16 = vpop.eup %2200  ;;  %v643_v19 = vadd.f32 1.0, %v2199_v13 }
 0x31e   :  { %v649_v20 = vadd.f32 1.0, %v2201_v16  ;;  %v2203_v28 = vpop.eup %2202  ;;  %v674_v16 = vadd.f32 %v1613_v2, %v2515_v3  ;;  %v1619_v2 = vld [vmem:[%s2895_s0 + $0x88] sm:$0xff] }
 0x31f   :  { %2206 = vrcp.f32 %v643_v19  ;;  %v2205_v29 = vpop.eup %2204  ;;  %v656_v36 = vadd.f32 1.0, %v2203_v28  ;;  %v1612_v19 = vld [vmem:[%s2895_s0 + $0x70] sm:$0xff] }
 0x320   :  { %2208 = vrcp.f32 %v649_v20  ;;  %v673_v28 = vadd.f32 %v1612_v19, %v2521_v23 }
 0x321   :  { %2210 = vrcp.f32 %v656_v36 }
 0x329   :  { %v2207_v34 = vpop.eup %2206 }
 0x32a   :  { %v2209_v5 = vpop.eup %2208  ;;  %v660_v35 = vmul.f32 %v2207_v34, %v2205_v29 }
 0x32b   :  { %v659_v38 = vmul.f32 %v2209_v5, %v2584_v21  ;;  %v2211_v44 = vpop.eup %2210  ;;  %v1610_v21 = vld [vmem:[%s2895_s0 + $0x60] sm:$0xff] }
 0x32c   :  { %v671_v53 = vadd.f32 %v1610_v21, %v2503_v56 }
 0x32d   :  { %v2641_v43 = vadd.f32 %v660_v35, %v659_v38 }
 0x32f   :  { %2212 = vtanh.f32 %v2641_v43 }
 0x339   :  { %v2213_v49 = vpop.eup %2212 }
 0x33a   :  { %v663_v50 = vmul.f32 %v2213_v49, %v2211_v44 }
 0x33c   :  { %1609 = vst [vmem:[%s2898_s3 + $0x10] sm:$0xff] %v663_v50  ;;  %740 = vmatmul.mubr.f32.vlgmr.msra.gmra.mrb[6].mxu0 %v663_v50  ;;  %811 = vmatmul.mubr.f32.vlgmr.msra.gmra.mrb[6].mxu1 %v663_v50 }
 0x33d   :  { %1909 = vmatpush1.bf16.msra.mxu0 %v2368_v8  ;;  %1941 = vmatpush1.bf16.msra.mxu1 %v2381_v25 }
 0x33e   :  { %1911 = vmatprep.subr.bf16.mxu0 %v2370_v9  ;;  %1943 = vmatprep.subr.bf16.mxu1 %v2391_v33 }
 0x33f   :  { %920 = vmatprep.mubr.f32.mxu0 %v2321_v0  ;;  %991 = vmatprep.mubr.f32.mxu1 %v2321_v0 }
 0x341   :  { %1913 = vmatpush1.bf16.msra.mxu0 %v2374_v14  ;;  %1945 = vmatpush1.bf16.msra.mxu1 %v2393_v37 }
 0x342   :  { %1915 = vmatprep.subr.bf16.mxu0 %v2377_v17  ;;  %1947 = vmatprep.subr.bf16.mxu1 %v2399_v45 }
 0x345   :  { %1917 = vmatpush1.bf16.msra.mxu0 %v2384_v26  ;;  %1949 = vmatpush1.bf16.msra.mxu1 %v2405_v48 }
 0x346   :  { %1919 = vmatprep.subr.bf16.mxu0 %v2388_v30  ;;  %1951 = vmatprep.subr.bf16.mxu1 %v2408_v52 }
 0x349   :  { %1921 = vmatpush1.bf16.msra.mxu0 %v2397_v42  ;;  %1953 = vmatpush1.bf16.msra.mxu1 %v2417_v62 }
 0x34a   :  { %1923 = vmatprep.subr.bf16.mxu0 %v2402_v46  ;;  %1955 = vmatprep.subr.bf16.mxu1 %v2420_v1 }
 0x34d   :  { %1925 = vmatpush1.bf16.msra.mxu0 %v2411_v55  ;;  %1957 = vmatpush1.bf16.msra.mxu1 %v2429_v15 }
 0x34e   :  { %1927 = vmatprep.subr.bf16.mxu0 %v2414_v58  ;;  %1959 = vmatprep.subr.bf16.mxu1 %v2432_v18 }
 0x351   :  { %1929 = vmatpush1.bf16.msra.mxu0 %v2423_v7  ;;  %1961 = vmatpush1.bf16.msra.mxu1 %v2441_v31 }
 0x352   :  { %1931 = vmatprep.subr.bf16.mxu0 %v2426_v10  ;;  %1963 = vmatprep.subr.bf16.mxu1 %v2444_v32 }
 0x355   :  { %1933 = vmatpush1.bf16.msra.mxu0 %v2435_v24  ;;  %1965 = vmatpush1.bf16.msra.mxu1 %v2451_v40 }
 0x356   :  { %1935 = vmatprep.subr.bf16.mxu0 %v2438_v27  ;;  %1967 = vmatprep.subr.bf16.mxu1 %v2454_v41 }
 0x359   :  { %1937 = vmatpush1.bf16.msra.mxu0 %v2447_v39  ;;  %1969 = vmatpush1.bf16.msra.mxu1 %v2458_v47 }
 0x35a   :  { %1971 = vmatprep.subr.bf16.mxu0 %v2366_v4  ;;  %2003 = vmatprep.subr.bf16.mxu1 %v2379_v22 }
 0x40f   :  { %v741_v57 = vpop.f32.mrb[6].mxu0  ;;  %v812_v60 = vpop.f32.mrb[6].mxu1 }
 0x410   :  { %v817_v61 = vadd.f32 %v741_v57, %v671_v53  ;;  %v743_v63 = vpop.f32.mrb[7].mxu0  ;;  %v814_v6 = vpop.f32.mrb[7].mxu1  ;;  %v819_v34 = vadd.f32 %v812_v60, %v673_v28 }
 0x411   :  { %v818_v11 = vadd.f32 %v743_v63, %v672_v54  ;;  %v820_v20 = vadd.f32 %v814_v6, %v674_v16 }
 0x412   :  { %v1614_v12 = vmul.f32 -1.442695, %v817_v61 }
 0x413   :  { %v1615_v13 = vmul.f32 -1.442695, %v818_v11  ;;  %v1616_v29 = vmul.f32 -1.442695, %v820_v20  ;;  %v853_v11 = vadd.f32 %v1619_v2, %v2508_v59  ;;  %v1621_v20 = vld [vmem:[%s2895_s0 + $0x98] sm:$0xff] }
 0x414   :  { %2214 = vpow2.f32 %v1614_v12 }
 0x415   :  { %2216 = vpow2.f32 %v1615_v13 }
 0x416   :  { %2218 = vpow2.f32 %v1616_v29 }
 0x417   :  { %2220 = vtanh.f32 %v819_v34 }
 0x41e   :  { %v2215_v5 = vpop.eup %2214 }
 0x41f   :  { %v2217_v35 = vpop.eup %2216  ;;  %v824_v36 = vadd.f32 1.0, %v2215_v5 }
 0x420   :  { %v830_v38 = vadd.f32 1.0, %v2217_v35  ;;  %v2219_v44 = vpop.eup %2218  ;;  %v855_v35 = vadd.f32 %v1621_v20, %v2515_v3  ;;  %v1627_v20 = vld [vmem:[%s2895_s0 + $0xa8] sm:$0xff] }
 0x421   :  { %2222 = vrcp.f32 %v824_v36  ;;  %v2221_v49 = vpop.eup %2220  ;;  %v837_v53 = vadd.f32 1.0, %v2219_v44  ;;  %v1620_v36 = vld [vmem:[%s2895_s0 + $0x90] sm:$0xff] }
 0x422   :  { %2224 = vrcp.f32 %v830_v38  ;;  %v854_v44 = vadd.f32 %v1620_v36, %v2521_v23 }
 0x423   :  { %2226 = vrcp.f32 %v837_v53 }
 0x42b   :  { %v2223_v50 = vpop.eup %2222 }
 0x42c   :  { %v2225_v21 = vpop.eup %2224  ;;  %v841_v51 = vmul.f32 %v2223_v50, %v2221_v49 }
 0x42d   :  { %v840_v54 = vmul.f32 %v2225_v21, %v2641_v43  ;;  %v2227_v60 = vpop.eup %2226  ;;  %v1618_v43 = vld [vmem:[%s2895_s0 + $0x80] sm:$0xff] }
 0x42e   :  { %v852_v6 = vadd.f32 %v1618_v43, %v2503_v56 }
 0x42f   :  { %v2698_v57 = vadd.f32 %v841_v51, %v840_v54 }
 0x431   :  { %2228 = vtanh.f32 %v2698_v57 }
 0x43b   :  { %v2229_v61 = vpop.eup %2228 }
 0x43c   :  { %v844_v63 = vmul.f32 %v2229_v61, %v2227_v60 }
 0x43e   :  { %1617 = vst [vmem:[%s2898_s3 + $0x18] sm:$0xff] %v844_v63  ;;  %921 = vmatmul.mubr.f32.vlgmr.msra.gmra.mrb[8].mxu0 %v844_v63  ;;  %992 = vmatmul.mubr.f32.vlgmr.msra.gmra.mrb[8].mxu1 %v844_v63 }
 0x43f   :  { %1973 = vmatpush1.bf16.msra.mxu0 %v2368_v8  ;;  %2005 = vmatpush1.bf16.msra.mxu1 %v2381_v25 }
 0x440   :  { %1975 = vmatprep.subr.bf16.mxu0 %v2370_v9  ;;  %2007 = vmatprep.subr.bf16.mxu1 %v2391_v33 }
 0x441   :  { %1101 = vmatprep.mubr.f32.mxu0 %v2321_v0  ;;  %1172 = vmatprep.mubr.f32.mxu1 %v2321_v0 }
 0x443   :  { %1977 = vmatpush1.bf16.msra.mxu0 %v2374_v14  ;;  %2009 = vmatpush1.bf16.msra.mxu1 %v2393_v37 }
 0x444   :  { %1979 = vmatprep.subr.bf16.mxu0 %v2377_v17  ;;  %2011 = vmatprep.subr.bf16.mxu1 %v2399_v45 }
 0x447   :  { %1981 = vmatpush1.bf16.msra.mxu0 %v2384_v26  ;;  %2013 = vmatpush1.bf16.msra.mxu1 %v2405_v48 }
 0x448   :  { %1983 = vmatprep.subr.bf16.mxu0 %v2388_v30  ;;  %2015 = vmatprep.subr.bf16.mxu1 %v2408_v52 }
 0x44b   :  { %1985 = vmatpush1.bf16.msra.mxu0 %v2397_v42  ;;  %2017 = vmatpush1.bf16.msra.mxu1 %v2417_v62 }
 0x44c   :  { %1987 = vmatprep.subr.bf16.mxu0 %v2402_v46  ;;  %2019 = vmatprep.subr.bf16.mxu1 %v2420_v1 }
 0x44f   :  { %1989 = vmatpush1.bf16.msra.mxu0 %v2411_v55  ;;  %2021 = vmatpush1.bf16.msra.mxu1 %v2429_v15 }
 0x450   :  { %1991 = vmatprep.subr.bf16.mxu0 %v2414_v58  ;;  %2023 = vmatprep.subr.bf16.mxu1 %v2432_v18 }
 0x453   :  { %1993 = vmatpush1.bf16.msra.mxu0 %v2423_v7  ;;  %2025 = vmatpush1.bf16.msra.mxu1 %v2441_v31 }
 0x454   :  { %1995 = vmatprep.subr.bf16.mxu0 %v2426_v10  ;;  %2027 = vmatprep.subr.bf16.mxu1 %v2444_v32 }
 0x457   :  { %1997 = vmatpush1.bf16.msra.mxu0 %v2435_v24  ;;  %2029 = vmatpush1.bf16.msra.mxu1 %v2451_v40 }
 0x458   :  { %1999 = vmatprep.subr.bf16.mxu0 %v2438_v27  ;;  %2031 = vmatprep.subr.bf16.mxu1 %v2454_v41 }
 0x45b   :  { %2001 = vmatpush1.bf16.msra.mxu0 %v2447_v39  ;;  %2033 = vmatpush1.bf16.msra.mxu1 %v2458_v47 }
 0x45c   :  { %2035 = vmatprep.subr.bf16.mxu0 %v2366_v4  ;;  %2067 = vmatprep.subr.bf16.mxu1 %v2379_v22 }
 0x511   :  { %v922_v12 = vpop.f32.mrb[8].mxu0  ;;  %v993_v13 = vpop.f32.mrb[8].mxu1 }
 0x512   :  { %v998_v16 = vadd.f32 %v922_v12, %v852_v6  ;;  %v924_v19 = vpop.f32.mrb[9].mxu0  ;;  %v995_v28 = vpop.f32.mrb[9].mxu1  ;;  %v1000_v50 = vadd.f32 %v993_v13, %v854_v44 }
 0x513   :  { %v999_v29 = vadd.f32 %v924_v19, %v853_v11  ;;  %v1001_v38 = vadd.f32 %v995_v28, %v855_v35 }
 0x514   :  { %v1622_v34 = vmul.f32 -1.442695, %v998_v16 }
 0x515   :  { %v1623_v5 = vmul.f32 -1.442695, %v999_v29  ;;  %v1624_v49 = vmul.f32 -1.442695, %v1001_v38  ;;  %v1034_v29 = vadd.f32 %v1627_v20, %v2508_v59 }
 0x516   :  { %2230 = vpow2.f32 %v1622_v34 }
 0x517   :  { %2232 = vpow2.f32 %v1623_v5 }
 0x518   :  { %2234 = vpow2.f32 %v1624_v49 }
 0x519   :  { %2236 = vtanh.f32 %v1000_v50 }
 0x520   :  { %v2231_v21 = vpop.eup %2230 }
 0x521   :  { %v2233_v51 = vpop.eup %2232  ;;  %v1005_v53 = vadd.f32 1.0, %v2231_v21  ;;  %v1628_v21 = vld [vmem:[%s2895_s0 + $0xb0] sm:$0xff] }
 0x522   :  { %v1011_v54 = vadd.f32 1.0, %v2233_v51  ;;  %v2235_v60 = vpop.eup %2234 }
 0x523   :  { %2238 = vrcp.f32 %v1005_v53  ;;  %v2237_v61 = vpop.eup %2236  ;;  %v1018_v6 = vadd.f32 1.0, %v2235_v60  ;;  %v1035_v53 = vadd.f32 %v1628_v21, %v2521_v23 }
 0x524   :  { %2240 = vrcp.f32 %v1011_v54 }
 0x525   :  { %2242 = vrcp.f32 %v1018_v6 }
 0x52d   :  { %v2239_v63 = vpop.eup %2238 }
 0x52e   :  { %v2241_v43 = vpop.eup %2240  ;;  %v1022_v2 = vmul.f32 %v2239_v63, %v2237_v61 }
 0x52f   :  { %v1021_v11 = vmul.f32 %v2241_v43, %v2698_v57  ;;  %v2243_v13 = vpop.eup %2242  ;;  %v1626_v57 = vld [vmem:[%s2895_s0 + $0xa0] sm:$0xff] }
 0x530   :  { %v1033_v28 = vadd.f32 %v1626_v57, %v2503_v56 }
 0x531   :  { %v2755_v12 = vadd.f32 %v1022_v2, %v1021_v11 }
 0x533   :  { %2244 = vtanh.f32 %v2755_v12 }
 0x53d   :  { %v2245_v16 = vpop.eup %2244 }
 0x53e   :  { %v1025_v19 = vmul.f32 %v2245_v16, %v2243_v13 }
 0x540   :  { %1625 = vst [vmem:[%s2898_s3 + $0x20] sm:$0xff] %v1025_v19  ;;  %1102 = vmatmul.mubr.f32.vlgmr.msra.gmra.mrb[10].mxu0 %v1025_v19  ;;  %1173 = vmatmul.mubr.f32.vlgmr.msra.gmra.mrb[10].mxu1 %v1025_v19 }
 0x541   :  { %2037 = vmatpush1.bf16.msra.mxu0 %v2368_v8  ;;  %2069 = vmatpush1.bf16.msra.mxu1 %v2381_v25 }
 0x542   :  { %2039 = vmatprep.subr.bf16.mxu0 %v2370_v9  ;;  %2071 = vmatprep.subr.bf16.mxu1 %v2391_v33 }
 0x543   :  { %1282 = vmatprep.mubr.f32.mxu0 %v2321_v0  ;;  %1353 = vmatprep.mubr.f32.mxu1 %v2321_v0 }
 0x545   :  { %2041 = vmatpush1.bf16.msra.mxu0 %v2374_v14  ;;  %2073 = vmatpush1.bf16.msra.mxu1 %v2393_v37 }
 0x546   :  { %2043 = vmatprep.subr.bf16.mxu0 %v2377_v17  ;;  %2075 = vmatprep.subr.bf16.mxu1 %v2399_v45 }
 0x549   :  { %2045 = vmatpush1.bf16.msra.mxu0 %v2384_v26  ;;  %2077 = vmatpush1.bf16.msra.mxu1 %v2405_v48 }
 0x54a   :  { %2047 = vmatprep.subr.bf16.mxu0 %v2388_v30  ;;  %2079 = vmatprep.subr.bf16.mxu1 %v2408_v52 }
 0x54d   :  { %2049 = vmatpush1.bf16.msra.mxu0 %v2397_v42  ;;  %2081 = vmatpush1.bf16.msra.mxu1 %v2417_v62 }
 0x54e   :  { %2051 = vmatprep.subr.bf16.mxu0 %v2402_v46  ;;  %2083 = vmatprep.subr.bf16.mxu1 %v2420_v1 }
 0x551   :  { %2053 = vmatpush1.bf16.msra.mxu0 %v2411_v55  ;;  %2085 = vmatpush1.bf16.msra.mxu1 %v2429_v15 }
 0x552   :  { %2055 = vmatprep.subr.bf16.mxu0 %v2414_v58  ;;  %2087 = vmatprep.subr.bf16.mxu1 %v2432_v18 }
 0x555   :  { %2057 = vmatpush1.bf16.msra.mxu0 %v2423_v7  ;;  %2089 = vmatpush1.bf16.msra.mxu1 %v2441_v31 }
 0x556   :  { %2059 = vmatprep.subr.bf16.mxu0 %v2426_v10  ;;  %2091 = vmatprep.subr.bf16.mxu1 %v2444_v32 }
 0x559   :  { %2061 = vmatpush1.bf16.msra.mxu0 %v2435_v24  ;;  %2093 = vmatpush1.bf16.msra.mxu1 %v2451_v40 }
 0x55a   :  { %2063 = vmatprep.subr.bf16.mxu0 %v2438_v27  ;;  %2095 = vmatprep.subr.bf16.mxu1 %v2454_v41 }
 0x55d   :  { %2065 = vmatpush1.bf16.msra.mxu0 %v2447_v39  ;;  %2097 = vmatpush1.bf16.msra.mxu1 %v2458_v47 }
 0x55e   :  { %2099 = vmatprep.subr.bf16.mxu0 %v2366_v4  ;;  %2131 = vmatprep.subr.bf16.mxu1 %v2379_v22  ;;  %v1629_v4 = vld [vmem:[%s2895_s0 + $0xb8] sm:$0xff] }
 0x55f   :  { %v1036_v50 = vadd.f32 %v1629_v4, %v2515_v3  ;;  %v1642_v4 = vld [vmem:[%s2895_s0 + $0xe0] sm:$0xff] }
 0x613   :  { %v1103_v34 = vpop.f32.mrb[10].mxu0  ;;  %v1174_v5 = vpop.f32.mrb[10].mxu1 }
 0x614   :  { %v1179_v35 = vadd.f32 %v1103_v34, %v1033_v28  ;;  %v1105_v36 = vpop.f32.mrb[11].mxu0  ;;  %v1176_v22 = vpop.f32.mrb[11].mxu1  ;;  %v1181_v60 = vadd.f32 %v1174_v5, %v1035_v53  ;;  %v1645_v53 = vld [vmem:[%s2895_s0 + $0xf8] sm:$0xff] }
 0x615   :  { %v1180_v38 = vadd.f32 %v1105_v36, %v1034_v29  ;;  %v1182_v51 = vadd.f32 %v1176_v22, %v1036_v50  ;;  %v1643_v22 = vld [vmem:[%s2895_s0 + $0xe8] sm:$0xff] }
 0x616   :  { %v1630_v44 = vmul.f32 -1.442695, %v1179_v35 }
 0x617   :  { %v1631_v49 = vmul.f32 -1.442695, %v1180_v38  ;;  %v1632_v54 = vmul.f32 -1.442695, %v1182_v51  ;;  %v1395_v38 = vadd.f32 %v1642_v4, %v2503_v56 }
 0x618   :  { %2246 = vpow2.f32 %v1630_v44  ;;  %v1396_v44 = vadd.f32 %v1643_v22, %v2508_v59 }
 0x619   :  { %2248 = vpow2.f32 %v1631_v49 }
 0x61a   :  { %2250 = vpow2.f32 %v1632_v54 }
 0x61b   :  { %2252 = vtanh.f32 %v1181_v60 }
 0x622   :  { %v2247_v61 = vpop.eup %2246 }
 0x623   :  { %v2249_v63 = vpop.eup %2248  ;;  %v1186_v43 = vadd.f32 1.0, %v2247_v61 }
 0x624   :  { %v1192_v2 = vadd.f32 1.0, %v2249_v63  ;;  %v2251_v6 = vpop.eup %2250 }
 0x625   :  { %2254 = vrcp.f32 %v1186_v43  ;;  %v2253_v11 = vpop.eup %2252  ;;  %v1199_v57 = vadd.f32 1.0, %v2251_v6  ;;  %v1398_v43 = vadd.f32 %v1645_v53, %v2515_v3 }
 0x626   :  { %2256 = vrcp.f32 %v1192_v2 }
 0x627   :  { %2258 = vrcp.f32 %v1199_v57 }
 0x62f   :  { %v2255_v13 = vpop.eup %2254 }
 0x630   :  { %v2257_v16 = vpop.eup %2256  ;;  %v1203_v19 = vmul.f32 %v2255_v13, %v2253_v11 }
 0x631   :  { %v1202_v20 = vmul.f32 %v2257_v16, %v2755_v12  ;;  %v2259_v29 = vpop.eup %2258 }
 0x633   :  { %v2812_v28 = vadd.f32 %v1203_v19, %v1202_v20 }
 0x635   :  { %2260 = vtanh.f32 %v2812_v28 }
 0x63f   :  { %v2261_v34 = vpop.eup %2260 }
 0x640   :  { %v1206_v5 = vmul.f32 %v2261_v34, %v2259_v29 }
 0x642   :  { %1633 = vst [vmem:[%s2898_s3 + $0x28] sm:$0xff] %v1206_v5  ;;  %1283 = vmatmul.mubr.f32.vlgmr.msra.gmra.mrb[12].mxu0 %v1206_v5  ;;  %1354 = vmatmul.mubr.f32.vlgmr.msra.gmra.mrb[12].mxu1 %v1206_v5 }
 0x643   :  { %2101 = vmatpush1.bf16.msra.mxu0 %v2368_v8  ;;  %2133 = vmatpush1.bf16.msra.mxu1 %v2381_v25  ;;  %v1635_v8 = vld [vmem:[%s2895_s0 + $0xc8] sm:$0xff] }
 0x644   :  { %2103 = vmatprep.subr.bf16.mxu0 %v2370_v9  ;;  %2135 = vmatprep.subr.bf16.mxu1 %v2391_v33  ;;  %v1637_v33 = vld [vmem:[%s2895_s0 + $0xd8] sm:$0xff] }
 0x645   :  { %1463 = vmatprep.mubr.f32.mxu0 %v2321_v0  ;;  %1534 = vmatprep.mubr.f32.mxu1 %v2321_v0  ;;  %v1634_v0 = vld [vmem:[%s2895_s0 + $0xc0] sm:$0xff] }
 0x646   :  { %v1214_v9 = vadd.f32 %v1634_v0, %v2503_v56  ;;  %v1644_v56 = vld [vmem:[%s2895_s0 + $0xf0] sm:$0xff] }
 0x647   :  { %2105 = vmatpush1.bf16.msra.mxu0 %v2374_v14  ;;  %2137 = vmatpush1.bf16.msra.mxu1 %v2393_v37  ;;  %v1215_v14 = vadd.f32 %v1635_v8, %v2508_v59  ;;  %v1397_v2 = vadd.f32 %v1644_v56, %v2521_v23 }
 0x648   :  { %2107 = vmatprep.subr.bf16.mxu0 %v2377_v17  ;;  %2139 = vmatprep.subr.bf16.mxu1 %v2399_v45 }
 0x64b   :  { %2109 = vmatpush1.bf16.msra.mxu0 %v2384_v26  ;;  %2141 = vmatpush1.bf16.msra.mxu1 %v2405_v48  ;;  %v1217_v48 = vadd.f32 %v1637_v33, %v2515_v3 }
 0x64c   :  { %2111 = vmatprep.subr.bf16.mxu0 %v2388_v30  ;;  %2143 = vmatprep.subr.bf16.mxu1 %v2408_v52  ;;  %v1636_v52 = vld [vmem:[%s2895_s0 + $0xd0] sm:$0xff] }
 0x64f   :  { %2113 = vmatpush1.bf16.msra.mxu0 %v2397_v42  ;;  %2145 = vmatpush1.bf16.msra.mxu1 %v2417_v62 }
 0x650   :  { %2115 = vmatprep.subr.bf16.mxu0 %v2402_v46  ;;  %2147 = vmatprep.subr.bf16.mxu1 %v2420_v1 }
 0x653   :  { %2117 = vmatpush1.bf16.msra.mxu0 %v2411_v55  ;;  %2149 = vmatpush1.bf16.msra.mxu1 %v2429_v15 }
 0x654   :  { %2119 = vmatprep.subr.bf16.mxu0 %v2414_v58  ;;  %2151 = vmatprep.subr.bf16.mxu1 %v2432_v18  ;;  %v1216_v58 = vadd.f32 %v1636_v52, %v2521_v23 }
 0x657   :  { %2121 = vmatpush1.bf16.msra.mxu0 %v2423_v7  ;;  %2153 = vmatpush1.bf16.msra.mxu1 %v2441_v31 }
 0x658   :  { %2123 = vmatprep.subr.bf16.mxu0 %v2426_v10  ;;  %2155 = vmatprep.subr.bf16.mxu1 %v2444_v32 }
 0x65b   :  { %2125 = vmatpush1.bf16.msra.mxu0 %v2435_v24  ;;  %2157 = vmatpush1.bf16.msra.mxu1 %v2451_v40 }
 0x65c   :  { %2127 = vmatprep.subr.bf16.mxu0 %v2438_v27  ;;  %2159 = vmatprep.subr.bf16.mxu1 %v2454_v41 }
 0x65f   :  { %2129 = vmatpush1.bf16.msra.mxu0 %v2447_v39  ;;  %2161 = vmatpush1.bf16.msra.mxu1 %v2458_v47 }
 0x715   :  { %v1284_v17 = vpop.f32.mrb[12].mxu0  ;;  %v1355_v25 = vpop.f32.mrb[12].mxu1 }
 0x716   :  { %v1360_v26 = vadd.f32 %v1284_v17, %v1214_v9  ;;  %v1286_v30 = vpop.f32.mrb[13].mxu0  ;;  %v1357_v37 = vpop.f32.mrb[13].mxu1  ;;  %v1362_v1 = vadd.f32 %v1355_v25, %v1216_v58 }
 0x717   :  { %v1361_v42 = vadd.f32 %v1286_v30, %v1215_v14  ;;  %v1363_v55 = vadd.f32 %v1357_v37, %v1217_v48 }
 0x718   :  { %v1638_v45 = vmul.f32 -1.442695, %v1360_v26 }
 0x719   :  { %v1639_v46 = vmul.f32 -1.442695, %v1361_v42  ;;  %v1640_v62 = vmul.f32 -1.442695, %v1363_v55 }
 0x71a   :  { %2262 = vpow2.f32 %v1638_v45 }
 0x71b   :  { %2264 = vpow2.f32 %v1639_v46 }
 0x71c   :  { %2266 = vpow2.f32 %v1640_v62 }
 0x71d   :  { %2268 = vtanh.f32 %v1362_v1 }
 0x724   :  { %v2263_v7 = vpop.eup %2262 }
 0x725   :  { %v2265_v10 = vpop.eup %2264  ;;  %v1367_v15 = vadd.f32 1.0, %v2263_v7 }
 0x726   :  { %v1373_v18 = vadd.f32 1.0, %v2265_v10  ;;  %v2267_v24 = vpop.eup %2266 }
 0x727   :  { %2270 = vrcp.f32 %v1367_v15  ;;  %v2269_v27 = vpop.eup %2268  ;;  %v1380_v40 = vadd.f32 1.0, %v2267_v24 }
 0x728   :  { %2272 = vrcp.f32 %v1373_v18 }
 0x729   :  { %2274 = vrcp.f32 %v1380_v40 }
 0x731   :  { %v2271_v31 = vpop.eup %2270 }
 0x732   :  { %v2273_v32 = vpop.eup %2272  ;;  %v1384_v39 = vmul.f32 %v2271_v31, %v2269_v27 }
 0x733   :  { %v1383_v41 = vmul.f32 %v2273_v32, %v2812_v28  ;;  %v2275_v12 = vpop.eup %2274 }
 0x735   :  { %v1385_v47 = vadd.f32 %v1384_v39, %v1383_v41 }
 0x737   :  { %2276 = vtanh.f32 %v1385_v47 }
 0x741   :  { %v2277_v35 = vpop.eup %2276 }
 0x742   :  { %v1387_v36 = vmul.f32 %v2277_v35, %v2275_v12 }
 0x744   :  { %1641 = vst [vmem:[%s2898_s3 + $0x30] sm:$0xff] %v1387_v36  ;;  %1464 = vmatmul.mubr.f32.vlgmr.msra.gmra.mrb[14].mxu0 %v1387_v36  ;;  %1535 = vmatmul.mubr.f32.vlgmr.msra.gmra.mrb[14].mxu1 %v1387_v36 }
 0x817   :  { %v1465_v49 = vpop.f32.mrb[14].mxu0  ;;  %v1536_v50 = vpop.f32.mrb[14].mxu1 }
 0x818   :  { %v1541_v21 = vadd.f32 %v1465_v49, %v1395_v38  ;;  %v1467_v51 = vpop.f32.mrb[15].mxu0  ;;  %v1538_v54 = vpop.f32.mrb[15].mxu1  ;;  %v1543_v11 = vadd.f32 %v1536_v50, %v1397_v2 }
 0x819   :  { %v1542_v60 = vadd.f32 %v1467_v51, %v1396_v44  ;;  %v1544_v59 = vadd.f32 %v1538_v54, %v1398_v43 }
 0x81a   :  { %v1646_v61 = vmul.f32 -1.442695, %v1541_v21 }
 0x81b   :  { %v1647_v63 = vmul.f32 -1.442695, %v1542_v60  ;;  %v1648_v6 = vmul.f32 -1.442695, %v1544_v59 }
 0x81c   :  { %2278 = vpow2.f32 %v1646_v61 }
 0x81d   :  { %2280 = vpow2.f32 %v1647_v63 }
 0x81e   :  { %2282 = vpow2.f32 %v1648_v6 }
 0x81f   :  { %2284 = vtanh.f32 %v1543_v11 }
 0x826   :  { %v2279_v13 = vpop.eup %2278 }
 0x827   :  { %v2281_v16 = vpop.eup %2280  ;;  %v1548_v19 = vadd.f32 1.0, %v2279_v13 }
 0x828   :  { %v1554_v57 = vadd.f32 1.0, %v2281_v16  ;;  %v2283_v3 = vpop.eup %2282 }
 0x829   :  { %2286 = vrcp.f32 %v1548_v19  ;;  %v2285_v20 = vpop.eup %2284  ;;  %v1561_v5 = vadd.f32 1.0, %v2283_v3 }
 0x82a   :  { %2288 = vrcp.f32 %v1554_v57 }
 0x82b   :  { %2290 = vrcp.f32 %v1561_v5 }
 0x833   :  { %v2287_v28 = vpop.eup %2286 }
 0x834   :  { %v2289_v29 = vpop.eup %2288  ;;  %v1565_v34 = vmul.f32 %v2287_v28, %v2285_v20 }
 0x835   :  { %v1564_v0 = vmul.f32 %v2289_v29, %v1385_v47  ;;  %v2291_v23 = vpop.eup %2290 }
 0x837   :  { %v1566_v8 = vadd.f32 %v1565_v34, %v1564_v0 }
 0x839   :  { %2292 = vtanh.f32 %v1566_v8  ;;  %1577 = vst [vmem:[%s2900_s5] sm:$0xff] %v1566_v8 }
 0x843   :  { %v2293_v9 = vpop.eup %2292 }
 0x844   :  { %v1568_v14 = vmul.f32 %v2293_v9, %v2291_v23 }
 0x846   :  { %1649 = vst [vmem:[%s2898_s3 + $0x38] sm:$0xff] %v1568_v14  ;;  %1576 = vst [vmem:[%s2899_s4] sm:$0xff] %v1568_v14 }
 0x847   :  { %1590 = vsyncpa [#allocation5], 1 }

// kernel: multilayer_lstm_forward.3
= control target key start
LH: loop header
LB: loop body
LE: loop exit
PB: predicated region body
PF: predicated region fallthrough
CT: control target
= control target key end

     0   :  { %v2276_v3 = vmov 0.0   ;;  %s3030_s2 = inlined_call_operand.vmem [shape: f32[128,512], index: 2, kind: input, shape index: {}]   ;;  %s3031_s1 = inlined_call_operand.vmem [shape: f32[1,512], index: 1, kind: input, shape index: {}]   ;;  %s3032_s0 = inlined_call_operand.vmem [shape: f32[8,8,512], index: 0, kind: input, shape index: {}]   ;;  %s3033_s3 = inlined_call_operand.vmem [shape: f32[8,8,128], index: 3, kind: output, shape index: {0}]   ;;  %s3034_s5 = inlined_call_operand.vmem [shape: f32[8,128], index: 5, kind: output, shape index: {2}]   ;;  %s3035_s4 = inlined_call_operand.vmem [shape: f32[8,128], index: 4, kind: output, shape index: {1}]  }
   0x1   :  { %v24_v0 = vld [vmem:[%s3030_s2 + $0x8] sm:$0xff]  ;;  %v23_v2 = vld [vmem:[%s3030_s2] sm:$0xff]  ;;  %183 = vmatprep.mubr.f32.mxu0 %v2276_v3  ;;  %254 = vmatprep.mubr.f32.mxu1 %v2276_v3  ;;  %v26_v19 = vld [vmem:[%s3030_s2 + $0x18] sm:$0xff] }
   0x2   :  { %v28_v1 = vld [vmem:[%s3030_s2 + $0x28] sm:$0xff]  ;;  %v27_v5 = vld [vmem:[%s3030_s2 + $0x20] sm:$0xff]  ;;  %v30_v20 = vld [vmem:[%s3030_s2 + $0x38] sm:$0xff] }
   0x3   :  { %v2318_v4 = vpack.c.bf16 %v28_v1, %v24_v0  ;;  %v32_v6 = vld [vmem:[%s3030_s2 + $0x48] sm:$0xff]  ;;  %v2329_v8 = vpack.c.bf16 %v27_v5, %v23_v2  ;;  %v31_v10 = vld [vmem:[%s3030_s2 + $0x40] sm:$0xff]  ;;  %v2370_v22 = vpack.c.bf16 %v30_v20, %v26_v19  ;;  %v25_v23 = vld [vmem:[%s3030_s2 + $0x10] sm:$0xff] }
   0x4   :  { %v36_v7 = vld [vmem:[%s3030_s2 + $0x68] sm:$0xff]  ;;  %v35_v11 = vld [vmem:[%s3030_s2 + $0x60] sm:$0xff]  ;;  %v29_v24 = vld [vmem:[%s3030_s2 + $0x30] sm:$0xff] }
   0x5   :  { %v2331_v9 = vpack.c.bf16 %v36_v7, %v32_v6  ;;  %v40_v12 = vld [vmem:[%s3030_s2 + $0x88] sm:$0xff]  ;;  %1636 = vmatprep.subr.bf16.mxu0 %v2318_v4  ;;  %v2347_v14 = vpack.c.bf16 %v35_v11, %v31_v10  ;;  %v39_v15 = vld [vmem:[%s3030_s2 + $0x80] sm:$0xff]  ;;  %v2378_v25 = vpack.c.bf16 %v29_v24, %v25_v23  ;;  %1668 = vmatprep.subr.bf16.mxu1 %v2370_v22  ;;  %v34_v27 = vld [vmem:[%s3030_s2 + $0x58] sm:$0xff] }
   0x6   :  { %v44_v13 = vld [vmem:[%s3030_s2 + $0xa8] sm:$0xff]  ;;  %1638 = vmatpush1.bf16.msra.mxu0 %v2329_v8  ;;  %v43_v16 = vld [vmem:[%s3030_s2 + $0xa0] sm:$0xff]  ;;  %v38_v28 = vld [vmem:[%s3030_s2 + $0x78] sm:$0xff] }
   0x7   :  { %1640 = vmatprep.subr.bf16.mxu0 %v2331_v9  ;;  %v2356_v17 = vpack.c.bf16 %v44_v13, %v40_v12  ;;  %v48_v18 = vld [vmem:[%s3030_s2 + $0xc8] sm:$0xff]  ;;  %v2381_v26 = vpack.c.bf16 %v43_v16, %v39_v15  ;;  %v33_v29 = vld [vmem:[%s3030_s2 + $0x50] sm:$0xff]  ;;  %v47_v31 = vld [vmem:[%s3030_s2 + $0xc0] sm:$0xff]  ;;  %1670 = vmatpush1.bf16.msra.mxu1 %v2378_v25  ;;  %v2403_v33 = vpack.c.bf16 %v38_v28, %v34_v27 }
   0x8   :  { %v52_v21 = vld [vmem:[%s3030_s2 + $0xe8] sm:$0xff]  ;;  %v51_v32 = vld [vmem:[%s3030_s2 + $0xe0] sm:$0xff]  ;;  %v37_v34 = vld [vmem:[%s3030_s2 + $0x70] sm:$0xff] }
   0x9   :  { %v2394_v30 = vpack.c.bf16 %v52_v21, %v48_v18  ;;  %v56_v35 = vld [vmem:[%s3030_s2 + $0x108] sm:$0xff]  ;;  %v2414_v37 = vpack.c.bf16 %v37_v34, %v33_v29  ;;  %v42_v38 = vld [vmem:[%s3030_s2 + $0x98] sm:$0xff]  ;;  %1672 = vmatprep.subr.bf16.mxu1 %v2403_v33  ;;  %v41_v40 = vld [vmem:[%s3030_s2 + $0x90] sm:$0xff]  ;;  %v2430_v42 = vpack.c.bf16 %v51_v32, %v47_v31 }
   0xa   :  { %1642 = vmatpush1.bf16.msra.mxu0 %v2347_v14  ;;  %v60_v36 = vld [vmem:[%s3030_s2 + $0x128] sm:$0xff]  ;;  %v46_v39 = vld [vmem:[%s3030_s2 + $0xb8] sm:$0xff]  ;;  %v45_v41 = vld [vmem:[%s3030_s2 + $0xb0] sm:$0xff] }
   0xb   :  { %1644 = vmatprep.subr.bf16.mxu0 %v2356_v17  ;;  %v55_v43 = vld [vmem:[%s3030_s2 + $0x100] sm:$0xff]  ;;  %v2438_v45 = vpack.c.bf16 %v46_v39, %v42_v38  ;;  %v2441_v46 = vpack.c.bf16 %v60_v36, %v56_v35  ;;  %1674 = vmatpush1.bf16.msra.mxu1 %v2414_v37  ;;  %v64_v47 = vld [vmem:[%s3030_s2 + $0x148] sm:$0xff]  ;;  %v2447_v48 = vpack.c.bf16 %v45_v41, %v41_v40  ;;  %v50_v49 = vld [vmem:[%s3030_s2 + $0xd8] sm:$0xff] }
   0xc   :  { %v59_v44 = vld [vmem:[%s3030_s2 + $0x120] sm:$0xff]  ;;  %v54_v50 = vld [vmem:[%s3030_s2 + $0xf8] sm:$0xff]  ;;  %v68_v51 = vld [vmem:[%s3030_s2 + $0x168] sm:$0xff] }
   0xd   :  { %1676 = vmatprep.subr.bf16.mxu1 %v2438_v45  ;;  %v2459_v52 = vpack.c.bf16 %v54_v50, %v50_v49  ;;  %v49_v53 = vld [vmem:[%s3030_s2 + $0xd0] sm:$0xff]  ;;  %v2468_v55 = vpack.c.bf16 %v59_v44, %v55_v43  ;;  %v58_v56 = vld [vmem:[%s3030_s2 + $0x118] sm:$0xff]  ;;  %v2477_v58 = vpack.c.bf16 %v68_v51, %v64_v47  ;;  %v63_v59 = vld [vmem:[%s3030_s2 + $0x140] sm:$0xff]  ;;  %v95_v49 = vlaneseq }
   0xe   :  { %1646 = vmatpush1.bf16.msra.mxu0 %v2381_v26  ;;  %v53_v54 = vld [vmem:[%s3030_s2 + $0xf0] sm:$0xff]  ;;  %v62_v57 = vld [vmem:[%s3030_s2 + $0x138] sm:$0xff]  ;;  %v67_v60 = vld [vmem:[%s3030_s2 + $0x160] sm:$0xff] }
   0xf   :  { %1648 = vmatprep.subr.bf16.mxu0 %v2394_v30  ;;  %1678 = vmatpush1.bf16.msra.mxu1 %v2447_v48  ;;  %v72_v61 = vld [vmem:[%s3030_s2 + $0x188] sm:$0xff]  ;;  %v2489_v62 = vpack.c.bf16 %v53_v54, %v49_v53  ;;  %v2495_v0 = vpack.c.bf16 %v62_v57, %v58_v56  ;;  %v57_v1 = vld [vmem:[%s3030_s2 + $0x110] sm:$0xff]  ;;  %v66_v5 = vld [vmem:[%s3030_s2 + $0x158] sm:$0xff]  ;;  %v2510_v7 = vpack.c.bf16 %v67_v60, %v63_v59  ;;  %v96_v50 = vshrl.u32 %v95_v49, 7 }
  0x10   :  { %v76_v63 = vld [vmem:[%s3030_s2 + $0x1a8] sm:$0xff]  ;;  %1680 = vmatprep.subr.bf16.mxu1 %v2459_v52  ;;  %v61_v2 = vld [vmem:[%s3030_s2 + $0x130] sm:$0xff]  ;;  %v70_v6 = vld [vmem:[%s3030_s2 + $0x178] sm:$0xff] }
  0x11   :  { %v2513_v10 = vpack.c.bf16 %v76_v63, %v72_v61  ;;  %v71_v11 = vld [vmem:[%s3030_s2 + $0x180] sm:$0xff]  ;;  %v80_v13 = vld [vmem:[%s3030_s2 + $0x1c8] sm:$0xff]  ;;  %v2525_v15 = vpack.c.bf16 %v61_v2, %v57_v1  ;;  %v2531_v18 = vpack.c.bf16 %v70_v6, %v66_v5  ;;  %v65_v19 = vld [vmem:[%s3030_s2 + $0x150] sm:$0xff]  ;;  %v97_v51 = vsub.s32 0, %v96_v50 }
  0x12   :  { %1650 = vmatpush1.bf16.msra.mxu0 %v2430_v42  ;;  %v75_v12 = vld [vmem:[%s3030_s2 + $0x1a0] sm:$0xff]  ;;  %v84_v16 = vld [vmem:[%s3030_s2 + $0x1e8] sm:$0xff]  ;;  %v69_v20 = vld [vmem:[%s3030_s2 + $0x170] sm:$0xff]  ;;  %v101_v54 = vsub.s32 1, %v96_v50  ;;  %v109_v61 = vsub.s32 3, %v96_v50  ;;  %v105_v6 = vsub.s32 2, %v96_v50 }
  0x13   :  { %1652 = vmatprep.subr.bf16.mxu0 %v2441_v46  ;;  %1682 = vmatpush1.bf16.msra.mxu1 %v2489_v62  ;;  %v74_v21 = vld [vmem:[%s3030_s2 + $0x198] sm:$0xff]  ;;  %v2546_v24 = vpack.c.bf16 %v75_v12, %v71_v11  ;;  %v2549_v27 = vpack.c.bf16 %v84_v16, %v80_v13  ;;  %v79_v28 = vld [vmem:[%s3030_s2 + $0x1c0] sm:$0xff]  ;;  %v2558_v31 = vpack.c.bf16 %v69_v20, %v65_v19  ;;  %v73_v34 = vld [vmem:[%s3030_s2 + $0x190] sm:$0xff] }
  0x14   :  { %1684 = vmatprep.subr.bf16.mxu1 %v2495_v0  ;;  %v78_v23 = vld [vmem:[%s3030_s2 + $0x1b8] sm:$0xff]  ;;  %v83_v29 = vld [vmem:[%s3030_s2 + $0x1e0] sm:$0xff]  ;;  %v77_v35 = vld [vmem:[%s3030_s2 + $0x1b0] sm:$0xff] }
  0x15   :  { %v2561_v32 = vpack.c.bf16 %v78_v23, %v74_v21  ;;  %v82_v36 = vld [vmem:[%s3030_s2 + $0x1d8] sm:$0xff]  ;;  %v2576_v39 = vpack.c.bf16 %v83_v29, %v79_v28  ;;  %v2580_v40 = vpack.c.bf16 %v77_v35, %v73_v34  ;;  %v81_v43 = vld [vmem:[%s3030_s2 + $0x1d0] sm:$0xff]  ;;  %v87_v53 = vld [vmem:[%s3031_s1] sm:$0xf] }
  0x16   :  { %1654 = vmatpush1.bf16.msra.mxu0 %v2468_v55  ;;  %v86_v38 = vld [vmem:[%s3030_s2 + $0x1f8] sm:$0xff]  ;;  %v85_v44 = vld [vmem:[%s3030_s2 + $0x1f0] sm:$0xff]  ;;  %v2638_v56 = vrot.slane %v87_v53, %v97_v51  ;;  %v90_v57 = vld [vmem:[%s3032_s0] sm:$0xff]  ;;  %v2643_v59 = vrot.slane %v87_v53, %v101_v54  ;;  %v2650_v2 = vrot.slane %v87_v53, %v109_v61  ;;  %v2656_v23 = vrot.slane %v87_v53, %v105_v6 }
  0x17   :  { %1656 = vmatprep.subr.bf16.mxu0 %v2477_v58  ;;  %1686 = vmatpush1.bf16.msra.mxu1 %v2525_v15  ;;  %v2583_v41 = vpack.c.bf16 %v86_v38, %v82_v36  ;;  %v2593_v47 = vpack.c.bf16 %v85_v44, %v81_v43  ;;  %v91_v60 = vld [vmem:[%s3032_s0 + $0x8] sm:$0xff]  ;;  %v93_v11 = vld [vmem:[%s3032_s0 + $0x18] sm:$0xff]  ;;  %v92_v28 = vld [vmem:[%s3032_s0 + $0x10] sm:$0xff] }
  0x18   :  { %1688 = vmatprep.subr.bf16.mxu1 %v2531_v18  ;;  %v115_v63 = vadd.f32 %v2638_v56, %v90_v57  ;;  %v116_v1 = vadd.f32 %v2643_v59, %v91_v60  ;;  %v118_v20 = vadd.f32 %v2650_v2, %v93_v11  ;;  %v117_v36 = vadd.f32 %v2656_v23, %v92_v28 }
  0x1a   :  { %1658 = vmatpush1.bf16.msra.mxu0 %v2510_v7 }
  0x1b   :  { %1660 = vmatprep.subr.bf16.mxu0 %v2513_v10  ;;  %1690 = vmatpush1.bf16.msra.mxu1 %v2558_v31 }
  0x1c   :  { %1692 = vmatprep.subr.bf16.mxu1 %v2561_v32 }
  0x1e   :  { %1662 = vmatpush1.bf16.msra.mxu0 %v2546_v24 }
  0x1f   :  { %1664 = vmatprep.subr.bf16.mxu0 %v2549_v27  ;;  %1694 = vmatpush1.bf16.msra.mxu1 %v2580_v40 }
  0x20   :  { %1696 = vmatprep.subr.bf16.mxu1 %v2583_v41 }
  0x22   :  { %1666 = vmatpush1.bf16.msra.mxu0 %v2576_v39 }
  0x23   :  { %1700 = vmatprep.subr.bf16.mxu0 %v2318_v4  ;;  %1698 = vmatpush1.bf16.msra.mxu1 %v2593_v47 }
  0x24   :  { %1732 = vmatprep.subr.bf16.mxu1 %v2370_v22 }
  0x25   :  { %184 = vmatmul.mubr.f32.vlgmr.msra.gmra.mrb[0].mxu0 %v2276_v3 }
  0x26   :  { %1702 = vmatpush1.bf16.msra.mxu0 %v2329_v8  ;;  %363 = vmatprep.mubr.f32.mxu0 %v2276_v3 }
  0x27   :  { %1704 = vmatprep.subr.bf16.mxu0 %v2331_v9  ;;  %255 = vmatmul.mubr.f32.vlgmr.msra.gmra.mrb[0].mxu1 %v2276_v3 }
  0x28   :  { %1734 = vmatpush1.bf16.msra.mxu1 %v2378_v25  ;;  %434 = vmatprep.mubr.f32.mxu1 %v2276_v3 }
  0x29   :  { %1736 = vmatprep.subr.bf16.mxu1 %v2403_v33 }
  0x2a   :  { %1706 = vmatpush1.bf16.msra.mxu0 %v2347_v14 }
  0x2b   :  { %1708 = vmatprep.subr.bf16.mxu0 %v2356_v17 }
  0x2c   :  { %1738 = vmatpush1.bf16.msra.mxu1 %v2414_v37 }
  0x2d   :  { %1740 = vmatprep.subr.bf16.mxu1 %v2438_v45 }
  0x2e   :  { %1710 = vmatpush1.bf16.msra.mxu0 %v2381_v26 }
  0x2f   :  { %1712 = vmatprep.subr.bf16.mxu0 %v2394_v30 }
  0x30   :  { %1742 = vmatpush1.bf16.msra.mxu1 %v2447_v48 }
  0x31   :  { %1744 = vmatprep.subr.bf16.mxu1 %v2459_v52 }
  0x32   :  { %1714 = vmatpush1.bf16.msra.mxu0 %v2430_v42 }
  0x33   :  { %1716 = vmatprep.subr.bf16.mxu0 %v2441_v46 }
  0x34   :  { %1746 = vmatpush1.bf16.msra.mxu1 %v2489_v62 }
  0x35   :  { %1748 = vmatprep.subr.bf16.mxu1 %v2495_v0 }
  0x36   :  { %1718 = vmatpush1.bf16.msra.mxu0 %v2468_v55 }
  0x37   :  { %1720 = vmatprep.subr.bf16.mxu0 %v2477_v58 }
  0x38   :  { %1750 = vmatpush1.bf16.msra.mxu1 %v2525_v15 }
  0x39   :  { %1752 = vmatprep.subr.bf16.mxu1 %v2531_v18 }
  0x3a   :  { %1722 = vmatpush1.bf16.msra.mxu0 %v2510_v7 }
  0x3b   :  { %1724 = vmatprep.subr.bf16.mxu0 %v2513_v10 }
  0x3c   :  { %1754 = vmatpush1.bf16.msra.mxu1 %v2558_v31 }
  0x3d   :  { %1756 = vmatprep.subr.bf16.mxu1 %v2561_v32 }
  0x3e   :  { %1726 = vmatpush1.bf16.msra.mxu0 %v2546_v24 }
  0x3f   :  { %1728 = vmatprep.subr.bf16.mxu0 %v2549_v27 }
  0x40   :  { %1758 = vmatpush1.bf16.msra.mxu1 %v2580_v40 }
  0x41   :  { %1760 = vmatprep.subr.bf16.mxu1 %v2583_v41 }
  0x42   :  { %1730 = vmatpush1.bf16.msra.mxu0 %v2576_v39 }
  0x43   :  { %1764 = vmatprep.subr.bf16.mxu0 %v2318_v4 }
  0x44   :  { %1762 = vmatpush1.bf16.msra.mxu1 %v2593_v47 }
  0x45   :  { %1796 = vmatprep.subr.bf16.mxu1 %v2370_v22 }
  0xf8   :  { %v185_v5 = vpop.f32.mrb[0].mxu0 }
  0xf9   :  { %v261_v12 = vadd.f32 %v185_v5, %v115_v63  ;;  %v187_v13 = vpop.f32.mrb[1].mxu0 }
  0xfa   :  { %v262_v16 = vadd.f32 %v187_v13, %v116_v1  ;;  %v256_v29 = vpop.f32.mrb[0].mxu1  ;;  %v1579_v13 = vld [vmem:[%s3032_s0 + $0x20] sm:$0xff] }
  0xfb   :  { %v1576_v19 = vmul.f32 -1.442695, %v261_v12  ;;  %v258_v34 = vpop.f32.mrb[1].mxu1  ;;  %v263_v43 = vadd.f32 %v256_v29, %v117_v36 }
  0xfc   :  { %v1577_v21 = vmul.f32 -1.442695, %v262_v16  ;;  %v264_v35 = vadd.f32 %v258_v34, %v118_v20  ;;  %v1580_v16 = vld [vmem:[%s3032_s0 + $0x28] sm:$0xff] }
  0xfd   :  { %2148 = vpow2.f32 %v1576_v19  ;;  %v295_v19 = vadd.f32 %v1579_v13, %v2638_v56  ;;  %v296_v20 = vadd.f32 %v1580_v16, %v2643_v59 }
  0xfe   :  { %2150 = vpow2.f32 %v1577_v21  ;;  %v1578_v38 = vmul.f32 -1.442695, %v264_v35  ;;  %v1582_v35 = vld [vmem:[%s3032_s0 + $0x38] sm:$0xff] }
 0x100   :  { %2152 = vpow2.f32 %v1578_v38 }
 0x101   :  { %2154 = vtanh.f32 %v263_v43 }
 0x107   :  { %v2149_v44 = vpop.eup %2148 }
 0x108   :  { %v2151_v49 = vpop.eup %2150  ;;  %v268_v50 = vadd.f32 1.0, %v2149_v44 }
 0x109   :  { %v274_v51 = vadd.f32 1.0, %v2151_v49  ;;  %v298_v49 = vadd.f32 %v1582_v35, %v2650_v2  ;;  %v1588_v35 = vld [vmem:[%s3032_s0 + $0x48] sm:$0xff] }
 0x10a   :  { %2156 = vrcp.f32 %v268_v50  ;;  %v2153_v53 = vpop.eup %2152  ;;  %v1581_v50 = vld [vmem:[%s3032_s0 + $0x30] sm:$0xff] }
 0x10b   :  { %2158 = vrcp.f32 %v274_v51  ;;  %v2155_v54 = vpop.eup %2154  ;;  %v281_v60 = vadd.f32 1.0, %v2153_v53  ;;  %v297_v53 = vadd.f32 %v1581_v50, %v2656_v23 }
 0x10d   :  { %2160 = vrcp.f32 %v281_v60 }
 0x114   :  { %v2157_v57 = vpop.eup %2156 }
 0x115   :  { %v2159_v61 = vpop.eup %2158  ;;  %v285_v63 = vmul.f32 %v2157_v57, %v2155_v54 }
 0x116   :  { %v284_v1 = vmul.f32 0.0, %v2159_v61 }
 0x117   :  { %v2161_v6 = vpop.eup %2160 }
 0x118   :  { %v2662_v5 = vadd.f32 %v285_v63, %v284_v1 }
 0x11a   :  { %2162 = vtanh.f32 %v2662_v5 }
 0x124   :  { %v2163_v11 = vpop.eup %2162 }
 0x125   :  { %v288_v12 = vmul.f32 %v2163_v11, %v2161_v6 }
 0x127   :  { %289 = vst [vmem:[%s3033_s3] sm:$0xff] %v288_v12  ;;  %364 = vmatmul.mubr.f32.vlgmr.msra.gmra.mrb[2].mxu0 %v288_v12  ;;  %435 = vmatmul.mubr.f32.vlgmr.msra.gmra.mrb[2].mxu1 %v288_v12 }
 0x128   :  { %1766 = vmatpush1.bf16.msra.mxu0 %v2329_v8  ;;  %1798 = vmatpush1.bf16.msra.mxu1 %v2378_v25 }
 0x129   :  { %1768 = vmatprep.subr.bf16.mxu0 %v2331_v9  ;;  %1800 = vmatprep.subr.bf16.mxu1 %v2403_v33 }
 0x12a   :  { %544 = vmatprep.mubr.f32.mxu0 %v2276_v3  ;;  %615 = vmatprep.mubr.f32.mxu1 %v2276_v3 }
 0x12c   :  { %1770 = vmatpush1.bf16.msra.mxu0 %v2347_v14  ;;  %1802 = vmatpush1.bf16.msra.mxu1 %v2414_v37 }
 0x12d   :  { %1772 = vmatprep.subr.bf16.mxu0 %v2356_v17  ;;  %1804 = vmatprep.subr.bf16.mxu1 %v2438_v45 }
 0x130   :  { %1774 = vmatpush1.bf16.msra.mxu0 %v2381_v26  ;;  %1806 = vmatpush1.bf16.msra.mxu1 %v2447_v48 }
 0x131   :  { %1776 = vmatprep.subr.bf16.mxu0 %v2394_v30  ;;  %1808 = vmatprep.subr.bf16.mxu1 %v2459_v52 }
 0x134   :  { %1778 = vmatpush1.bf16.msra.mxu0 %v2430_v42  ;;  %1810 = vmatpush1.bf16.msra.mxu1 %v2489_v62 }
 0x135   :  { %1780 = vmatprep.subr.bf16.mxu0 %v2441_v46  ;;  %1812 = vmatprep.subr.bf16.mxu1 %v2495_v0 }
 0x138   :  { %1782 = vmatpush1.bf16.msra.mxu0 %v2468_v55  ;;  %1814 = vmatpush1.bf16.msra.mxu1 %v2525_v15 }
 0x139   :  { %1784 = vmatprep.subr.bf16.mxu0 %v2477_v58  ;;  %1816 = vmatprep.subr.bf16.mxu1 %v2531_v18 }
 0x13c   :  { %1786 = vmatpush1.bf16.msra.mxu0 %v2510_v7  ;;  %1818 = vmatpush1.bf16.msra.mxu1 %v2558_v31 }
 0x13d   :  { %1788 = vmatprep.subr.bf16.mxu0 %v2513_v10  ;;  %1820 = vmatprep.subr.bf16.mxu1 %v2561_v32 }
 0x140   :  { %1790 = vmatpush1.bf16.msra.mxu0 %v2546_v24  ;;  %1822 = vmatpush1.bf16.msra.mxu1 %v2580_v40 }
 0x141   :  { %1792 = vmatprep.subr.bf16.mxu0 %v2549_v27  ;;  %1824 = vmatprep.subr.bf16.mxu1 %v2583_v41 }
 0x144   :  { %1794 = vmatpush1.bf16.msra.mxu0 %v2576_v39  ;;  %1826 = vmatpush1.bf16.msra.mxu1 %v2593_v47 }
 0x145   :  { %1828 = vmatprep.subr.bf16.mxu0 %v2318_v4  ;;  %1860 = vmatprep.subr.bf16.mxu1 %v2370_v22 }
 0x1fa   :  { %v365_v21 = vpop.f32.mrb[2].mxu0  ;;  %v436_v28 = vpop.f32.mrb[2].mxu1 }
 0x1fb   :  { %v441_v29 = vadd.f32 %v365_v21, %v295_v19  ;;  %v367_v34 = vpop.f32.mrb[3].mxu0  ;;  %v438_v36 = vpop.f32.mrb[3].mxu1  ;;  %v443_v57 = vadd.f32 %v436_v28, %v297_v53 }
 0x1fc   :  { %v442_v38 = vadd.f32 %v367_v34, %v296_v20  ;;  %v444_v51 = vadd.f32 %v438_v36, %v298_v49 }
 0x1fd   :  { %v1583_v43 = vmul.f32 -1.442695, %v441_v29 }
 0x1fe   :  { %v1584_v44 = vmul.f32 -1.442695, %v442_v38  ;;  %v1585_v54 = vmul.f32 -1.442695, %v444_v51  ;;  %v477_v38 = vadd.f32 %v1588_v35, %v2643_v59  ;;  %v1590_v51 = vld [vmem:[%s3032_s0 + $0x58] sm:$0xff] }
 0x1ff   :  { %2164 = vpow2.f32 %v1583_v43 }
 0x200   :  { %2166 = vpow2.f32 %v1584_v44 }
 0x201   :  { %2168 = vpow2.f32 %v1585_v54 }
 0x202   :  { %2170 = vtanh.f32 %v443_v57 }
 0x209   :  { %v2165_v60 = vpop.eup %2164 }
 0x20a   :  { %v2167_v61 = vpop.eup %2166  ;;  %v448_v63 = vadd.f32 1.0, %v2165_v60 }
 0x20b   :  { %v454_v1 = vadd.f32 1.0, %v2167_v61  ;;  %v2169_v6 = vpop.eup %2168  ;;  %v479_v61 = vadd.f32 %v1590_v51, %v2650_v2  ;;  %v1596_v51 = vld [vmem:[%s3032_s0 + $0x68] sm:$0xff] }
 0x20c   :  { %2172 = vrcp.f32 %v448_v63  ;;  %v2171_v11 = vpop.eup %2170  ;;  %v461_v19 = vadd.f32 1.0, %v2169_v6  ;;  %v1589_v63 = vld [vmem:[%s3032_s0 + $0x50] sm:$0xff] }
 0x20d   :  { %2174 = vrcp.f32 %v454_v1  ;;  %v478_v6 = vadd.f32 %v1589_v63, %v2656_v23 }
 0x20e   :  { %2176 = vrcp.f32 %v461_v19 }
 0x216   :  { %v2173_v12 = vpop.eup %2172 }
 0x217   :  { %v2175_v13 = vpop.eup %2174  ;;  %v465_v16 = vmul.f32 %v2173_v12, %v2171_v11 }
 0x218   :  { %v464_v20 = vmul.f32 %v2175_v13, %v2662_v5  ;;  %v2177_v28 = vpop.eup %2176  ;;  %v1587_v5 = vld [vmem:[%s3032_s0 + $0x40] sm:$0xff] }
 0x219   :  { %v476_v36 = vadd.f32 %v1587_v5, %v2638_v56 }
 0x21a   :  { %v2719_v21 = vadd.f32 %v465_v16, %v464_v20 }
 0x21c   :  { %2178 = vtanh.f32 %v2719_v21 }
 0x226   :  { %v2179_v29 = vpop.eup %2178 }
 0x227   :  { %v468_v34 = vmul.f32 %v2179_v29, %v2177_v28 }
 0x229   :  { %1586 = vst [vmem:[%s3033_s3 + $0x8] sm:$0xff] %v468_v34  ;;  %545 = vmatmul.mubr.f32.vlgmr.msra.gmra.mrb[4].mxu0 %v468_v34  ;;  %616 = vmatmul.mubr.f32.vlgmr.msra.gmra.mrb[4].mxu1 %v468_v34 }
 0x22a   :  { %1830 = vmatpush1.bf16.msra.mxu0 %v2329_v8  ;;  %1862 = vmatpush1.bf16.msra.mxu1 %v2378_v25 }
 0x22b   :  { %1832 = vmatprep.subr.bf16.mxu0 %v2331_v9  ;;  %1864 = vmatprep.subr.bf16.mxu1 %v2403_v33 }
 0x22c   :  { %725 = vmatprep.mubr.f32.mxu0 %v2276_v3  ;;  %796 = vmatprep.mubr.f32.mxu1 %v2276_v3 }
 0x22e   :  { %1834 = vmatpush1.bf16.msra.mxu0 %v2347_v14  ;;  %1866 = vmatpush1.bf16.msra.mxu1 %v2414_v37 }
 0x22f   :  { %1836 = vmatprep.subr.bf16.mxu0 %v2356_v17  ;;  %1868 = vmatprep.subr.bf16.mxu1 %v2438_v45 }
 0x232   :  { %1838 = vmatpush1.bf16.msra.mxu0 %v2381_v26  ;;  %1870 = vmatpush1.bf16.msra.mxu1 %v2447_v48 }
 0x233   :  { %1840 = vmatprep.subr.bf16.mxu0 %v2394_v30  ;;  %1872 = vmatprep.subr.bf16.mxu1 %v2459_v52 }
 0x236   :  { %1842 = vmatpush1.bf16.msra.mxu0 %v2430_v42  ;;  %1874 = vmatpush1.bf16.msra.mxu1 %v2489_v62 }
 0x237   :  { %1844 = vmatprep.subr.bf16.mxu0 %v2441_v46  ;;  %1876 = vmatprep.subr.bf16.mxu1 %v2495_v0 }
 0x23a   :  { %1846 = vmatpush1.bf16.msra.mxu0 %v2468_v55  ;;  %1878 = vmatpush1.bf16.msra.mxu1 %v2525_v15 }
 0x23b   :  { %1848 = vmatprep.subr.bf16.mxu0 %v2477_v58  ;;  %1880 = vmatprep.subr.bf16.mxu1 %v2531_v18 }
 0x23e   :  { %1850 = vmatpush1.bf16.msra.mxu0 %v2510_v7  ;;  %1882 = vmatpush1.bf16.msra.mxu1 %v2558_v31 }
 0x23f   :  { %1852 = vmatprep.subr.bf16.mxu0 %v2513_v10  ;;  %1884 = vmatprep.subr.bf16.mxu1 %v2561_v32 }
 0x242   :  { %1854 = vmatpush1.bf16.msra.mxu0 %v2546_v24  ;;  %1886 = vmatpush1.bf16.msra.mxu1 %v2580_v40 }
 0x243   :  { %1856 = vmatprep.subr.bf16.mxu0 %v2549_v27  ;;  %1888 = vmatprep.subr.bf16.mxu1 %v2583_v41 }
 0x246   :  { %1858 = vmatpush1.bf16.msra.mxu0 %v2576_v39  ;;  %1890 = vmatpush1.bf16.msra.mxu1 %v2593_v47 }
 0x247   :  { %1892 = vmatprep.subr.bf16.mxu0 %v2318_v4  ;;  %1924 = vmatprep.subr.bf16.mxu1 %v2370_v22 }
 0x2fc   :  { %v546_v43 = vpop.f32.mrb[4].mxu0  ;;  %v617_v44 = vpop.f32.mrb[4].mxu1 }
 0x2fd   :  { %v622_v49 = vadd.f32 %v546_v43, %v476_v36  ;;  %v548_v50 = vpop.f32.mrb[5].mxu0  ;;  %v619_v53 = vpop.f32.mrb[5].mxu1  ;;  %v624_v12 = vadd.f32 %v617_v44, %v478_v6 }
 0x2fe   :  { %v623_v54 = vadd.f32 %v548_v50, %v477_v38  ;;  %v625_v1 = vadd.f32 %v619_v53, %v479_v61 }
 0x2ff   :  { %v1591_v57 = vmul.f32 -1.442695, %v622_v49 }
 0x300   :  { %v1592_v60 = vmul.f32 -1.442695, %v623_v54  ;;  %v1593_v11 = vmul.f32 -1.442695, %v625_v1  ;;  %v658_v54 = vadd.f32 %v1596_v51, %v2643_v59  ;;  %v1598_v1 = vld [vmem:[%s3032_s0 + $0x78] sm:$0xff] }
 0x301   :  { %2180 = vpow2.f32 %v1591_v57 }
 0x302   :  { %2182 = vpow2.f32 %v1592_v60 }
 0x303   :  { %2184 = vpow2.f32 %v1593_v11 }
 0x304   :  { %2186 = vtanh.f32 %v624_v12 }
 0x30b   :  { %v2181_v13 = vpop.eup %2180 }
 0x30c   :  { %v2183_v16 = vpop.eup %2182  ;;  %v629_v19 = vadd.f32 1.0, %v2181_v13 }
 0x30d   :  { %v635_v20 = vadd.f32 1.0, %v2183_v16  ;;  %v2185_v28 = vpop.eup %2184  ;;  %v660_v16 = vadd.f32 %v1598_v1, %v2650_v2  ;;  %v1604_v1 = vld [vmem:[%s3032_s0 + $0x88] sm:$0xff] }
 0x30e   :  { %2188 = vrcp.f32 %v629_v19  ;;  %v2187_v29 = vpop.eup %2186  ;;  %v642_v36 = vadd.f32 1.0, %v2185_v28  ;;  %v1597_v19 = vld [vmem:[%s3032_s0 + $0x70] sm:$0xff] }
 0x30f   :  { %2190 = vrcp.f32 %v635_v20  ;;  %v659_v28 = vadd.f32 %v1597_v19, %v2656_v23 }
 0x310   :  { %2192 = vrcp.f32 %v642_v36 }
 0x318   :  { %v2189_v34 = vpop.eup %2188 }
 0x319   :  { %v2191_v5 = vpop.eup %2190  ;;  %v646_v35 = vmul.f32 %v2189_v34, %v2187_v29 }
 0x31a   :  { %v645_v38 = vmul.f32 %v2191_v5, %v2719_v21  ;;  %v2193_v44 = vpop.eup %2192  ;;  %v1595_v21 = vld [vmem:[%s3032_s0 + $0x60] sm:$0xff] }
 0x31b   :  { %v657_v53 = vadd.f32 %v1595_v21, %v2638_v56 }
 0x31c   :  { %v2776_v43 = vadd.f32 %v646_v35, %v645_v38 }
 0x31e   :  { %2194 = vtanh.f32 %v2776_v43 }
 0x328   :  { %v2195_v49 = vpop.eup %2194 }
 0x329   :  { %v649_v50 = vmul.f32 %v2195_v49, %v2193_v44 }
 0x32b   :  { %1594 = vst [vmem:[%s3033_s3 + $0x10] sm:$0xff] %v649_v50  ;;  %726 = vmatmul.mubr.f32.vlgmr.msra.gmra.mrb[6].mxu0 %v649_v50  ;;  %797 = vmatmul.mubr.f32.vlgmr.msra.gmra.mrb[6].mxu1 %v649_v50 }
 0x32c   :  { %1894 = vmatpush1.bf16.msra.mxu0 %v2329_v8  ;;  %1926 = vmatpush1.bf16.msra.mxu1 %v2378_v25 }
 0x32d   :  { %1896 = vmatprep.subr.bf16.mxu0 %v2331_v9  ;;  %1928 = vmatprep.subr.bf16.mxu1 %v2403_v33 }
 0x32e   :  { %906 = vmatprep.mubr.f32.mxu0 %v2276_v3  ;;  %977 = vmatprep.mubr.f32.mxu1 %v2276_v3 }
 0x330   :  { %1898 = vmatpush1.bf16.msra.mxu0 %v2347_v14  ;;  %1930 = vmatpush1.bf16.msra.mxu1 %v2414_v37 }
 0x331   :  { %1900 = vmatprep.subr.bf16.mxu0 %v2356_v17  ;;  %1932 = vmatprep.subr.bf16.mxu1 %v2438_v45 }
 0x334   :  { %1902 = vmatpush1.bf16.msra.mxu0 %v2381_v26  ;;  %1934 = vmatpush1.bf16.msra.mxu1 %v2447_v48 }
 0x335   :  { %1904 = vmatprep.subr.bf16.mxu0 %v2394_v30  ;;  %1936 = vmatprep.subr.bf16.mxu1 %v2459_v52 }
 0x338   :  { %1906 = vmatpush1.bf16.msra.mxu0 %v2430_v42  ;;  %1938 = vmatpush1.bf16.msra.mxu1 %v2489_v62 }
 0x339   :  { %1908 = vmatprep.subr.bf16.mxu0 %v2441_v46  ;;  %1940 = vmatprep.subr.bf16.mxu1 %v2495_v0 }
 0x33c   :  { %1910 = vmatpush1.bf16.msra.mxu0 %v2468_v55  ;;  %1942 = vmatpush1.bf16.msra.mxu1 %v2525_v15 }
 0x33d   :  { %1912 = vmatprep.subr.bf16.mxu0 %v2477_v58  ;;  %1944 = vmatprep.subr.bf16.mxu1 %v2531_v18 }
 0x340   :  { %1914 = vmatpush1.bf16.msra.mxu0 %v2510_v7  ;;  %1946 = vmatpush1.bf16.msra.mxu1 %v2558_v31 }
 0x341   :  { %1916 = vmatprep.subr.bf16.mxu0 %v2513_v10  ;;  %1948 = vmatprep.subr.bf16.mxu1 %v2561_v32 }
 0x344   :  { %1918 = vmatpush1.bf16.msra.mxu0 %v2546_v24  ;;  %1950 = vmatpush1.bf16.msra.mxu1 %v2580_v40 }
 0x345   :  { %1920 = vmatprep.subr.bf16.mxu0 %v2549_v27  ;;  %1952 = vmatprep.subr.bf16.mxu1 %v2583_v41 }
 0x348   :  { %1922 = vmatpush1.bf16.msra.mxu0 %v2576_v39  ;;  %1954 = vmatpush1.bf16.msra.mxu1 %v2593_v47 }
 0x349   :  { %1956 = vmatprep.subr.bf16.mxu0 %v2318_v4  ;;  %1988 = vmatprep.subr.bf16.mxu1 %v2370_v22 }
 0x3fe   :  { %v727_v57 = vpop.f32.mrb[6].mxu0  ;;  %v798_v60 = vpop.f32.mrb[6].mxu1 }
 0x3ff   :  { %v803_v61 = vadd.f32 %v727_v57, %v657_v53  ;;  %v729_v63 = vpop.f32.mrb[7].mxu0  ;;  %v800_v6 = vpop.f32.mrb[7].mxu1  ;;  %v805_v34 = vadd.f32 %v798_v60, %v659_v28 }
 0x400   :  { %v804_v11 = vadd.f32 %v729_v63, %v658_v54  ;;  %v806_v20 = vadd.f32 %v800_v6, %v660_v16 }
 0x401   :  { %v1599_v12 = vmul.f32 -1.442695, %v803_v61 }
 0x402   :  { %v1600_v13 = vmul.f32 -1.442695, %v804_v11  ;;  %v1601_v29 = vmul.f32 -1.442695, %v806_v20  ;;  %v839_v11 = vadd.f32 %v1604_v1, %v2643_v59  ;;  %v1606_v20 = vld [vmem:[%s3032_s0 + $0x98] sm:$0xff] }
 0x403   :  { %2196 = vpow2.f32 %v1599_v12 }
 0x404   :  { %2198 = vpow2.f32 %v1600_v13 }
 0x405   :  { %2200 = vpow2.f32 %v1601_v29 }
 0x406   :  { %2202 = vtanh.f32 %v805_v34 }
 0x40d   :  { %v2197_v5 = vpop.eup %2196 }
 0x40e   :  { %v2199_v35 = vpop.eup %2198  ;;  %v810_v36 = vadd.f32 1.0, %v2197_v5 }
 0x40f   :  { %v816_v38 = vadd.f32 1.0, %v2199_v35  ;;  %v2201_v44 = vpop.eup %2200  ;;  %v841_v35 = vadd.f32 %v1606_v20, %v2650_v2  ;;  %v1612_v20 = vld [vmem:[%s3032_s0 + $0xa8] sm:$0xff] }
 0x410   :  { %2204 = vrcp.f32 %v810_v36  ;;  %v2203_v49 = vpop.eup %2202  ;;  %v823_v53 = vadd.f32 1.0, %v2201_v44  ;;  %v1605_v36 = vld [vmem:[%s3032_s0 + $0x90] sm:$0xff] }
 0x411   :  { %2206 = vrcp.f32 %v816_v38  ;;  %v840_v44 = vadd.f32 %v1605_v36, %v2656_v23 }
 0x412   :  { %2208 = vrcp.f32 %v823_v53 }
 0x41a   :  { %v2205_v50 = vpop.eup %2204 }
 0x41b   :  { %v2207_v21 = vpop.eup %2206  ;;  %v827_v51 = vmul.f32 %v2205_v50, %v2203_v49 }
 0x41c   :  { %v826_v54 = vmul.f32 %v2207_v21, %v2776_v43  ;;  %v2209_v60 = vpop.eup %2208  ;;  %v1603_v43 = vld [vmem:[%s3032_s0 + $0x80] sm:$0xff] }
 0x41d   :  { %v838_v6 = vadd.f32 %v1603_v43, %v2638_v56 }
 0x41e   :  { %v2833_v57 = vadd.f32 %v827_v51, %v826_v54 }
 0x420   :  { %2210 = vtanh.f32 %v2833_v57 }
 0x42a   :  { %v2211_v61 = vpop.eup %2210 }
 0x42b   :  { %v830_v63 = vmul.f32 %v2211_v61, %v2209_v60 }
 0x42d   :  { %1602 = vst [vmem:[%s3033_s3 + $0x18] sm:$0xff] %v830_v63  ;;  %907 = vmatmul.mubr.f32.vlgmr.msra.gmra.mrb[8].mxu0 %v830_v63  ;;  %978 = vmatmul.mubr.f32.vlgmr.msra.gmra.mrb[8].mxu1 %v830_v63 }
 0x42e   :  { %1958 = vmatpush1.bf16.msra.mxu0 %v2329_v8  ;;  %1990 = vmatpush1.bf16.msra.mxu1 %v2378_v25 }
 0x42f   :  { %1960 = vmatprep.subr.bf16.mxu0 %v2331_v9  ;;  %1992 = vmatprep.subr.bf16.mxu1 %v2403_v33 }
 0x430   :  { %1087 = vmatprep.mubr.f32.mxu0 %v2276_v3  ;;  %1158 = vmatprep.mubr.f32.mxu1 %v2276_v3 }
 0x432   :  { %1962 = vmatpush1.bf16.msra.mxu0 %v2347_v14  ;;  %1994 = vmatpush1.bf16.msra.mxu1 %v2414_v37 }
 0x433   :  { %1964 = vmatprep.subr.bf16.mxu0 %v2356_v17  ;;  %1996 = vmatprep.subr.bf16.mxu1 %v2438_v45 }
 0x436   :  { %1966 = vmatpush1.bf16.msra.mxu0 %v2381_v26  ;;  %1998 = vmatpush1.bf16.msra.mxu1 %v2447_v48 }
 0x437   :  { %1968 = vmatprep.subr.bf16.mxu0 %v2394_v30  ;;  %2000 = vmatprep.subr.bf16.mxu1 %v2459_v52 }
 0x43a   :  { %1970 = vmatpush1.bf16.msra.mxu0 %v2430_v42  ;;  %2002 = vmatpush1.bf16.msra.mxu1 %v2489_v62 }
 0x43b   :  { %1972 = vmatprep.subr.bf16.mxu0 %v2441_v46  ;;  %2004 = vmatprep.subr.bf16.mxu1 %v2495_v0 }
 0x43e   :  { %1974 = vmatpush1.bf16.msra.mxu0 %v2468_v55  ;;  %2006 = vmatpush1.bf16.msra.mxu1 %v2525_v15 }
 0x43f   :  { %1976 = vmatprep.subr.bf16.mxu0 %v2477_v58  ;;  %2008 = vmatprep.subr.bf16.mxu1 %v2531_v18 }
 0x442   :  { %1978 = vmatpush1.bf16.msra.mxu0 %v2510_v7  ;;  %2010 = vmatpush1.bf16.msra.mxu1 %v2558_v31 }
 0x443   :  { %1980 = vmatprep.subr.bf16.mxu0 %v2513_v10  ;;  %2012 = vmatprep.subr.bf16.mxu1 %v2561_v32 }
 0x446   :  { %1982 = vmatpush1.bf16.msra.mxu0 %v2546_v24  ;;  %2014 = vmatpush1.bf16.msra.mxu1 %v2580_v40 }
 0x447   :  { %1984 = vmatprep.subr.bf16.mxu0 %v2549_v27  ;;  %2016 = vmatprep.subr.bf16.mxu1 %v2583_v41 }
 0x44a   :  { %1986 = vmatpush1.bf16.msra.mxu0 %v2576_v39  ;;  %2018 = vmatpush1.bf16.msra.mxu1 %v2593_v47 }
 0x44b   :  { %2020 = vmatprep.subr.bf16.mxu0 %v2318_v4  ;;  %2052 = vmatprep.subr.bf16.mxu1 %v2370_v22 }
 0x500   :  { %v908_v12 = vpop.f32.mrb[8].mxu0  ;;  %v979_v13 = vpop.f32.mrb[8].mxu1 }
 0x501   :  { %v984_v16 = vadd.f32 %v908_v12, %v838_v6  ;;  %v910_v19 = vpop.f32.mrb[9].mxu0  ;;  %v981_v28 = vpop.f32.mrb[9].mxu1  ;;  %v986_v50 = vadd.f32 %v979_v13, %v840_v44 }
 0x502   :  { %v985_v29 = vadd.f32 %v910_v19, %v839_v11  ;;  %v987_v38 = vadd.f32 %v981_v28, %v841_v35 }
 0x503   :  { %v1607_v34 = vmul.f32 -1.442695, %v984_v16 }
 0x504   :  { %v1608_v5 = vmul.f32 -1.442695, %v985_v29  ;;  %v1609_v49 = vmul.f32 -1.442695, %v987_v38  ;;  %v1020_v29 = vadd.f32 %v1612_v20, %v2643_v59 }
 0x505   :  { %2212 = vpow2.f32 %v1607_v34 }
 0x506   :  { %2214 = vpow2.f32 %v1608_v5 }
 0x507   :  { %2216 = vpow2.f32 %v1609_v49 }
 0x508   :  { %2218 = vtanh.f32 %v986_v50 }
 0x50f   :  { %v2213_v21 = vpop.eup %2212 }
 0x510   :  { %v2215_v51 = vpop.eup %2214  ;;  %v991_v53 = vadd.f32 1.0, %v2213_v21  ;;  %v1613_v21 = vld [vmem:[%s3032_s0 + $0xb0] sm:$0xff] }
 0x511   :  { %v997_v54 = vadd.f32 1.0, %v2215_v51  ;;  %v2217_v60 = vpop.eup %2216 }
 0x512   :  { %2220 = vrcp.f32 %v991_v53  ;;  %v2219_v61 = vpop.eup %2218  ;;  %v1004_v6 = vadd.f32 1.0, %v2217_v60  ;;  %v1021_v53 = vadd.f32 %v1613_v21, %v2656_v23 }
 0x513   :  { %2222 = vrcp.f32 %v997_v54 }
 0x514   :  { %2224 = vrcp.f32 %v1004_v6 }
 0x51c   :  { %v2221_v63 = vpop.eup %2220 }
 0x51d   :  { %v2223_v43 = vpop.eup %2222  ;;  %v1008_v1 = vmul.f32 %v2221_v63, %v2219_v61 }
 0x51e   :  { %v1007_v11 = vmul.f32 %v2223_v43, %v2833_v57  ;;  %v2225_v13 = vpop.eup %2224  ;;  %v1611_v57 = vld [vmem:[%s3032_s0 + $0xa0] sm:$0xff] }
 0x51f   :  { %v1019_v28 = vadd.f32 %v1611_v57, %v2638_v56 }
 0x520   :  { %v2890_v12 = vadd.f32 %v1008_v1, %v1007_v11 }
 0x522   :  { %2226 = vtanh.f32 %v2890_v12 }
 0x52c   :  { %v2227_v16 = vpop.eup %2226 }
 0x52d   :  { %v1011_v19 = vmul.f32 %v2227_v16, %v2225_v13 }
 0x52f   :  { %1610 = vst [vmem:[%s3033_s3 + $0x20] sm:$0xff] %v1011_v19  ;;  %1088 = vmatmul.mubr.f32.vlgmr.msra.gmra.mrb[10].mxu0 %v1011_v19  ;;  %1159 = vmatmul.mubr.f32.vlgmr.msra.gmra.mrb[10].mxu1 %v1011_v19 }
 0x530   :  { %2022 = vmatpush1.bf16.msra.mxu0 %v2329_v8  ;;  %2054 = vmatpush1.bf16.msra.mxu1 %v2378_v25 }
 0x531   :  { %2024 = vmatprep.subr.bf16.mxu0 %v2331_v9  ;;  %2056 = vmatprep.subr.bf16.mxu1 %v2403_v33 }
 0x532   :  { %1268 = vmatprep.mubr.f32.mxu0 %v2276_v3  ;;  %1339 = vmatprep.mubr.f32.mxu1 %v2276_v3 }
 0x534   :  { %2026 = vmatpush1.bf16.msra.mxu0 %v2347_v14  ;;  %2058 = vmatpush1.bf16.msra.mxu1 %v2414_v37 }
 0x535   :  { %2028 = vmatprep.subr.bf16.mxu0 %v2356_v17  ;;  %2060 = vmatprep.subr.bf16.mxu1 %v2438_v45 }
 0x538   :  { %2030 = vmatpush1.bf16.msra.mxu0 %v2381_v26  ;;  %2062 = vmatpush1.bf16.msra.mxu1 %v2447_v48 }
 0x539   :  { %2032 = vmatprep.subr.bf16.mxu0 %v2394_v30  ;;  %2064 = vmatprep.subr.bf16.mxu1 %v2459_v52 }
 0x53c   :  { %2034 = vmatpush1.bf16.msra.mxu0 %v2430_v42  ;;  %2066 = vmatpush1.bf16.msra.mxu1 %v2489_v62 }
 0x53d   :  { %2036 = vmatprep.subr.bf16.mxu0 %v2441_v46  ;;  %2068 = vmatprep.subr.bf16.mxu1 %v2495_v0 }
 0x540   :  { %2038 = vmatpush1.bf16.msra.mxu0 %v2468_v55  ;;  %2070 = vmatpush1.bf16.msra.mxu1 %v2525_v15 }
 0x541   :  { %2040 = vmatprep.subr.bf16.mxu0 %v2477_v58  ;;  %2072 = vmatprep.subr.bf16.mxu1 %v2531_v18 }
 0x544   :  { %2042 = vmatpush1.bf16.msra.mxu0 %v2510_v7  ;;  %2074 = vmatpush1.bf16.msra.mxu1 %v2558_v31 }
 0x545   :  { %2044 = vmatprep.subr.bf16.mxu0 %v2513_v10  ;;  %2076 = vmatprep.subr.bf16.mxu1 %v2561_v32 }
 0x548   :  { %2046 = vmatpush1.bf16.msra.mxu0 %v2546_v24  ;;  %2078 = vmatpush1.bf16.msra.mxu1 %v2580_v40 }
 0x549   :  { %2048 = vmatprep.subr.bf16.mxu0 %v2549_v27  ;;  %2080 = vmatprep.subr.bf16.mxu1 %v2583_v41 }
 0x54c   :  { %2050 = vmatpush1.bf16.msra.mxu0 %v2576_v39  ;;  %2082 = vmatpush1.bf16.msra.mxu1 %v2593_v47 }
 0x54d   :  { %2084 = vmatprep.subr.bf16.mxu0 %v2318_v4  ;;  %2116 = vmatprep.subr.bf16.mxu1 %v2370_v22  ;;  %v1614_v4 = vld [vmem:[%s3032_s0 + $0xb8] sm:$0xff] }
 0x54e   :  { %v1022_v50 = vadd.f32 %v1614_v4, %v2650_v2  ;;  %v1627_v4 = vld [vmem:[%s3032_s0 + $0xe0] sm:$0xff] }
 0x602   :  { %v1089_v34 = vpop.f32.mrb[10].mxu0  ;;  %v1160_v5 = vpop.f32.mrb[10].mxu1 }
 0x603   :  { %v1165_v35 = vadd.f32 %v1089_v34, %v1019_v28  ;;  %v1091_v36 = vpop.f32.mrb[11].mxu0  ;;  %v1162_v22 = vpop.f32.mrb[11].mxu1  ;;  %v1167_v60 = vadd.f32 %v1160_v5, %v1021_v53  ;;  %v1630_v53 = vld [vmem:[%s3032_s0 + $0xf8] sm:$0xff] }
 0x604   :  { %v1166_v38 = vadd.f32 %v1091_v36, %v1020_v29  ;;  %v1168_v51 = vadd.f32 %v1162_v22, %v1022_v50  ;;  %v1628_v22 = vld [vmem:[%s3032_s0 + $0xe8] sm:$0xff] }
 0x605   :  { %v1615_v44 = vmul.f32 -1.442695, %v1165_v35 }
 0x606   :  { %v1616_v49 = vmul.f32 -1.442695, %v1166_v38  ;;  %v1617_v54 = vmul.f32 -1.442695, %v1168_v51  ;;  %v1381_v38 = vadd.f32 %v1627_v4, %v2638_v56 }
 0x607   :  { %2228 = vpow2.f32 %v1615_v44  ;;  %v1382_v44 = vadd.f32 %v1628_v22, %v2643_v59 }
 0x608   :  { %2230 = vpow2.f32 %v1616_v49 }
 0x609   :  { %2232 = vpow2.f32 %v1617_v54 }
 0x60a   :  { %2234 = vtanh.f32 %v1167_v60 }
 0x611   :  { %v2229_v61 = vpop.eup %2228 }
 0x612   :  { %v2231_v63 = vpop.eup %2230  ;;  %v1172_v43 = vadd.f32 1.0, %v2229_v61 }
 0x613   :  { %v1178_v1 = vadd.f32 1.0, %v2231_v63  ;;  %v2233_v6 = vpop.eup %2232 }
 0x614   :  { %2236 = vrcp.f32 %v1172_v43  ;;  %v2235_v11 = vpop.eup %2234  ;;  %v1185_v57 = vadd.f32 1.0, %v2233_v6  ;;  %v1384_v43 = vadd.f32 %v1630_v53, %v2650_v2 }
 0x615   :  { %2238 = vrcp.f32 %v1178_v1 }
 0x616   :  { %2240 = vrcp.f32 %v1185_v57 }
 0x61e   :  { %v2237_v13 = vpop.eup %2236 }
 0x61f   :  { %v2239_v16 = vpop.eup %2238  ;;  %v1189_v19 = vmul.f32 %v2237_v13, %v2235_v11 }
 0x620   :  { %v1188_v20 = vmul.f32 %v2239_v16, %v2890_v12  ;;  %v2241_v29 = vpop.eup %2240 }
 0x622   :  { %v2947_v28 = vadd.f32 %v1189_v19, %v1188_v20 }
 0x624   :  { %2242 = vtanh.f32 %v2947_v28 }
 0x62e   :  { %v2243_v34 = vpop.eup %2242 }
 0x62f   :  { %v1192_v5 = vmul.f32 %v2243_v34, %v2241_v29 }
 0x631   :  { %1618 = vst [vmem:[%s3033_s3 + $0x28] sm:$0xff] %v1192_v5  ;;  %1269 = vmatmul.mubr.f32.vlgmr.msra.gmra.mrb[12].mxu0 %v1192_v5  ;;  %1340 = vmatmul.mubr.f32.vlgmr.msra.gmra.mrb[12].mxu1 %v1192_v5 }
 0x632   :  { %2086 = vmatpush1.bf16.msra.mxu0 %v2329_v8  ;;  %2118 = vmatpush1.bf16.msra.mxu1 %v2378_v25  ;;  %v1620_v8 = vld [vmem:[%s3032_s0 + $0xc8] sm:$0xff] }
 0x633   :  { %2088 = vmatprep.subr.bf16.mxu0 %v2331_v9  ;;  %2120 = vmatprep.subr.bf16.mxu1 %v2403_v33  ;;  %v1622_v33 = vld [vmem:[%s3032_s0 + $0xd8] sm:$0xff] }
 0x634   :  { %1449 = vmatprep.mubr.f32.mxu0 %v2276_v3  ;;  %1520 = vmatprep.mubr.f32.mxu1 %v2276_v3  ;;  %v1619_v3 = vld [vmem:[%s3032_s0 + $0xc0] sm:$0xff] }
 0x635   :  { %v1200_v9 = vadd.f32 %v1619_v3, %v2638_v56  ;;  %v1629_v56 = vld [vmem:[%s3032_s0 + $0xf0] sm:$0xff] }
 0x636   :  { %2090 = vmatpush1.bf16.msra.mxu0 %v2347_v14  ;;  %2122 = vmatpush1.bf16.msra.mxu1 %v2414_v37  ;;  %v1201_v14 = vadd.f32 %v1620_v8, %v2643_v59  ;;  %v1383_v1 = vadd.f32 %v1629_v56, %v2656_v23 }
 0x637   :  { %2092 = vmatprep.subr.bf16.mxu0 %v2356_v17  ;;  %2124 = vmatprep.subr.bf16.mxu1 %v2438_v45 }
 0x63a   :  { %2094 = vmatpush1.bf16.msra.mxu0 %v2381_v26  ;;  %2126 = vmatpush1.bf16.msra.mxu1 %v2447_v48  ;;  %v1203_v48 = vadd.f32 %v1622_v33, %v2650_v2 }
 0x63b   :  { %2096 = vmatprep.subr.bf16.mxu0 %v2394_v30  ;;  %2128 = vmatprep.subr.bf16.mxu1 %v2459_v52  ;;  %v1621_v52 = vld [vmem:[%s3032_s0 + $0xd0] sm:$0xff] }
 0x63e   :  { %2098 = vmatpush1.bf16.msra.mxu0 %v2430_v42  ;;  %2130 = vmatpush1.bf16.msra.mxu1 %v2489_v62 }
 0x63f   :  { %2100 = vmatprep.subr.bf16.mxu0 %v2441_v46  ;;  %2132 = vmatprep.subr.bf16.mxu1 %v2495_v0 }
 0x642   :  { %2102 = vmatpush1.bf16.msra.mxu0 %v2468_v55  ;;  %2134 = vmatpush1.bf16.msra.mxu1 %v2525_v15 }
 0x643   :  { %2104 = vmatprep.subr.bf16.mxu0 %v2477_v58  ;;  %2136 = vmatprep.subr.bf16.mxu1 %v2531_v18  ;;  %v1202_v58 = vadd.f32 %v1621_v52, %v2656_v23 }
 0x646   :  { %2106 = vmatpush1.bf16.msra.mxu0 %v2510_v7  ;;  %2138 = vmatpush1.bf16.msra.mxu1 %v2558_v31 }
 0x647   :  { %2108 = vmatprep.subr.bf16.mxu0 %v2513_v10  ;;  %2140 = vmatprep.subr.bf16.mxu1 %v2561_v32 }
 0x64a   :  { %2110 = vmatpush1.bf16.msra.mxu0 %v2546_v24  ;;  %2142 = vmatpush1.bf16.msra.mxu1 %v2580_v40 }
 0x64b   :  { %2112 = vmatprep.subr.bf16.mxu0 %v2549_v27  ;;  %2144 = vmatprep.subr.bf16.mxu1 %v2583_v41 }
 0x64e   :  { %2114 = vmatpush1.bf16.msra.mxu0 %v2576_v39  ;;  %2146 = vmatpush1.bf16.msra.mxu1 %v2593_v47 }
 0x704   :  { %v1270_v17 = vpop.f32.mrb[12].mxu0  ;;  %v1341_v25 = vpop.f32.mrb[12].mxu1 }
 0x705   :  { %v1346_v26 = vadd.f32 %v1270_v17, %v1200_v9  ;;  %v1272_v30 = vpop.f32.mrb[13].mxu0  ;;  %v1343_v37 = vpop.f32.mrb[13].mxu1  ;;  %v1348_v0 = vadd.f32 %v1341_v25, %v1202_v58 }
 0x706   :  { %v1347_v42 = vadd.f32 %v1272_v30, %v1201_v14  ;;  %v1349_v55 = vadd.f32 %v1343_v37, %v1203_v48 }
 0x707   :  { %v1623_v45 = vmul.f32 -1.442695, %v1346_v26 }
 0x708   :  { %v1624_v46 = vmul.f32 -1.442695, %v1347_v42  ;;  %v1625_v62 = vmul.f32 -1.442695, %v1349_v55 }
 0x709   :  { %2244 = vpow2.f32 %v1623_v45 }
 0x70a   :  { %2246 = vpow2.f32 %v1624_v46 }
 0x70b   :  { %2248 = vpow2.f32 %v1625_v62 }
 0x70c   :  { %2250 = vtanh.f32 %v1348_v0 }
 0x713   :  { %v2245_v7 = vpop.eup %2244 }
 0x714   :  { %v2247_v10 = vpop.eup %2246  ;;  %v1353_v15 = vadd.f32 1.0, %v2245_v7 }
 0x715   :  { %v1359_v18 = vadd.f32 1.0, %v2247_v10  ;;  %v2249_v24 = vpop.eup %2248 }
 0x716   :  { %2252 = vrcp.f32 %v1353_v15  ;;  %v2251_v27 = vpop.eup %2250  ;;  %v1366_v40 = vadd.f32 1.0, %v2249_v24 }
 0x717   :  { %2254 = vrcp.f32 %v1359_v18 }
 0x718   :  { %2256 = vrcp.f32 %v1366_v40 }
 0x720   :  { %v2253_v31 = vpop.eup %2252 }
 0x721   :  { %v2255_v32 = vpop.eup %2254  ;;  %v1370_v39 = vmul.f32 %v2253_v31, %v2251_v27 }
 0x722   :  { %v1369_v41 = vmul.f32 %v2255_v32, %v2947_v28  ;;  %v2257_v12 = vpop.eup %2256 }
 0x724   :  { %v1371_v47 = vadd.f32 %v1370_v39, %v1369_v41 }
 0x726   :  { %2258 = vtanh.f32 %v1371_v47 }
 0x730   :  { %v2259_v35 = vpop.eup %2258 }
 0x731   :  { %v1373_v36 = vmul.f32 %v2259_v35, %v2257_v12 }
 0x733   :  { %1626 = vst [vmem:[%s3033_s3 + $0x30] sm:$0xff] %v1373_v36  ;;  %1450 = vmatmul.mubr.f32.vlgmr.msra.gmra.mrb[14].mxu0 %v1373_v36  ;;  %1521 = vmatmul.mubr.f32.vlgmr.msra.gmra.mrb[14].mxu1 %v1373_v36 }
 0x806   :  { %v1451_v49 = vpop.f32.mrb[14].mxu0  ;;  %v1522_v50 = vpop.f32.mrb[14].mxu1 }
 0x807   :  { %v1527_v21 = vadd.f32 %v1451_v49, %v1381_v38  ;;  %v1453_v51 = vpop.f32.mrb[15].mxu0  ;;  %v1524_v54 = vpop.f32.mrb[15].mxu1  ;;  %v1529_v11 = vadd.f32 %v1522_v50, %v1383_v1 }
 0x808   :  { %v1528_v60 = vadd.f32 %v1453_v51, %v1382_v44  ;;  %v1530_v59 = vadd.f32 %v1524_v54, %v1384_v43 }
 0x809   :  { %v1631_v61 = vmul.f32 -1.442695, %v1527_v21 }
 0x80a   :  { %v1632_v63 = vmul.f32 -1.442695, %v1528_v60  ;;  %v1633_v6 = vmul.f32 -1.442695, %v1530_v59 }
 0x80b   :  { %2260 = vpow2.f32 %v1631_v61 }
 0x80c   :  { %2262 = vpow2.f32 %v1632_v63 }
 0x80d   :  { %2264 = vpow2.f32 %v1633_v6 }
 0x80e   :  { %2266 = vtanh.f32 %v1529_v11 }
 0x815   :  { %v2261_v13 = vpop.eup %2260 }
 0x816   :  { %v2263_v16 = vpop.eup %2262  ;;  %v1534_v19 = vadd.f32 1.0, %v2261_v13 }
 0x817   :  { %v1540_v57 = vadd.f32 1.0, %v2263_v16  ;;  %v2265_v2 = vpop.eup %2264 }
 0x818   :  { %2268 = vrcp.f32 %v1534_v19  ;;  %v2267_v20 = vpop.eup %2266  ;;  %v1547_v5 = vadd.f32 1.0, %v2265_v2 }
 0x819   :  { %2270 = vrcp.f32 %v1540_v57 }
 0x81a   :  { %2272 = vrcp.f32 %v1547_v5 }
 0x822   :  { %v2269_v28 = vpop.eup %2268 }
 0x823   :  { %v2271_v29 = vpop.eup %2270  ;;  %v1551_v34 = vmul.f32 %v2269_v28, %v2267_v20 }
 0x824   :  { %v1550_v3 = vmul.f32 %v2271_v29, %v1371_v47  ;;  %v2273_v23 = vpop.eup %2272 }
 0x826   :  { %v1552_v8 = vadd.f32 %v1551_v34, %v1550_v3 }
 0x828   :  { %2274 = vtanh.f32 %v1552_v8  ;;  %1563 = vst [vmem:[%s3034_s5] sm:$0xff] %v1552_v8 }
 0x832   :  { %v2275_v9 = vpop.eup %2274 }
 0x833   :  { %v1554_v14 = vmul.f32 %v2275_v9, %v2273_v23 }
 0x835   :  { %1634 = vst [vmem:[%s3033_s3 + $0x38] sm:$0xff] %v1554_v14  ;;  %1562 = vst [vmem:[%s3035_s4] sm:$0xff] %v1554_v14 }

</bundles_post_ra>
